<compile_context>
chip_gen: v6e
topology: v6e:2x2x1
jax: 0.10.0
libtpu: 0.0.40
codegen_flags: <defaults>
</compile_context>

<pallas_src>
import jax
import jax.numpy as jnp
from jax import lax
from jax.experimental import pallas as pl
from jax.experimental.pallas import tpu as pltpu


# ---------------------------------------------------------------------------
# Pallas kernel: whole forward pass for one batch tile (B images) per grid step.
# ---------------------------------------------------------------------------
def fused_forward_kernel(
    x_ref,                                   # (B, 28, 28) input images
    t1_ref, b1_ref, s1we_ref, s1wo_ref, p1he_ref, p1ho_ref, r2_ref,
    t2_ref, b2_ref, s2we_ref, s2wo_ref, p2he_ref, p2ho_ref,
    rfc_ref, wf1_ref, bf1_ref, wf2_ref, bf2_ref,
    o_ref,                                   # (B, 10) logits
):
    f32 = jnp.float32
    bt = x_ref.shape[0]
    x = x_ref[...]                           # (B, 28, 28)

    # ---- conv1 (norm1 folded): 5 row-Toeplitz matmuls on batch-merged slabs --
    acc1 = jnp.zeros((bt * 24, 240), dtype=f32)
    for i in range(5):
        xs = x[:, i:i + 24, :].reshape(bt * 24, 28)       # rows = b*24 + oh
        acc1 = acc1 + jnp.dot(xs, t1_ref[i], preferred_element_type=f32)
    acc1 = acc1 + b1_ref[...]                # (B*24, 240), lanes = ow*10 + co

    # ---- 2x2 max-pool (exact 0/1 selection matmuls) + ReLU --------------------
    pw1 = jnp.maximum(
        jnp.dot(acc1, s1we_ref[...], preferred_element_type=f32),
        jnp.dot(acc1, s1wo_ref[...], preferred_element_type=f32))        # (B*24, 120)
    a1 = jnp.maximum(
        jnp.dot(p1he_ref[...], pw1, preferred_element_type=f32),
        jnp.dot(p1ho_ref[...], pw1, preferred_element_type=f32))         # (B*12, 120)
    a1 = jnp.maximum(a1, 0.0)                # rows = b*12 + h, lanes = w*10 + ci

    # ---- conv2 (norm2 folded); Dropout2d is identity in eval mode ------------
    acc2 = jnp.zeros((bt * 8, 160), dtype=f32)
    for i in range(5):
        rows = jnp.dot(r2_ref[i], a1, preferred_element_type=f32)        # (B*8, 120)
        acc2 = acc2 + jnp.dot(rows, t2_ref[i], preferred_element_type=f32)
    acc2 = acc2 + b2_ref[...]                # (B*8, 160), lanes = ow*20 + co

    pw2 = jnp.maximum(
        jnp.dot(acc2, s2we_ref[...], preferred_element_type=f32),
        jnp.dot(acc2, s2wo_ref[...], preferred_element_type=f32))        # (B*8, 80)
    a2 = jnp.maximum(
        jnp.dot(p2he_ref[...], pw2, preferred_element_type=f32),
        jnp.dot(p2ho_ref[...], pw2, preferred_element_type=f32))         # (B*4, 80)
    a2 = jnp.maximum(a2, 0.0)                # rows = b*4 + h, lanes = w*20 + c

    # ---- fc1 (norm4 folded): torch view(-1, 320) flatten absorbed into
    #      per-spatial-row weight slabs; rows gathered with 0/1 matmuls --------
    hid = jnp.zeros((bt, 50), dtype=f32)
    for r in range(4):
        rows = jnp.dot(rfc_ref[r], a2, preferred_element_type=f32)       # (B, 80)
        hid = hid + jnp.dot(rows, wf1_ref[r], preferred_element_type=f32)
    hid = hid + bf1_ref[...]                 # (B, 50)

    # ---- fc2 (norm5 folded) ----------------------------------------------------
    o_ref[...] = jnp.dot(hid, wf2_ref[...], preferred_element_type=f32) + bf2_ref[...]


# ---------------------------------------------------------------------------
# One-time parameter preparation (plain JAX, runs once outside the kernel).
# ---------------------------------------------------------------------------
def bn_scale_shift(gamma, beta, mean, var, eps=1e-5):
    s = gamma / jnp.sqrt(var + eps)
    return s, beta - mean * s


def make_row_toeplitz(w, w_in, w_out):
    """w: folded conv weight (Cout, Cin, KH, KW).

    Returns T of shape (KH, w_in*Cin, w_out*Cout) with
    T[i, wi*Cin+ci, wo*Cout+co] = w[co, ci, i, wi-wo]  for 0 <= wi-wo < KW,
    so that a 'valid' conv becomes  out_row(oh) = sum_i x_row(oh+i) @ T[i].
    """
    cout, cin, kh, kw = w.shape
    wi = jnp.arange(w_in)
    wo = jnp.arange(w_out)
    d = wi[:, None] - wo[None, :]                    # (w_in, w_out)
    valid = (d >= 0) & (d < kw)
    dcl = jnp.clip(d, 0, kw - 1)
    wt = jnp.transpose(w, (2, 3, 1, 0))              # (KH, KW, Cin, Cout)
    g = wt[:, dcl, :, :]                             # (KH, w_in, w_out, Cin, Cout)
    g = jnp.where(valid[None, :, :, None, None], g, 0.0)
    g = jnp.transpose(g, (0, 1, 3, 2, 4))            # (KH, w_in, Cin, w_out, Cout)
    return g.reshape(kh, w_in * cin, w_out * cout).astype(jnp.float32)


def make_pool_w_select(w, c):
    """0/1 matrices (W*C, (W//2)*C) selecting even / odd spatial columns."""
    i_in = jnp.arange(w * c)
    i_out = jnp.arange((w // 2) * c)
    w_in, c_in = i_in // c, i_in % c
    w_out, c_out = i_out // c, i_out % c
    same_c = c_in[:, None] == c_out[None, :]
    se = ((w_in[:, None] == 2 * w_out[None, :]) & same_c).astype(jnp.float32)
    so = ((w_in[:, None] == 2 * w_out[None, :] + 1) & same_c).astype(jnp.float32)
    return se, so


def make_pool_h_select(h):
    """0/1 matrices (H//2, H) selecting even / odd spatial rows (left-multiply)."""
    r = jnp.arange(h // 2)
    c = jnp.arange(h)
    se = (c[None, :] == 2 * r[:, None]).astype(jnp.float32)
    so = (c[None, :] == 2 * r[:, None] + 1).astype(jnp.float32)
    return se, so


def make_shift_select(rows_out, rows_in, shift):
    """0/1 matrix (rows_out, rows_in) picking input row r+shift for output row r."""
    r = jnp.arange(rows_out)[:, None]
    k = jnp.arange(rows_in)[None, :]
    return (k == r + shift).astype(jnp.float32)


def prepare_params(p, b_tile=8):
    # Fold eval-mode BatchNorm into the adjacent conv / fc weights and biases.
    s1, t1 = bn_scale_shift(*p["bn1"])
    s2, t2 = bn_scale_shift(*p["bn2"])
    s4, t4 = bn_scale_shift(*p["bn4"])
    s5, t5 = bn_scale_shift(*p["bn5"])

    w1 = p["conv1_w"] * s1[None, :, None, None]
    b1 = p["conv1_b"] + jnp.sum(p["conv1_w"] * t1[None, :, None, None], axis=(1, 2, 3))
    w2 = p["conv2_w"] * s2[None, :, None, None]
    b2 = p["conv2_b"] + jnp.sum(p["conv2_w"] * t2[None, :, None, None], axis=(1, 2, 3))
    fw1 = p["fc1_w"] * s4[None, :]
    fb1 = p["fc1_b"] + p["fc1_w"] @ t4
    fw2 = p["fc2_w"] * s5[None, :]
    fb2 = p["fc2_b"] + p["fc2_w"] @ t5

    s1we, s1wo = make_pool_w_select(24, 10)
    s1he, s1ho = make_pool_h_select(24)
    s2we, s2wo = make_pool_w_select(8, 20)
    s2he, s2ho = make_pool_h_select(8)

    eye_b = jnp.eye(b_tile, dtype=jnp.float32)
    blockdiag = lambda m: jnp.kron(eye_b, m.astype(jnp.float32))

    # conv2 per-image row-shift selectors and fc1 per-spatial-row gatherers.
    r2 = jnp.stack([blockdiag(make_shift_select(8, 12, i)) for i in range(5)])
    rfc = jnp.stack(
        [blockdiag((jnp.arange(4) == h).astype(jnp.float32).reshape(1, 4))
         for h in range(4)])

    # fc1 columns reindexed from torch (C, H, W) flatten order into per-spatial-row
    # (W, C) slabs matching the kernel's activation layout.
    wf1 = jnp.transpose(fw1.reshape(50, 20, 4, 4), (2, 3, 1, 0)).reshape(4, 80, 50)

    return dict(
        T1=make_row_toeplitz(w1, 28, 24),                       # (5, 28, 240)
        b1=jnp.tile(b1, 24).reshape(1, 240).astype(jnp.float32),
        S1we=s1we, S1wo=s1wo,                                   # (240, 120)
        P1he=blockdiag(s1he), P1ho=blockdiag(s1ho),             # (B*12, B*24)
        R2=r2,                                                  # (5, B*8, B*12)
        T2=make_row_toeplitz(w2, 12, 8),                        # (5, 120, 160)
        b2=jnp.tile(b2, 8).reshape(1, 160).astype(jnp.float32),
        S2we=s2we, S2wo=s2wo,                                   # (160, 80)
        P2he=blockdiag(s2he), P2ho=blockdiag(s2ho),             # (B*4, B*8)
        Rfc=rfc,                                                # (4, B, B*4)
        Wf1=wf1.astype(jnp.float32),                            # (4, 80, 50)
        bf1=fb1.reshape(1, 50).astype(jnp.float32),
        Wf2=jnp.transpose(fw2).astype(jnp.float32),             # (50, 10)
        bf2=fb2.reshape(1, 10).astype(jnp.float32),
    )


CONST_ORDER = ("T1", "b1", "S1we", "S1wo", "P1he", "P1ho", "R2",
               "T2", "b2", "S2we", "S2wo", "P2he", "P2ho",
               "Rfc", "Wf1", "bf1", "Wf2", "bf2")


# ---------------------------------------------------------------------------
# Forward pass: one fused pallas_call, grid over batch tiles of b_tile images.
# ---------------------------------------------------------------------------
def classifier_forward(x_nchw, prep):
    b_tile = prep["Rfc"].shape[1]
    n = x_nchw.shape[0]
    x3 = x_nchw.reshape(n, 28, 28).astype(jnp.float32)    # Cin == 1
    n_pad = -(-n // b_tile) * b_tile
    if n_pad != n:
        x3 = jnp.pad(x3, ((0, n_pad - n), (0, 0), (0, 0)))

    consts = [prep[k] for k in CONST_ORDER]

    def const_spec(a):
        nd = a.ndim
        return pl.BlockSpec(a.shape, lambda i, _nd=nd: (0,) * _nd)

    out = pl.pallas_call(
        fused_forward_kernel,
        out_shape=jax.ShapeDtypeStruct((n_pad, 10), jnp.float32),
        grid=(n_pad // b_tile,),
        in_specs=[pl.BlockSpec((b_tile, 28, 28), lambda i: (i, 0, 0))]
                 + [const_spec(a) for a in consts],
        out_specs=pl.BlockSpec((b_tile, 10), lambda i: (i, 0)),
        compiler_params=pltpu.CompilerParams(dimension_semantics=("parallel",)),
    )(x3, *consts)
    return out[:n]


# ---------------------------------------------------------------------------
# Pure-JAX reference (eval-mode semantics) for correctness checking.
# ---------------------------------------------------------------------------
def reference_forward(x_nchw, p, eps=1e-5):
    hp = lax.Precision.HIGHEST

    def bn(x, g, b, m, v, axis):
        shape = [1] * x.ndim
        shape[axis] = -1
        s = g / jnp.sqrt(v + eps)
        return x * s.reshape(shape) + (b - m * s).reshape(shape)

    x = x_nchw.astype(jnp.float32)
    n = x.shape[0]
    x = bn(x, *p["bn1"], axis=1)
    y = lax.conv_general_dilated(x, p["conv1_w"], (1, 1), "VALID",
                                 dimension_numbers=("NCHW", "OIHW", "NCHW"),
                                 precision=hp) + p["conv1_b"].reshape(1, -1, 1, 1)
    y = y.reshape(n, 10, 12, 2, 12, 2).max(axis=(3, 5))
    y = jax.nn.relu(y)
    y = bn(y, *p["bn2"], axis=1)
    y = lax.conv_general_dilated(y, p["conv2_w"], (1, 1), "VALID",
                                 dimension_numbers=("NCHW", "OIHW", "NCHW"),
                                 precision=hp) + p["conv2_b"].reshape(1, -1, 1, 1)
    y = y.reshape(n, 20, 4, 2, 4, 2).max(axis=(3, 5))
    y = jax.nn.relu(y)
    f = y.reshape(n, 320)
    f = bn(f, *p["bn4"], axis=1)
    h = jnp.dot(f, p["fc1_w"].T, precision=hp) + p["fc1_b"]
    h = bn(h, *p["bn5"], axis=1)
    return jnp.dot(h, p["fc2_w"].T, precision=hp) + p["fc2_b"]


# ---------------------------------------------------------------------------
# Deterministic parameter init (shapes from classifier.__init__).
# ---------------------------------------------------------------------------
def init_params(key):
    ks = jax.random.split(key, 20)

    def normal(k, shape, s=0.1):
        return s * jax.random.normal(k, shape, dtype=jnp.float32)

    def bn(kg, kb, km, c):
        gamma = 1.0 + 0.1 * jax.random.normal(kg, (c,), dtype=jnp.float32)
        beta = 0.1 * jax.random.normal(kb, (c,), dtype=jnp.float32)
        mean = 0.1 * jax.random.normal(km, (c,), dtype=jnp.float32)
        var = jnp.ones((c,), dtype=jnp.float32)
        return (gamma, beta, mean, var)

    return {
        "conv1_w": normal(ks[0], (10, 1, 5, 5)),
        "conv1_b": normal(ks[1], (10,)),
        "conv2_w": normal(ks[2], (20, 10, 5, 5)),
        "conv2_b": normal(ks[3], (20,)),
        "fc1_w": normal(ks[4], (50, 320)),
        "fc1_b": normal(ks[5], (50,)),
        "fc2_w": normal(ks[6], (10, 50)),
        "fc2_b": normal(ks[7], (10,)),
        "bn1": bn(ks[8], ks[9], ks[10], 1),
        "bn2": bn(ks[11], ks[12], ks[13], 10),
        "bn4": bn(ks[14], ks[15], ks[16], 320),
        "bn5": bn(ks[17], ks[18], ks[19], 50),
    }


if __name__ == "__main__":
    key = jax.random.PRNGKey(0)
    pkey, xkey = jax.random.split(key)
    params = init_params(pkey)
    prep = prepare_params(params, b_tile=8)   # one-time: BN folding + weight re-layout

    # MNIST-shaped input (the 320-wide flatten requires 28x28), small batch.
    x = jax.random.normal(xkey, (2, 1, 28, 28), dtype=jnp.float32)

    logits = jax.jit(classifier_forward)(x, prep)
    jax.block_until_ready(logits)
    assert logits.shape == (2, 10) and logits.dtype == jnp.float32
    assert bool(jnp.all(jnp.isfinite(logits)))

    ref = reference_forward(x, params)
    max_err = float(jnp.max(jnp.abs(logits - ref)))
    assert max_err < 0.2, f"mismatch vs reference: max abs err = {max_err}"

    print("KERNEL_OK")
</pallas_src>

<mosaic_0001>
module attributes {stable_mosaic.version = 11 : i64} {
  func.func @fused_forward_kernel(%arg0: i32, %arg1: memref<8x28x28xf32, #tpu.memory_space<vmem>>, %arg2: memref<5x28x240xf32, #tpu.memory_space<vmem>>, %arg3: memref<1x240xf32, #tpu.memory_space<vmem>>, %arg4: memref<240x120xf32, #tpu.memory_space<vmem>>, %arg5: memref<240x120xf32, #tpu.memory_space<vmem>>, %arg6: memref<96x192xf32, #tpu.memory_space<vmem>>, %arg7: memref<96x192xf32, #tpu.memory_space<vmem>>, %arg8: memref<5x64x96xf32, #tpu.memory_space<vmem>>, %arg9: memref<5x120x160xf32, #tpu.memory_space<vmem>>, %arg10: memref<1x160xf32, #tpu.memory_space<vmem>>, %arg11: memref<160x80xf32, #tpu.memory_space<vmem>>, %arg12: memref<160x80xf32, #tpu.memory_space<vmem>>, %arg13: memref<32x64xf32, #tpu.memory_space<vmem>>, %arg14: memref<32x64xf32, #tpu.memory_space<vmem>>, %arg15: memref<4x8x32xf32, #tpu.memory_space<vmem>>, %arg16: memref<4x80x50xf32, #tpu.memory_space<vmem>>, %arg17: memref<1x50xf32, #tpu.memory_space<vmem>>, %arg18: memref<50x10xf32, #tpu.memory_space<vmem>>, %arg19: memref<1x10xf32, #tpu.memory_space<vmem>>, %arg20: memref<8x10xf32, #tpu.memory_space<vmem>>) attributes {dimension_semantics = [#tpu.dimension_semantics<parallel>], iteration_bounds = array<i64: 1>, scalar_prefetch = 0 : i64, scratch_operands = 0 : i64, tpu.core_type = #tpu.core_type<tc>, window_params = [{transform_indices = @transform_0, window_bounds = array<i64: 8, 28, 28>}, {pipeline_mode = #tpu.pipeline_mode<synchronous>, transform_indices = @transform_1, window_bounds = array<i64: 5, 28, 240>}, {pipeline_mode = #tpu.pipeline_mode<synchronous>, transform_indices = @transform_2, window_bounds = array<i64: 1, 240>}, {pipeline_mode = #tpu.pipeline_mode<synchronous>, transform_indices = @transform_3, window_bounds = array<i64: 240, 120>}, {pipeline_mode = #tpu.pipeline_mode<synchronous>, transform_indices = @transform_4, window_bounds = array<i64: 240, 120>}, {pipeline_mode = #tpu.pipeline_mode<synchronous>, transform_indices = @transform_5, window_bounds = array<i64: 96, 192>}, {pipeline_mode = #tpu.pipeline_mode<synchronous>, transform_indices = @transform_6, window_bounds = array<i64: 96, 192>}, {pipeline_mode = #tpu.pipeline_mode<synchronous>, transform_indices = @transform_7, window_bounds = array<i64: 5, 64, 96>}, {pipeline_mode = #tpu.pipeline_mode<synchronous>, transform_indices = @transform_8, window_bounds = array<i64: 5, 120, 160>}, {pipeline_mode = #tpu.pipeline_mode<synchronous>, transform_indices = @transform_9, window_bounds = array<i64: 1, 160>}, {pipeline_mode = #tpu.pipeline_mode<synchronous>, transform_indices = @transform_10, window_bounds = array<i64: 160, 80>}, {pipeline_mode = #tpu.pipeline_mode<synchronous>, transform_indices = @transform_11, window_bounds = array<i64: 160, 80>}, {pipeline_mode = #tpu.pipeline_mode<synchronous>, transform_indices = @transform_12, window_bounds = array<i64: 32, 64>}, {pipeline_mode = #tpu.pipeline_mode<synchronous>, transform_indices = @transform_13, window_bounds = array<i64: 32, 64>}, {pipeline_mode = #tpu.pipeline_mode<synchronous>, transform_indices = @transform_14, window_bounds = array<i64: 4, 8, 32>}, {pipeline_mode = #tpu.pipeline_mode<synchronous>, transform_indices = @transform_15, window_bounds = array<i64: 4, 80, 50>}, {pipeline_mode = #tpu.pipeline_mode<synchronous>, transform_indices = @transform_16, window_bounds = array<i64: 1, 50>}, {pipeline_mode = #tpu.pipeline_mode<synchronous>, transform_indices = @transform_17, window_bounds = array<i64: 50, 10>}, {pipeline_mode = #tpu.pipeline_mode<synchronous>, transform_indices = @transform_18, window_bounds = array<i64: 1, 10>}, {transform_indices = @transform_19, window_bounds = array<i64: 8, 10>}]} {
    %c0 = arith.constant 0 : index
    %c0_0 = arith.constant 0 : index
    %c0_1 = arith.constant 0 : index
    %0 = vector.load %arg1[%c0, %c0_0, %c0_1] : memref<8x28x28xf32, #tpu.memory_space<vmem>>, vector<8x28x28xf32>
    %cst = arith.constant 0.000000e+00 : f32
    %1 = vector.broadcast %cst : f32 to vector<192x240xf32>
    %2 = vector.extract_strided_slice %0 {offsets = [0, 0, 0], sizes = [8, 24, 28], strides = [1, 1, 1]} : vector<8x28x28xf32> to vector<8x24x28xf32>
    %3 = vector.shape_cast %2 : vector<8x24x28xf32> to vector<192x28xf32>
    %c0_2 = arith.constant 0 : index
    %c0_3 = arith.constant 0 : index
    %c0_4 = arith.constant 0 : index
    %4 = vector.load %arg2[%c0_2, %c0_3, %c0_4] : memref<5x28x240xf32, #tpu.memory_space<vmem>>, vector<1x28x240xf32>
    %5 = vector.shape_cast %4 : vector<1x28x240xf32> to vector<28x240xf32>
    %cst_5 = arith.constant dense<0.000000e+00> : vector<192x240xf32>
    %6 = tpu.matmul %3, %5, %cst_5 {dimension_numbers = #tpu.dot_dimension_numbers<[1], [0], [0], [1], [0, 0, 1, 1], [], []>} : vector<192x28xf32>, vector<28x240xf32>, vector<192x240xf32> -> vector<192x240xf32>
    %7 = arith.addf %1, %6 : vector<192x240xf32>
    %8 = vector.extract_strided_slice %0 {offsets = [0, 1, 0], sizes = [8, 24, 28], strides = [1, 1, 1]} : vector<8x28x28xf32> to vector<8x24x28xf32>
    %9 = vector.shape_cast %8 : vector<8x24x28xf32> to vector<192x28xf32>
    %c1 = arith.constant 1 : index
    %c0_6 = arith.constant 0 : index
    %c0_7 = arith.constant 0 : index
    %10 = vector.load %arg2[%c1, %c0_6, %c0_7] : memref<5x28x240xf32, #tpu.memory_space<vmem>>, vector<1x28x240xf32>
    %11 = vector.shape_cast %10 : vector<1x28x240xf32> to vector<28x240xf32>
    %cst_8 = arith.constant dense<0.000000e+00> : vector<192x240xf32>
    %12 = tpu.matmul %9, %11, %cst_8 {dimension_numbers = #tpu.dot_dimension_numbers<[1], [0], [0], [1], [0, 0, 1, 1], [], []>} : vector<192x28xf32>, vector<28x240xf32>, vector<192x240xf32> -> vector<192x240xf32>
    %13 = arith.addf %7, %12 : vector<192x240xf32>
    %14 = vector.extract_strided_slice %0 {offsets = [0, 2, 0], sizes = [8, 24, 28], strides = [1, 1, 1]} : vector<8x28x28xf32> to vector<8x24x28xf32>
    %15 = vector.shape_cast %14 : vector<8x24x28xf32> to vector<192x28xf32>
    %c2 = arith.constant 2 : index
    %c0_9 = arith.constant 0 : index
    %c0_10 = arith.constant 0 : index
    %16 = vector.load %arg2[%c2, %c0_9, %c0_10] : memref<5x28x240xf32, #tpu.memory_space<vmem>>, vector<1x28x240xf32>
    %17 = vector.shape_cast %16 : vector<1x28x240xf32> to vector<28x240xf32>
    %cst_11 = arith.constant dense<0.000000e+00> : vector<192x240xf32>
    %18 = tpu.matmul %15, %17, %cst_11 {dimension_numbers = #tpu.dot_dimension_numbers<[1], [0], [0], [1], [0, 0, 1, 1], [], []>} : vector<192x28xf32>, vector<28x240xf32>, vector<192x240xf32> -> vector<192x240xf32>
    %19 = arith.addf %13, %18 : vector<192x240xf32>
    %20 = vector.extract_strided_slice %0 {offsets = [0, 3, 0], sizes = [8, 24, 28], strides = [1, 1, 1]} : vector<8x28x28xf32> to vector<8x24x28xf32>
    %21 = vector.shape_cast %20 : vector<8x24x28xf32> to vector<192x28xf32>
    %c3 = arith.constant 3 : index
    %c0_12 = arith.constant 0 : index
    %c0_13 = arith.constant 0 : index
    %22 = vector.load %arg2[%c3, %c0_12, %c0_13] : memref<5x28x240xf32, #tpu.memory_space<vmem>>, vector<1x28x240xf32>
    %23 = vector.shape_cast %22 : vector<1x28x240xf32> to vector<28x240xf32>
    %cst_14 = arith.constant dense<0.000000e+00> : vector<192x240xf32>
    %24 = tpu.matmul %21, %23, %cst_14 {dimension_numbers = #tpu.dot_dimension_numbers<[1], [0], [0], [1], [0, 0, 1, 1], [], []>} : vector<192x28xf32>, vector<28x240xf32>, vector<192x240xf32> -> vector<192x240xf32>
    %25 = arith.addf %19, %24 : vector<192x240xf32>
    %26 = vector.extract_strided_slice %0 {offsets = [0, 4, 0], sizes = [8, 24, 28], strides = [1, 1, 1]} : vector<8x28x28xf32> to vector<8x24x28xf32>
    %27 = vector.shape_cast %26 : vector<8x24x28xf32> to vector<192x28xf32>
    %c4 = arith.constant 4 : index
    %c0_15 = arith.constant 0 : index
    %c0_16 = arith.constant 0 : index
    %28 = vector.load %arg2[%c4, %c0_15, %c0_16] : memref<5x28x240xf32, #tpu.memory_space<vmem>>, vector<1x28x240xf32>
    %29 = vector.shape_cast %28 : vector<1x28x240xf32> to vector<28x240xf32>
    %cst_17 = arith.constant dense<0.000000e+00> : vector<192x240xf32>
    %30 = tpu.matmul %27, %29, %cst_17 {dimension_numbers = #tpu.dot_dimension_numbers<[1], [0], [0], [1], [0, 0, 1, 1], [], []>} : vector<192x28xf32>, vector<28x240xf32>, vector<192x240xf32> -> vector<192x240xf32>
    %31 = arith.addf %25, %30 : vector<192x240xf32>
    %c0_18 = arith.constant 0 : index
    %c0_19 = arith.constant 0 : index
    %32 = vector.load %arg3[%c0_18, %c0_19] : memref<1x240xf32, #tpu.memory_space<vmem>>, vector<1x240xf32>
    %33 = vector.broadcast %32 : vector<1x240xf32> to vector<192x240xf32>
    %34 = arith.addf %31, %33 : vector<192x240xf32>
    %c0_20 = arith.constant 0 : index
    %c0_21 = arith.constant 0 : index
    %35 = vector.load %arg4[%c0_20, %c0_21] : memref<240x120xf32, #tpu.memory_space<vmem>>, vector<240x120xf32>
    %cst_22 = arith.constant dense<0.000000e+00> : vector<192x120xf32>
    %36 = tpu.matmul %34, %35, %cst_22 {dimension_numbers = #tpu.dot_dimension_numbers<[1], [0], [0], [1], [0, 0, 1, 1], [], []>} : vector<192x240xf32>, vector<240x120xf32>, vector<192x120xf32> -> vector<192x120xf32>
    %c0_23 = arith.constant 0 : index
    %c0_24 = arith.constant 0 : index
    %37 = vector.load %arg5[%c0_23, %c0_24] : memref<240x120xf32, #tpu.memory_space<vmem>>, vector<240x120xf32>
    %cst_25 = arith.constant dense<0.000000e+00> : vector<192x120xf32>
    %38 = tpu.matmul %34, %37, %cst_25 {dimension_numbers = #tpu.dot_dimension_numbers<[1], [0], [0], [1], [0, 0, 1, 1], [], []>} : vector<192x240xf32>, vector<240x120xf32>, vector<192x120xf32> -> vector<192x120xf32>
    %39 = arith.maximumf %36, %38 : vector<192x120xf32>
    %c0_26 = arith.constant 0 : index
    %c0_27 = arith.constant 0 : index
    %40 = vector.load %arg6[%c0_26, %c0_27] : memref<96x192xf32, #tpu.memory_space<vmem>>, vector<96x192xf32>
    %cst_28 = arith.constant dense<0.000000e+00> : vector<96x120xf32>
    %41 = tpu.matmul %40, %39, %cst_28 {dimension_numbers = #tpu.dot_dimension_numbers<[1], [0], [0], [1], [0, 0, 1, 1], [], []>} : vector<96x192xf32>, vector<192x120xf32>, vector<96x120xf32> -> vector<96x120xf32>
    %c0_29 = arith.constant 0 : index
    %c0_30 = arith.constant 0 : index
    %42 = vector.load %arg7[%c0_29, %c0_30] : memref<96x192xf32, #tpu.memory_space<vmem>>, vector<96x192xf32>
    %cst_31 = arith.constant dense<0.000000e+00> : vector<96x120xf32>
    %43 = tpu.matmul %42, %39, %cst_31 {dimension_numbers = #tpu.dot_dimension_numbers<[1], [0], [0], [1], [0, 0, 1, 1], [], []>} : vector<96x192xf32>, vector<192x120xf32>, vector<96x120xf32> -> vector<96x120xf32>
    %44 = arith.maximumf %41, %43 : vector<96x120xf32>
    %cst_32 = arith.constant 0.000000e+00 : f32
    %45 = vector.broadcast %cst_32 : f32 to vector<96x120xf32>
    %46 = arith.maximumf %44, %45 : vector<96x120xf32>
    %cst_33 = arith.constant 0.000000e+00 : f32
    %47 = vector.broadcast %cst_33 : f32 to vector<64x160xf32>
    %c0_34 = arith.constant 0 : index
    %c0_35 = arith.constant 0 : index
    %c0_36 = arith.constant 0 : index
    %48 = vector.load %arg8[%c0_34, %c0_35, %c0_36] : memref<5x64x96xf32, #tpu.memory_space<vmem>>, vector<1x64x96xf32>
    %49 = vector.shape_cast %48 : vector<1x64x96xf32> to vector<64x96xf32>
    %cst_37 = arith.constant dense<0.000000e+00> : vector<64x120xf32>
    %50 = tpu.matmul %49, %46, %cst_37 {dimension_numbers = #tpu.dot_dimension_numbers<[1], [0], [0], [1], [0, 0, 1, 1], [], []>} : vector<64x96xf32>, vector<96x120xf32>, vector<64x120xf32> -> vector<64x120xf32>
    %c0_38 = arith.constant 0 : index
    %c0_39 = arith.constant 0 : index
    %c0_40 = arith.constant 0 : index
    %51 = vector.load %arg9[%c0_38, %c0_39, %c0_40] : memref<5x120x160xf32, #tpu.memory_space<vmem>>, vector<1x120x160xf32>
    %52 = vector.shape_cast %51 : vector<1x120x160xf32> to vector<120x160xf32>
    %cst_41 = arith.constant dense<0.000000e+00> : vector<64x160xf32>
    %53 = tpu.matmul %50, %52, %cst_41 {dimension_numbers = #tpu.dot_dimension_numbers<[1], [0], [0], [1], [0, 0, 1, 1], [], []>} : vector<64x120xf32>, vector<120x160xf32>, vector<64x160xf32> -> vector<64x160xf32>
    %54 = arith.addf %47, %53 : vector<64x160xf32>
    %c1_42 = arith.constant 1 : index
    %c0_43 = arith.constant 0 : index
    %c0_44 = arith.constant 0 : index
    %55 = vector.load %arg8[%c1_42, %c0_43, %c0_44] : memref<5x64x96xf32, #tpu.memory_space<vmem>>, vector<1x64x96xf32>
    %56 = vector.shape_cast %55 : vector<1x64x96xf32> to vector<64x96xf32>
    %cst_45 = arith.constant dense<0.000000e+00> : vector<64x120xf32>
    %57 = tpu.matmul %56, %46, %cst_45 {dimension_numbers = #tpu.dot_dimension_numbers<[1], [0], [0], [1], [0, 0, 1, 1], [], []>} : vector<64x96xf32>, vector<96x120xf32>, vector<64x120xf32> -> vector<64x120xf32>
    %c1_46 = arith.constant 1 : index
    %c0_47 = arith.constant 0 : index
    %c0_48 = arith.constant 0 : index
    %58 = vector.load %arg9[%c1_46, %c0_47, %c0_48] : memref<5x120x160xf32, #tpu.memory_space<vmem>>, vector<1x120x160xf32>
    %59 = vector.shape_cast %58 : vector<1x120x160xf32> to vector<120x160xf32>
    %cst_49 = arith.constant dense<0.000000e+00> : vector<64x160xf32>
    %60 = tpu.matmul %57, %59, %cst_49 {dimension_numbers = #tpu.dot_dimension_numbers<[1], [0], [0], [1], [0, 0, 1, 1], [], []>} : vector<64x120xf32>, vector<120x160xf32>, vector<64x160xf32> -> vector<64x160xf32>
    %61 = arith.addf %54, %60 : vector<64x160xf32>
    %c2_50 = arith.constant 2 : index
    %c0_51 = arith.constant 0 : index
    %c0_52 = arith.constant 0 : index
    %62 = vector.load %arg8[%c2_50, %c0_51, %c0_52] : memref<5x64x96xf32, #tpu.memory_space<vmem>>, vector<1x64x96xf32>
    %63 = vector.shape_cast %62 : vector<1x64x96xf32> to vector<64x96xf32>
    %cst_53 = arith.constant dense<0.000000e+00> : vector<64x120xf32>
    %64 = tpu.matmul %63, %46, %cst_53 {dimension_numbers = #tpu.dot_dimension_numbers<[1], [0], [0], [1], [0, 0, 1, 1], [], []>} : vector<64x96xf32>, vector<96x120xf32>, vector<64x120xf32> -> vector<64x120xf32>
    %c2_54 = arith.constant 2 : index
    %c0_55 = arith.constant 0 : index
    %c0_56 = arith.constant 0 : index
    %65 = vector.load %arg9[%c2_54, %c0_55, %c0_56] : memref<5x120x160xf32, #tpu.memory_space<vmem>>, vector<1x120x160xf32>
    %66 = vector.shape_cast %65 : vector<1x120x160xf32> to vector<120x160xf32>
    %cst_57 = arith.constant dense<0.000000e+00> : vector<64x160xf32>
    %67 = tpu.matmul %64, %66, %cst_57 {dimension_numbers = #tpu.dot_dimension_numbers<[1], [0], [0], [1], [0, 0, 1, 1], [], []>} : vector<64x120xf32>, vector<120x160xf32>, vector<64x160xf32> -> vector<64x160xf32>
    %68 = arith.addf %61, %67 : vector<64x160xf32>
    %c3_58 = arith.constant 3 : index
    %c0_59 = arith.constant 0 : index
    %c0_60 = arith.constant 0 : index
    %69 = vector.load %arg8[%c3_58, %c0_59, %c0_60] : memref<5x64x96xf32, #tpu.memory_space<vmem>>, vector<1x64x96xf32>
    %70 = vector.shape_cast %69 : vector<1x64x96xf32> to vector<64x96xf32>
    %cst_61 = arith.constant dense<0.000000e+00> : vector<64x120xf32>
    %71 = tpu.matmul %70, %46, %cst_61 {dimension_numbers = #tpu.dot_dimension_numbers<[1], [0], [0], [1], [0, 0, 1, 1], [], []>} : vector<64x96xf32>, vector<96x120xf32>, vector<64x120xf32> -> vector<64x120xf32>
    %c3_62 = arith.constant 3 : index
    %c0_63 = arith.constant 0 : index
    %c0_64 = arith.constant 0 : index
    %72 = vector.load %arg9[%c3_62, %c0_63, %c0_64] : memref<5x120x160xf32, #tpu.memory_space<vmem>>, vector<1x120x160xf32>
    %73 = vector.shape_cast %72 : vector<1x120x160xf32> to vector<120x160xf32>
    %cst_65 = arith.constant dense<0.000000e+00> : vector<64x160xf32>
    %74 = tpu.matmul %71, %73, %cst_65 {dimension_numbers = #tpu.dot_dimension_numbers<[1], [0], [0], [1], [0, 0, 1, 1], [], []>} : vector<64x120xf32>, vector<120x160xf32>, vector<64x160xf32> -> vector<64x160xf32>
    %75 = arith.addf %68, %74 : vector<64x160xf32>
    %c4_66 = arith.constant 4 : index
    %c0_67 = arith.constant 0 : index
    %c0_68 = arith.constant 0 : index
    %76 = vector.load %arg8[%c4_66, %c0_67, %c0_68] : memref<5x64x96xf32, #tpu.memory_space<vmem>>, vector<1x64x96xf32>
    %77 = vector.shape_cast %76 : vector<1x64x96xf32> to vector<64x96xf32>
    %cst_69 = arith.constant dense<0.000000e+00> : vector<64x120xf32>
    %78 = tpu.matmul %77, %46, %cst_69 {dimension_numbers = #tpu.dot_dimension_numbers<[1], [0], [0], [1], [0, 0, 1, 1], [], []>} : vector<64x96xf32>, vector<96x120xf32>, vector<64x120xf32> -> vector<64x120xf32>
    %c4_70 = arith.constant 4 : index
    %c0_71 = arith.constant 0 : index
    %c0_72 = arith.constant 0 : index
    %79 = vector.load %arg9[%c4_70, %c0_71, %c0_72] : memref<5x120x160xf32, #tpu.memory_space<vmem>>, vector<1x120x160xf32>
    %80 = vector.shape_cast %79 : vector<1x120x160xf32> to vector<120x160xf32>
    %cst_73 = arith.constant dense<0.000000e+00> : vector<64x160xf32>
    %81 = tpu.matmul %78, %80, %cst_73 {dimension_numbers = #tpu.dot_dimension_numbers<[1], [0], [0], [1], [0, 0, 1, 1], [], []>} : vector<64x120xf32>, vector<120x160xf32>, vector<64x160xf32> -> vector<64x160xf32>
    %82 = arith.addf %75, %81 : vector<64x160xf32>
    %c0_74 = arith.constant 0 : index
    %c0_75 = arith.constant 0 : index
    %83 = vector.load %arg10[%c0_74, %c0_75] : memref<1x160xf32, #tpu.memory_space<vmem>>, vector<1x160xf32>
    %84 = vector.broadcast %83 : vector<1x160xf32> to vector<64x160xf32>
    %85 = arith.addf %82, %84 : vector<64x160xf32>
    %c0_76 = arith.constant 0 : index
    %c0_77 = arith.constant 0 : index
    %86 = vector.load %arg11[%c0_76, %c0_77] : memref<160x80xf32, #tpu.memory_space<vmem>>, vector<160x80xf32>
    %cst_78 = arith.constant dense<0.000000e+00> : vector<64x80xf32>
    %87 = tpu.matmul %85, %86, %cst_78 {dimension_numbers = #tpu.dot_dimension_numbers<[1], [0], [0], [1], [0, 0, 1, 1], [], []>} : vector<64x160xf32>, vector<160x80xf32>, vector<64x80xf32> -> vector<64x80xf32>
    %c0_79 = arith.constant 0 : index
    %c0_80 = arith.constant 0 : index
    %88 = vector.load %arg12[%c0_79, %c0_80] : memref<160x80xf32, #tpu.memory_space<vmem>>, vector<160x80xf32>
    %cst_81 = arith.constant dense<0.000000e+00> : vector<64x80xf32>
    %89 = tpu.matmul %85, %88, %cst_81 {dimension_numbers = #tpu.dot_dimension_numbers<[1], [0], [0], [1], [0, 0, 1, 1], [], []>} : vector<64x160xf32>, vector<160x80xf32>, vector<64x80xf32> -> vector<64x80xf32>
    %90 = arith.maximumf %87, %89 : vector<64x80xf32>
    %c0_82 = arith.constant 0 : index
    %c0_83 = arith.constant 0 : index
    %91 = vector.load %arg13[%c0_82, %c0_83] : memref<32x64xf32, #tpu.memory_space<vmem>>, vector<32x64xf32>
    %cst_84 = arith.constant dense<0.000000e+00> : vector<32x80xf32>
    %92 = tpu.matmul %91, %90, %cst_84 {dimension_numbers = #tpu.dot_dimension_numbers<[1], [0], [0], [1], [0, 0, 1, 1], [], []>} : vector<32x64xf32>, vector<64x80xf32>, vector<32x80xf32> -> vector<32x80xf32>
    %c0_85 = arith.constant 0 : index
    %c0_86 = arith.constant 0 : index
    %93 = vector.load %arg14[%c0_85, %c0_86] : memref<32x64xf32, #tpu.memory_space<vmem>>, vector<32x64xf32>
    %cst_87 = arith.constant dense<0.000000e+00> : vector<32x80xf32>
    %94 = tpu.matmul %93, %90, %cst_87 {dimension_numbers = #tpu.dot_dimension_numbers<[1], [0], [0], [1], [0, 0, 1, 1], [], []>} : vector<32x64xf32>, vector<64x80xf32>, vector<32x80xf32> -> vector<32x80xf32>
    %95 = arith.maximumf %92, %94 : vector<32x80xf32>
    %cst_88 = arith.constant 0.000000e+00 : f32
    %96 = vector.broadcast %cst_88 : f32 to vector<32x80xf32>
    %97 = arith.maximumf %95, %96 : vector<32x80xf32>
    %cst_89 = arith.constant 0.000000e+00 : f32
    %98 = vector.broadcast %cst_89 : f32 to vector<8x50xf32>
    %c0_90 = arith.constant 0 : index
    %c0_91 = arith.constant 0 : index
    %c0_92 = arith.constant 0 : index
    %99 = vector.load %arg15[%c0_90, %c0_91, %c0_92] : memref<4x8x32xf32, #tpu.memory_space<vmem>>, vector<1x8x32xf32>
    %100 = vector.shape_cast %99 : vector<1x8x32xf32> to vector<8x32xf32>
    %cst_93 = arith.constant dense<0.000000e+00> : vector<8x80xf32>
    %101 = tpu.matmul %100, %97, %cst_93 {dimension_numbers = #tpu.dot_dimension_numbers<[1], [0], [0], [1], [0, 0, 1, 1], [], []>} : vector<8x32xf32>, vector<32x80xf32>, vector<8x80xf32> -> vector<8x80xf32>
    %c0_94 = arith.constant 0 : index
    %c0_95 = arith.constant 0 : index
    %c0_96 = arith.constant 0 : index
    %102 = vector.load %arg16[%c0_94, %c0_95, %c0_96] : memref<4x80x50xf32, #tpu.memory_space<vmem>>, vector<1x80x50xf32>
    %103 = vector.shape_cast %102 : vector<1x80x50xf32> to vector<80x50xf32>
    %cst_97 = arith.constant dense<0.000000e+00> : vector<8x50xf32>
    %104 = tpu.matmul %101, %103, %cst_97 {dimension_numbers = #tpu.dot_dimension_numbers<[1], [0], [0], [1], [0, 0, 1, 1], [], []>} : vector<8x80xf32>, vector<80x50xf32>, vector<8x50xf32> -> vector<8x50xf32>
    %105 = arith.addf %98, %104 : vector<8x50xf32>
    %c1_98 = arith.constant 1 : index
    %c0_99 = arith.constant 0 : index
    %c0_100 = arith.constant 0 : index
    %106 = vector.load %arg15[%c1_98, %c0_99, %c0_100] : memref<4x8x32xf32, #tpu.memory_space<vmem>>, vector<1x8x32xf32>
    %107 = vector.shape_cast %106 : vector<1x8x32xf32> to vector<8x32xf32>
    %cst_101 = arith.constant dense<0.000000e+00> : vector<8x80xf32>
    %108 = tpu.matmul %107, %97, %cst_101 {dimension_numbers = #tpu.dot_dimension_numbers<[1], [0], [0], [1], [0, 0, 1, 1], [], []>} : vector<8x32xf32>, vector<32x80xf32>, vector<8x80xf32> -> vector<8x80xf32>
    %c1_102 = arith.constant 1 : index
    %c0_103 = arith.constant 0 : index
    %c0_104 = arith.constant 0 : index
    %109 = vector.load %arg16[%c1_102, %c0_103, %c0_104] : memref<4x80x50xf32, #tpu.memory_space<vmem>>, vector<1x80x50xf32>
    %110 = vector.shape_cast %109 : vector<1x80x50xf32> to vector<80x50xf32>
    %cst_105 = arith.constant dense<0.000000e+00> : vector<8x50xf32>
    %111 = tpu.matmul %108, %110, %cst_105 {dimension_numbers = #tpu.dot_dimension_numbers<[1], [0], [0], [1], [0, 0, 1, 1], [], []>} : vector<8x80xf32>, vector<80x50xf32>, vector<8x50xf32> -> vector<8x50xf32>
    %112 = arith.addf %105, %111 : vector<8x50xf32>
    %c2_106 = arith.constant 2 : index
    %c0_107 = arith.constant 0 : index
    %c0_108 = arith.constant 0 : index
    %113 = vector.load %arg15[%c2_106, %c0_107, %c0_108] : memref<4x8x32xf32, #tpu.memory_space<vmem>>, vector<1x8x32xf32>
    %114 = vector.shape_cast %113 : vector<1x8x32xf32> to vector<8x32xf32>
    %cst_109 = arith.constant dense<0.000000e+00> : vector<8x80xf32>
    %115 = tpu.matmul %114, %97, %cst_109 {dimension_numbers = #tpu.dot_dimension_numbers<[1], [0], [0], [1], [0, 0, 1, 1], [], []>} : vector<8x32xf32>, vector<32x80xf32>, vector<8x80xf32> -> vector<8x80xf32>
    %c2_110 = arith.constant 2 : index
    %c0_111 = arith.constant 0 : index
    %c0_112 = arith.constant 0 : index
    %116 = vector.load %arg16[%c2_110, %c0_111, %c0_112] : memref<4x80x50xf32, #tpu.memory_space<vmem>>, vector<1x80x50xf32>
    %117 = vector.shape_cast %116 : vector<1x80x50xf32> to vector<80x50xf32>
    %cst_113 = arith.constant dense<0.000000e+00> : vector<8x50xf32>
    %118 = tpu.matmul %115, %117, %cst_113 {dimension_numbers = #tpu.dot_dimension_numbers<[1], [0], [0], [1], [0, 0, 1, 1], [], []>} : vector<8x80xf32>, vector<80x50xf32>, vector<8x50xf32> -> vector<8x50xf32>
    %119 = arith.addf %112, %118 : vector<8x50xf32>
    %c3_114 = arith.constant 3 : index
    %c0_115 = arith.constant 0 : index
    %c0_116 = arith.constant 0 : index
    %120 = vector.load %arg15[%c3_114, %c0_115, %c0_116] : memref<4x8x32xf32, #tpu.memory_space<vmem>>, vector<1x8x32xf32>
    %121 = vector.shape_cast %120 : vector<1x8x32xf32> to vector<8x32xf32>
    %cst_117 = arith.constant dense<0.000000e+00> : vector<8x80xf32>
    %122 = tpu.matmul %121, %97, %cst_117 {dimension_numbers = #tpu.dot_dimension_numbers<[1], [0], [0], [1], [0, 0, 1, 1], [], []>} : vector<8x32xf32>, vector<32x80xf32>, vector<8x80xf32> -> vector<8x80xf32>
    %c3_118 = arith.constant 3 : index
    %c0_119 = arith.constant 0 : index
    %c0_120 = arith.constant 0 : index
    %123 = vector.load %arg16[%c3_118, %c0_119, %c0_120] : memref<4x80x50xf32, #tpu.memory_space<vmem>>, vector<1x80x50xf32>
    %124 = vector.shape_cast %123 : vector<1x80x50xf32> to vector<80x50xf32>
    %cst_121 = arith.constant dense<0.000000e+00> : vector<8x50xf32>
    %125 = tpu.matmul %122, %124, %cst_121 {dimension_numbers = #tpu.dot_dimension_numbers<[1], [0], [0], [1], [0, 0, 1, 1], [], []>} : vector<8x80xf32>, vector<80x50xf32>, vector<8x50xf32> -> vector<8x50xf32>
    %126 = arith.addf %119, %125 : vector<8x50xf32>
    %c0_122 = arith.constant 0 : index
    %c0_123 = arith.constant 0 : index
    %127 = vector.load %arg17[%c0_122, %c0_123] : memref<1x50xf32, #tpu.memory_space<vmem>>, vector<1x50xf32>
    %128 = vector.broadcast %127 : vector<1x50xf32> to vector<8x50xf32>
    %129 = arith.addf %126, %128 : vector<8x50xf32>
    %c0_124 = arith.constant 0 : index
    %c0_125 = arith.constant 0 : index
    %130 = vector.load %arg18[%c0_124, %c0_125] : memref<50x10xf32, #tpu.memory_space<vmem>>, vector<50x10xf32>
    %cst_126 = arith.constant dense<0.000000e+00> : vector<8x10xf32>
    %131 = tpu.matmul %129, %130, %cst_126 {dimension_numbers = #tpu.dot_dimension_numbers<[1], [0], [0], [1], [0, 0, 1, 1], [], []>} : vector<8x50xf32>, vector<50x10xf32>, vector<8x10xf32> -> vector<8x10xf32>
    %c0_127 = arith.constant 0 : index
    %c0_128 = arith.constant 0 : index
    %132 = vector.load %arg19[%c0_127, %c0_128] : memref<1x10xf32, #tpu.memory_space<vmem>>, vector<1x10xf32>
    %133 = vector.broadcast %132 : vector<1x10xf32> to vector<8x10xf32>
    %134 = arith.addf %131, %133 : vector<8x10xf32>
    %c0_129 = arith.constant 0 : index
    %c0_130 = arith.constant 0 : index
    %135 = vector.load %arg20[%c0_129, %c0_130] : memref<8x10xf32, #tpu.memory_space<vmem>>, vector<8x10xf32>
    tpu.vector_store %arg20[%c0_129, %c0_130], %134 {strides = array<i32>} : memref<8x10xf32, #tpu.memory_space<vmem>>, vector<8x10xf32>,
    return
  }
  func.func @transform_0(%arg0: i32) -> (i32, i32, i32) {
    %c0_i32 = arith.constant 0 : i32
    %c0_i32_0 = arith.constant 0 : i32
    %c0_i32_1 = arith.constant 0 : i32
    return %arg0, %c0_i32, %c0_i32_0 : i32, i32, i32
  }
  func.func @transform_1(%arg0: i32) -> (i32, i32, i32) {
    %c0_i32 = arith.constant 0 : i32
    %c0_i32_0 = arith.constant 0 : i32
    %c0_i32_1 = arith.constant 0 : i32
    %c0_i32_2 = arith.constant 0 : i32
    return %c0_i32, %c0_i32_0, %c0_i32_1 : i32, i32, i32
  }
  func.func @transform_2(%arg0: i32) -> (i32, i32) {
    %c0_i32 = arith.constant 0 : i32
    %c0_i32_0 = arith.constant 0 : i32
    %c0_i32_1 = arith.constant 0 : i32
    return %c0_i32, %c0_i32_0 : i32, i32
  }
  func.func @transform_3(%arg0: i32) -> (i32, i32) {
    %c0_i32 = arith.constant 0 : i32
    %c0_i32_0 = arith.constant 0 : i32
    %c0_i32_1 = arith.constant 0 : i32
    return %c0_i32, %c0_i32_0 : i32, i32
  }
  func.func @transform_4(%arg0: i32) -> (i32, i32) {
    %c0_i32 = arith.constant 0 : i32
    %c0_i32_0 = arith.constant 0 : i32
    %c0_i32_1 = arith.constant 0 : i32
    return %c0_i32, %c0_i32_0 : i32, i32
  }
  func.func @transform_5(%arg0: i32) -> (i32, i32) {
    %c0_i32 = arith.constant 0 : i32
    %c0_i32_0 = arith.constant 0 : i32
    %c0_i32_1 = arith.constant 0 : i32
    return %c0_i32, %c0_i32_0 : i32, i32
  }
  func.func @transform_6(%arg0: i32) -> (i32, i32) {
    %c0_i32 = arith.constant 0 : i32
    %c0_i32_0 = arith.constant 0 : i32
    %c0_i32_1 = arith.constant 0 : i32
    return %c0_i32, %c0_i32_0 : i32, i32
  }
  func.func @transform_7(%arg0: i32) -> (i32, i32, i32) {
    %c0_i32 = arith.constant 0 : i32
    %c0_i32_0 = arith.constant 0 : i32
    %c0_i32_1 = arith.constant 0 : i32
    %c0_i32_2 = arith.constant 0 : i32
    return %c0_i32, %c0_i32_0, %c0_i32_1 : i32, i32, i32
  }
  func.func @transform_8(%arg0: i32) -> (i32, i32, i32) {
    %c0_i32 = arith.constant 0 : i32
    %c0_i32_0 = arith.constant 0 : i32
    %c0_i32_1 = arith.constant 0 : i32
    %c0_i32_2 = arith.constant 0 : i32
    return %c0_i32, %c0_i32_0, %c0_i32_1 : i32, i32, i32
  }
  func.func @transform_9(%arg0: i32) -> (i32, i32) {
    %c0_i32 = arith.constant 0 : i32
    %c0_i32_0 = arith.constant 0 : i32
    %c0_i32_1 = arith.constant 0 : i32
    return %c0_i32, %c0_i32_0 : i32, i32
  }
  func.func @transform_10(%arg0: i32) -> (i32, i32) {
    %c0_i32 = arith.constant 0 : i32
    %c0_i32_0 = arith.constant 0 : i32
    %c0_i32_1 = arith.constant 0 : i32
    return %c0_i32, %c0_i32_0 : i32, i32
  }
  func.func @transform_11(%arg0: i32) -> (i32, i32) {
    %c0_i32 = arith.constant 0 : i32
    %c0_i32_0 = arith.constant 0 : i32
    %c0_i32_1 = arith.constant 0 : i32
    return %c0_i32, %c0_i32_0 : i32, i32
  }
  func.func @transform_12(%arg0: i32) -> (i32, i32) {
    %c0_i32 = arith.constant 0 : i32
    %c0_i32_0 = arith.constant 0 : i32
    %c0_i32_1 = arith.constant 0 : i32
    return %c0_i32, %c0_i32_0 : i32, i32
  }
  func.func @transform_13(%arg0: i32) -> (i32, i32) {
    %c0_i32 = arith.constant 0 : i32
    %c0_i32_0 = arith.constant 0 : i32
    %c0_i32_1 = arith.constant 0 : i32
    return %c0_i32, %c0_i32_0 : i32, i32
  }
  func.func @transform_14(%arg0: i32) -> (i32, i32, i32) {
    %c0_i32 = arith.constant 0 : i32
    %c0_i32_0 = arith.constant 0 : i32
    %c0_i32_1 = arith.constant 0 : i32
    %c0_i32_2 = arith.constant 0 : i32
    return %c0_i32, %c0_i32_0, %c0_i32_1 : i32, i32, i32
  }
  func.func @transform_15(%arg0: i32) -> (i32, i32, i32) {
    %c0_i32 = arith.constant 0 : i32
    %c0_i32_0 = arith.constant 0 : i32
    %c0_i32_1 = arith.constant 0 : i32
    %c0_i32_2 = arith.constant 0 : i32
    return %c0_i32, %c0_i32_0, %c0_i32_1 : i32, i32, i32
  }
  func.func @transform_16(%arg0: i32) -> (i32, i32) {
    %c0_i32 = arith.constant 0 : i32
    %c0_i32_0 = arith.constant 0 : i32
    %c0_i32_1 = arith.constant 0 : i32
    return %c0_i32, %c0_i32_0 : i32, i32
  }
  func.func @transform_17(%arg0: i32) -> (i32, i32) {
    %c0_i32 = arith.constant 0 : i32
    %c0_i32_0 = arith.constant 0 : i32
    %c0_i32_1 = arith.constant 0 : i32
    return %c0_i32, %c0_i32_0 : i32, i32
  }
  func.func @transform_18(%arg0: i32) -> (i32, i32) {
    %c0_i32 = arith.constant 0 : i32
    %c0_i32_0 = arith.constant 0 : i32
    %c0_i32_1 = arith.constant 0 : i32
    return %c0_i32, %c0_i32_0 : i32, i32
  }
  func.func @transform_19(%arg0: i32) -> (i32, i32) {
    %c0_i32 = arith.constant 0 : i32
    %c0_i32_0 = arith.constant 0 : i32
    return %arg0, %c0_i32 : i32, i32
  }
}

</mosaic_0001>

<bundles_post_ra>
// kernel: classifier_forward.1
= control target key start
LH: loop header
LB: loop body
LE: loop exit
PB: predicated region body
PF: predicated region fallthrough
CT: control target
= control target key end

     0   :  { %vm249_vm0 = vcmask 1043456   ;;  %v10417_v3 = vmov 0.0   ;;  %vm134_vm1 = vcmask 1046528   ;;  %vm200_vm2 = vcmask 228352   ;;  %s10393_s1 = inlined_call_operand.vmem [shape: f32[5,28,240], index: 1, kind: input, shape index: {}]   ;;  %s10394_s0 = inlined_call_operand.vmem [shape: f32[8,28,28], index: 0, kind: input, shape index: {}]   ;;  %s10395_s3 = inlined_call_operand.vmem [shape: f32[240,120], index: 3, kind: input, shape index: {}]   ;;  %s10396_s4 = inlined_call_operand.vmem [shape: f32[240,120], index: 4, kind: input, shape index: {}]   ;;  %s10397_s2 = inlined_call_operand.vmem [shape: f32[1,240], index: 2, kind: input, shape index: {}]   ;;  %s10398_s5 = inlined_call_operand.vmem [shape: f32[96,192], index: 5, kind: input, shape index: {}]   ;;  %s10399_s6 = inlined_call_operand.vmem [shape: f32[96,192], index: 6, kind: input, shape index: {}]   ;;  %s10400_s7 = inlined_call_operand.vmem [shape: f32[5,64,96], index: 7, kind: input, shape index: {}]   ;;  %s10401_s8 = inlined_call_operand.vmem [shape: f32[5,120,160], index: 8, kind: input, shape index: {}]   ;;  %s10402_s10 = inlined_call_operand.vmem [shape: f32[160,80], index: 10, kind: input, shape index: {}]   ;;  %s10403_s11 = inlined_call_operand.vmem [shape: f32[160,80], index: 11, kind: input, shape index: {}]   ;;  %s10404_s9 = inlined_call_operand.vmem [shape: f32[1,160], index: 9, kind: input, shape index: {}]   ;;  %s10405_s12 = inlined_call_operand.vmem [shape: f32[32,64], index: 12, kind: input, shape index: {}]   ;;  %s10406_s13 = inlined_call_operand.vmem [shape: f32[32,64], index: 13, kind: input, shape index: {}]   ;;  %s10407_s14 = inlined_call_operand.vmem [shape: f32[4,8,32], index: 14, kind: input, shape index: {}]   ;;  %s10408_s15 = inlined_call_operand.vmem [shape: f32[4,80,50], index: 15, kind: input, shape index: {}]   ;;  %s10409_s17 = inlined_call_operand.vmem [shape: f32[50,10], index: 17, kind: input, shape index: {}]   ;;  %s10410_s16 = inlined_call_operand.vmem [shape: f32[1,50], index: 16, kind: input, shape index: {}]   ;;  %s10411_s18 = inlined_call_operand.vmem [shape: f32[1,10], index: 18, kind: input, shape index: {}]   ;;  %s10412_s19 = inlined_call_operand.vmem [shape: f32[8,10], index: 19, kind: output, shape index: {}]  }
   0x1   :  { %10420 = sst [smem:[#allocation69_spill]] %s10393_s1  ;;  %320 = vmatprep.mubr.f32.mxu0 %v10417_v3  ;;  %583 = vmatprep.mubr.f32.mxu1 %v10417_v3  ;;  %vm728_vm3 = vcmask 1045504   ;;  %vm1105_vm4 = vcmask 1044480   ;;  %vm1948_vm5 = vcmask 916480   ;;  %vm2469_vm6 = vcmask 523264  }
   0x2   :  { %10421 = sst [smem:[#allocation70_spill]] %s10394_s0  ;;  %vm2848_vm7 = vcmask 785408   ;;  %vm3177_vm8 = vcmask 982016   ;;  %vm4466_vm9 = vcmask 261120   ;;  %vm6805_vm10 = vmmov 0  }
   0x3   :  { %10422 = sst [smem:[#allocation71_spill]] %s10395_s3  ;;  %vm5109_vm11 = vcmask 654336   ;;  %vm5602_vm12 = vcmask 1041408   ;;  %vm5598_vm13 = vcmask 408576   ;;  %vm5676_vm14 = vcmask 80896  }
   0x4   :  { %10423 = sst [smem:[#allocation72_spill]] %s10396_s4 }
   0x5   :  { %s10424_s20 = sld [smem:[#allocation69_spill]] }
   0x6   :  { %s10425_s23 = sld [smem:[#allocation70_spill]] }
   0x7   :  { %s10426_s1 = sld [smem:[#allocation71_spill]] }
   0x8   :  { %s10427_s0 = sld [smem:[#allocation72_spill]] }
   0xb   :  { %v5689_v0 = vld [vmem:[%s10424_s20 + $0x78] sm:$0xf]  ;;  %v5688_v2 = vld [vmem:[%s10424_s20 + $0x70] sm:$0xf]  ;;  %v5687_v5 = vld [vmem:[%s10424_s20 + $0x68] sm:$0xff] }
   0xc   :  { %v101_v1 = vld [vmem:[%s10424_s20 + $0x38] sm:$0xf]  ;;  %5690 = vmatprep.subr.msk.mxu0 %vm249_vm0, %v5689_v0  ;;  %v100_v4 = vld [vmem:[%s10424_s20 + $0x30] sm:$0xf]  ;;  %v99_v6 = vld [vmem:[%s10424_s20 + $0x28] sm:$0xff] }
   0xd   :  { %5716 = vmatprep.subr.msk.mxu1 %vm249_vm0, %v101_v1  ;;  %5691 = vmatpush1.msk.msra.mxu0 %vm249_vm0, %v5688_v2  ;;  %v5686_v7 = vld [vmem:[%s10424_s20 + $0x60] sm:$0xff]  ;;  %v5685_v9 = vld [vmem:[%s10424_s20 + $0x58] sm:$0xff]  ;;  %v5684_v11 = vld [vmem:[%s10424_s20 + $0x50] sm:$0xff] }
   0xe   :  { %5717 = vmatpush1.msk.msra.mxu1 %vm249_vm0, %v100_v4  ;;  %v98_v8 = vld [vmem:[%s10424_s20 + $0x20] sm:$0xff]  ;;  %282 = vmatprep.subr.mxu0 %v5687_v5  ;;  %v97_v10 = vld [vmem:[%s10424_s20 + $0x18] sm:$0xff]  ;;  %v96_v12 = vld [vmem:[%s10424_s20 + $0x10] sm:$0xff] }
   0xf   :  { %545 = vmatprep.subr.mxu1 %v99_v6  ;;  %283 = vmatpush1.msra.mxu0 %v5686_v7  ;;  %v5683_v13 = vld [vmem:[%s10424_s20 + $0x48] sm:$0xff]  ;;  %v5682_v15 = vld [vmem:[%s10424_s20 + $0x40] sm:$0xff]  ;;  %v6975_v21 = vld [vmem:[%s10425_s23 + $0x10] sm:$0xff] }
  0x10   :  { %546 = vmatpush1.msra.mxu1 %v98_v8  ;;  %v95_v14 = vld [vmem:[%s10424_s20 + $0x8] sm:$0xff]  ;;  %284 = vmatprep.subr.mxu0 %v5685_v9  ;;  %v94_v16 = vld [vmem:[%s10424_s20] sm:$0xff]  ;;  %v138_v22 = vrot.slane %v6975_v21, 1  ;;  %v6981_v23 = vld [vmem:[%s10425_s23 + $0x18] sm:$0xf] }
  0x11   :  { %547 = vmatprep.subr.mxu1 %v97_v10  ;;  %v6963_v17 = vld [vmem:[%s10425_s23] sm:$0xff]  ;;  %v6968_v18 = vld [vmem:[%s10425_s23 + $0x8] sm:$0xff]  ;;  %285 = vmatpush1.msra.mxu0 %v5684_v11  ;;  %v140_v26 = vrot.slane %v6981_v23, 1  ;;  %v5749_v29 = vld [vmem:[%s10424_s20 + $0xb8] sm:$0xf] }
  0x12   :  { %548 = vmatpush1.msra.mxu1 %v96_v12  ;;  %v135_v19 = vrot.slane %v6963_v17, 1  ;;  %v136_v20 = vrot.slane %v6968_v18, 1  ;;  %286 = vmatprep.subr.mxu0 %v5683_v13  ;;  %v6994_v27 = vld [vmem:[%s10425_s23 + $0x20] sm:$0xff]  ;;  %v6999_v28 = vld [vmem:[%s10425_s23 + $0x28] sm:$0xff]  ;;  %v5748_v30 = vld [vmem:[%s10424_s20 + $0xb0] sm:$0xf] }
  0x13   :  { %549 = vmatprep.subr.mxu1 %v95_v14  ;;  %287 = vmatpush1.msra.mxu0 %v5682_v15  ;;  %v141_v31 = vsel %vm134_vm1, %v138_v22, %v140_v26  ;;  %v142_v32 = vrot.slane %v6994_v27, 1  ;;  %v143_v33 = vrot.slane %v6999_v28, 1  ;;  %v7019_v34 = vld [vmem:[%s10425_s23 + $0x30] sm:$0xff]  ;;  %v5747_v35 = vld [vmem:[%s10424_s20 + $0xa8] sm:$0xff]  ;;  %v5746_v36 = vld [vmem:[%s10424_s20 + $0xa0] sm:$0xff]  ;;  %v729_v43 = vrot.slane %v6963_v17, 2 }
  0x14   :  { %550 = vmatpush1.msra.mxu1 %v94_v16  ;;  %v137_v24 = vsel %vm134_vm1, %v135_v19, %v136_v20  ;;  %v139_v25 = vsel %vm134_vm1, %v136_v20, %v138_v22  ;;  %5750 = vmatprep.subr.msk.mxu0 %vm249_vm0, %v5749_v29  ;;  %v145_v38 = vrot.slane %v7019_v34, 1  ;;  %v5783_v39 = vld [vmem:[%s10424_s20 + $0xf8] sm:$0xf]  ;;  %v5782_v40 = vld [vmem:[%s10424_s20 + $0xf0] sm:$0xf]  ;;  %v5781_v44 = vld [vmem:[%s10424_s20 + $0xe8] sm:$0xff] }
  0x15   :  { %5692 = vmatmul.mubr.msk.f32.vlgmr.msra.gmra.mxu0 %vm200_vm2, %v137_v24  ;;  %5718 = vmatmul.mubr.msk.f32.vlgmr.msra.gmra.mxu1 %vm200_vm2, %v6963_v17  ;;  %v144_v37 = vsel %vm134_vm1, %v142_v32, %v143_v33  ;;  %v7044_v41 = vld [vmem:[%s10425_s23 + $0x38] sm:$0xf]  ;;  %v5744_v45 = vld [vmem:[%s10424_s20 + $0x90] sm:$0xff]  ;;  %v730_v46 = vrot.slane %v6968_v18, 2  ;;  %v1106_v47 = vrot.slane %v6963_v17, 3  ;;  %v5780_v48 = vld [vmem:[%s10424_s20 + $0xe0] sm:$0xff] }
  0x16   :  { %326 = vmatprep.mubr.f32.mxu0 %v10417_v3  ;;  %589 = vmatprep.mubr.f32.mxu1 %v10417_v3  ;;  %v5745_v42 = vld [vmem:[%s10424_s20 + $0x98] sm:$0xff]  ;;  %v5743_v49 = vld [vmem:[%s10424_s20 + $0x88] sm:$0xff]  ;;  %v1107_v50 = vrot.slane %v6968_v18, 3  ;;  %v146_v51 = vsel %vm134_vm1, %v143_v33, %v145_v38  ;;  %v147_v52 = vrot.slane %v7044_v41, 1  ;;  %v7082_v54 = vld [vmem:[%s10425_s23 + $0x40] sm:$0xff] }
  0x17   :  { %5751 = vmatpush1.msk.msra.mxu0 %vm249_vm0, %v5748_v30  ;;  %5784 = vmatprep.subr.msk.mxu1 %vm249_vm0, %v5783_v39  ;;  %v7077_v53 = vsel %vm728_vm3, %v729_v43, %v730_v46  ;;  %v7087_v55 = vld [vmem:[%s10425_s23 + $0x48] sm:$0xff]  ;;  %v5779_v57 = vld [vmem:[%s10424_s20 + $0xd8] sm:$0xff]  ;;  %v5742_v58 = vld [vmem:[%s10424_s20 + $0x80] sm:$0xff]  ;;  %v149_v62 = vrot.slane %v7082_v54, 1 }
  0x18   :  { %874 = vmatprep.subr.mxu0 %v5747_v35  ;;  %5785 = vmatpush1.msk.msra.mxu1 %vm249_vm0, %v5782_v40  ;;  %v7092_v56 = vsel %vm1105_vm4, %v1106_v47, %v1107_v50  ;;  %v5778_v59 = vld [vmem:[%s10424_s20 + $0xd0] sm:$0xff]  ;;  %v5817_v60 = vld [vmem:[%s10424_s20 + $0x138] sm:$0xf]  ;;  %v148_v61 = vsel %vm134_vm1, %v145_v38, %v147_v52  ;;  %v150_v63 = vrot.slane %v7087_v55, 1  ;;  %v5777_v1 = vld [vmem:[%s10424_s20 + $0xc8] sm:$0xff]  ;;  %v1482_v52 = vrot.slane %v6963_v17, 4 }
  0x19   :  { %5693 = vmatmul.mubr.msk.f32.gmra.mxu0 %vm200_vm2, %v139_v25  ;;  %5719 = vmatmul.mubr.msk.f32.gmra.mxu1 %vm200_vm2, %v6968_v18  ;;  %v7117_v0 = vld [vmem:[%s10425_s23 + $0x50] sm:$0xff]  ;;  %v5776_v2 = vld [vmem:[%s10424_s20 + $0xc0] sm:$0xff]  ;;  %v7136_v6 = vld [vmem:[%s10425_s23 + $0x58] sm:$0xf] }
  0x1a   :  { %332 = vmatprep.mubr.f32.mxu0 %v10417_v3  ;;  %595 = vmatprep.mubr.f32.mxu1 %v10417_v3  ;;  %v151_v4 = vsel %vm134_vm1, %v149_v62, %v150_v63  ;;  %v152_v5 = vrot.slane %v7117_v0, 1  ;;  %v154_v8 = vrot.slane %v7136_v6, 1  ;;  %v7148_v9 = vld [vmem:[%s10425_s23 + $0x60] sm:$0xff]  ;;  %v7153_v10 = vld [vmem:[%s10425_s23 + $0x68] sm:$0xff]  ;;  %v7167_v14 = vld [vmem:[%s10425_s23 + $0x70] sm:$0xff] }
  0x1b   :  { %875 = vmatpush1.msra.mxu0 %v5746_v36  ;;  %1251 = vmatprep.subr.mxu1 %v5781_v44  ;;  %v156_v12 = vrot.slane %v7148_v9, 1  ;;  %v157_v13 = vrot.slane %v7153_v10, 1  ;;  %v159_v16 = vrot.slane %v7167_v14, 1  ;;  %v7179_v19 = vld [vmem:[%s10425_s23 + $0x78] sm:$0xf]  ;;  %v7191_v24 = vld [vmem:[%s10425_s23 + $0x80] sm:$0xff] }
  0x1c   :  { %876 = vmatprep.subr.mxu0 %v5745_v42  ;;  %1252 = vmatpush1.msra.mxu1 %v5780_v48  ;;  %v153_v7 = vsel %vm134_vm1, %v150_v63, %v152_v5  ;;  %v155_v11 = vsel %vm134_vm1, %v152_v5, %v154_v8  ;;  %v161_v22 = vrot.slane %v7179_v19, 1  ;;  %v7196_v25 = vld [vmem:[%s10425_s23 + $0x88] sm:$0xff]  ;;  %v163_v29 = vrot.slane %v7191_v24, 1  ;;  %v7221_v35 = vld [vmem:[%s10425_s23 + $0x98] sm:$0xf]  ;;  %v7233_v38 = vld [vmem:[%s10425_s23 + $0xa0] sm:$0xff] }
  0x1d   :  { %5694 = vmatmul.mubr.msk.f32.gmra.mxu0 %vm200_vm2, %v141_v31  ;;  %5720 = vmatmul.mubr.msk.f32.gmra.mxu1 %vm200_vm2, %v6975_v21  ;;  %v158_v15 = vsel %vm134_vm1, %v156_v12, %v157_v13  ;;  %v160_v20 = vsel %vm134_vm1, %v157_v13, %v159_v16  ;;  %v164_v30 = vrot.slane %v7196_v25, 1  ;;  %v7209_v31 = vld [vmem:[%s10425_s23 + $0x90] sm:$0xff]  ;;  %v7238_v39 = vld [vmem:[%s10425_s23 + $0xa8] sm:$0xff]  ;;  %v170_v42 = vrot.slane %v7233_v38, 1  ;;  %v7263_v48 = vld [vmem:[%s10425_s23 + $0xb8] sm:$0xf] }
  0x1e   :  { %338 = vmatprep.mubr.f32.mxu0 %v10417_v3  ;;  %601 = vmatprep.mubr.f32.mxu1 %v10417_v3  ;;  %v162_v26 = vsel %vm134_vm1, %v159_v16, %v161_v22  ;;  %v166_v33 = vrot.slane %v7209_v31, 1  ;;  %v171_v43 = vrot.slane %v7238_v39, 1  ;;  %v7251_v44 = vld [vmem:[%s10425_s23 + $0xb0] sm:$0xff]  ;;  %v7324_v8 = vld [vmem:[%s10425_s23 + $0xe0] sm:$0xff] }
  0x1f   :  { %877 = vmatpush1.msra.mxu0 %v5744_v45  ;;  %1253 = vmatprep.subr.mxu1 %v5779_v57  ;;  %v165_v32 = vsel %vm134_vm1, %v163_v29, %v164_v30  ;;  %v173_v47 = vrot.slane %v7251_v44, 1  ;;  %v1483_v57 = vrot.slane %v6968_v18, 4  ;;  %v7300_v63 = vld [vmem:[%s10425_s23 + $0xd0] sm:$0xff]  ;;  %v184_v13 = vrot.slane %v7324_v8, 1 }
  0x20   :  { %878 = vmatprep.subr.mxu0 %v5743_v49  ;;  %1254 = vmatpush1.msra.mxu1 %v5778_v59  ;;  %v167_v36 = vsel %vm134_vm1, %v164_v30, %v166_v33  ;;  %v172_v45 = vsel %vm134_vm1, %v170_v42, %v171_v43  ;;  %v7282_v59 = vld [vmem:[%s10425_s23 + $0xc8] sm:$0xff]  ;;  %v7342_v16 = vld [vmem:[%s10425_s23 + $0xf0] sm:$0xff]  ;;  %v1489_v18 = vrot.slane %v6994_v27, 4 }
  0x21   :  { %5695 = vmatmul.mubr.msk.f32.gmra.mxu0 %vm200_vm2, %v144_v37  ;;  %5721 = vmatmul.mubr.msk.f32.gmra.mxu1 %vm200_vm2, %v6994_v27  ;;  %v168_v37 = vrot.slane %v7221_v35, 1  ;;  %v174_v49 = vsel %vm134_vm1, %v171_v43, %v173_v47  ;;  %v178_v62 = vrot.slane %v7282_v59, 1  ;;  %v187_v22 = vrot.slane %v7342_v16, 1  ;;  %v5815_v42 = vld [vmem:[%s10424_s20 + $0x128] sm:$0xff] }
  0x22   :  { %344 = vmatprep.mubr.f32.mxu0 %v10417_v3  ;;  %607 = vmatprep.mubr.f32.mxu1 %v10417_v3 }
  0x23   :  { %879 = vmatpush1.msra.mxu0 %v5742_v58  ;;  %1255 = vmatprep.subr.mxu1 %v5777_v1  ;;  %v169_v40 = vsel %vm134_vm1, %v166_v33, %v168_v37  ;;  %v7277_v58 = vld [vmem:[%s10425_s23 + $0xc0] sm:$0xff]  ;;  %v732_v33 = vrot.slane %v6975_v21, 2  ;;  %v5816_v37 = vld [vmem:[%s10424_s20 + $0x130] sm:$0xf] }
  0x24   :  { %5818 = vmatprep.subr.msk.mxu0 %vm249_vm0, %v5817_v60  ;;  %1256 = vmatpush1.msra.mxu1 %v5776_v2  ;;  %v7287_v60 = vsel %vm249_vm0, %v1482_v52, %v1483_v57  ;;  %v180_v2 = vrot.slane %v7300_v63, 1  ;;  %v1113_v52 = vrot.slane %v6994_v27, 3 }
  0x25   :  { %5696 = vmatmul.mubr.msk.f32.gmra.mxu0 %vm200_vm2, %v146_v51  ;;  %5722 = vmatmul.mubr.msk.f32.gmra.mxu1 %vm200_vm2, %v6999_v28  ;;  %v175_v51 = vrot.slane %v7263_v48, 1  ;;  %v733_v43 = vsel %vm728_vm3, %v730_v46, %v732_v33 }
  0x26   :  { %350 = vmatprep.mubr.f32.mxu0 %v10417_v3  ;;  %613 = vmatprep.mubr.f32.mxu1 %v10417_v3  ;;  %v181_v5 = vsel %vm134_vm1, %v178_v62, %v180_v2 }
  0x27   :  { %2021 = vmatprep.subr.mxu1 %v10417_v3  ;;  %v176_v17 = vsel %vm134_vm1, %v173_v47, %v175_v51  ;;  %v736_v47 = vrot.slane %v6994_v27, 2  ;;  %v737_v51 = vrot.slane %v6999_v28, 2 }
  0x29   :  { %5697 = vmatmul.mubr.msk.f32.gmra.mxu0 %vm200_vm2, %v148_v61  ;;  %5723 = vmatmul.mubr.msk.f32.gmra.mxu1 %vm200_vm2, %v7019_v34  ;;  %v177_v61 = vrot.slane %v7277_v58, 1 }
  0x2a   :  { %356 = vmatprep.mubr.f32.mxu0 %v10417_v3  ;;  %619 = vmatprep.mubr.f32.mxu1 %v10417_v3 }
  0x2b   :  { %v179_v1 = vsel %vm134_vm1, %v177_v61, %v178_v62  ;;  %v5812_v61 = vld [vmem:[%s10424_s20 + $0x110] sm:$0xff]  ;;  %v5811_v62 = vld [vmem:[%s10424_s20 + $0x108] sm:$0xff] }
  0x2d   :  { %5698 = vmatmul.mubr.msk.f32.gmra.mxu0 %vm200_vm2, %v151_v4  ;;  %5724 = vmatmul.mubr.msk.f32.gmra.mxu1 %vm200_vm2, %v7082_v54  ;;  %v7312_v4 = vld [vmem:[%s10425_s23 + $0xd8] sm:$0xf] }
  0x2e   :  { %362 = vmatprep.mubr.f32.mxu0 %v10417_v3  ;;  %625 = vmatprep.mubr.f32.mxu1 %v10417_v3 }
  0x31   :  { %5699 = vmatmul.mubr.msk.f32.gmra.mxu0 %vm200_vm2, %v153_v7  ;;  %5725 = vmatmul.mubr.msk.f32.gmra.mxu1 %vm200_vm2, %v7087_v55  ;;  %v182_v7 = vrot.slane %v7312_v4, 1 }
  0x32   :  { %368 = vmatprep.mubr.f32.mxu0 %v10417_v3  ;;  %631 = vmatprep.mubr.f32.mxu1 %v10417_v3 }
  0x33   :  { %v183_v12 = vsel %vm134_vm1, %v180_v2, %v182_v7  ;;  %v1116_v7 = vrot.slane %v7019_v34, 3 }
  0x35   :  { %5700 = vmatmul.mubr.msk.f32.gmra.mxu0 %vm200_vm2, %v155_v11  ;;  %5726 = vmatmul.mubr.msk.f32.gmra.mxu1 %vm200_vm2, %v7117_v0  ;;  %v7329_v11 = vld [vmem:[%s10425_s23 + $0xe8] sm:$0xff] }
  0x36   :  { %374 = vmatprep.mubr.f32.mxu0 %v10417_v3  ;;  %637 = vmatprep.mubr.f32.mxu1 %v10417_v3 }
  0x39   :  { %5701 = vmatmul.mubr.msk.f32.gmra.mxu0 %vm200_vm2, %v158_v15  ;;  %5727 = vmatmul.mubr.msk.f32.gmra.mxu1 %vm200_vm2, %v7148_v9  ;;  %v185_v15 = vrot.slane %v7329_v11, 1 }
  0x3a   :  { %380 = vmatprep.mubr.f32.mxu0 %v10417_v3  ;;  %643 = vmatprep.mubr.f32.mxu1 %v10417_v3 }
  0x3b   :  { %v188_v29 = vsel %vm134_vm1, %v185_v15, %v187_v22 }
  0x3d   :  { %5702 = vmatmul.mubr.msk.f32.gmra.mxu0 %vm200_vm2, %v160_v20  ;;  %5728 = vmatmul.mubr.msk.f32.gmra.mxu1 %vm200_vm2, %v7153_v10  ;;  %v186_v20 = vsel %vm134_vm1, %v184_v13, %v185_v15 }
  0x3e   :  { %386 = vmatprep.mubr.f32.mxu0 %v10417_v3  ;;  %649 = vmatprep.mubr.f32.mxu1 %v10417_v3 }
  0x41   :  { %5703 = vmatmul.mubr.msk.f32.gmra.mxu0 %vm200_vm2, %v162_v26  ;;  %5729 = vmatmul.mubr.msk.f32.gmra.mxu1 %vm200_vm2, %v7167_v14  ;;  %v7354_v26 = vld [vmem:[%s10425_s23 + $0xf8] sm:$0xf] }
  0x42   :  { %392 = vmatprep.mubr.f32.mxu0 %v10417_v3  ;;  %655 = vmatprep.mubr.f32.mxu1 %v10417_v3  ;;  %v189_v30 = vrot.slane %v7354_v26, 1 }
  0x45   :  { %5704 = vmatmul.mubr.msk.f32.gmra.mxu0 %vm200_vm2, %v165_v32  ;;  %5730 = vmatmul.mubr.msk.f32.gmra.mxu1 %vm200_vm2, %v7191_v24  ;;  %v190_v32 = vsel %vm134_vm1, %v187_v22, %v189_v30  ;;  %v1118_v22 = vrot.slane %v7044_v41, 3  ;;  %v744_v30 = vrot.slane %v7087_v55, 2 }
  0x46   :  { %398 = vmatprep.mubr.f32.mxu0 %v10417_v3  ;;  %661 = vmatprep.mubr.f32.mxu1 %v10417_v3 }
  0x49   :  { %5705 = vmatmul.mubr.msk.f32.gmra.mxu0 %vm200_vm2, %v167_v36  ;;  %5731 = vmatmul.mubr.msk.f32.gmra.mxu1 %vm200_vm2, %v7196_v25  ;;  %v1109_v36 = vrot.slane %v6975_v21, 3 }
  0x4a   :  { %404 = vmatprep.mubr.f32.mxu0 %v10417_v3  ;;  %667 = vmatprep.mubr.f32.mxu1 %v10417_v3 }
  0x4d   :  { %5706 = vmatmul.mubr.msk.f32.gmra.mxu0 %vm200_vm2, %v169_v40  ;;  %5732 = vmatmul.mubr.msk.f32.gmra.mxu1 %vm200_vm2, %v7209_v31  ;;  %v734_v40 = vrot.slane %v6981_v23, 2 }
  0x4e   :  { %410 = vmatprep.mubr.f32.mxu0 %v10417_v3  ;;  %673 = vmatprep.mubr.f32.mxu1 %v10417_v3 }
  0x4f   :  { %v735_v46 = vsel %vm728_vm3, %v732_v33, %v734_v40  ;;  %v1119_v33 = vsel %vm1105_vm4, %v1116_v7, %v1118_v22  ;;  %v758_v22 = vrot.slane %v7196_v25, 2 }
  0x51   :  { %5707 = vmatmul.mubr.msk.f32.gmra.mxu0 %vm200_vm2, %v172_v45  ;;  %5733 = vmatmul.mubr.msk.f32.gmra.mxu1 %vm200_vm2, %v7233_v38  ;;  %v5814_v45 = vld [vmem:[%s10424_s20 + $0x120] sm:$0xff] }
  0x52   :  { %416 = vmatprep.mubr.f32.mxu0 %v10417_v3  ;;  %679 = vmatprep.mubr.f32.mxu1 %v10417_v3 }
  0x55   :  { %5708 = vmatmul.mubr.msk.f32.gmra.mxu0 %vm200_vm2, %v174_v49  ;;  %5734 = vmatmul.mubr.msk.f32.gmra.mxu1 %vm200_vm2, %v7238_v39 }
  0x56   :  { %422 = vmatprep.mubr.f32.mxu0 %v10417_v3  ;;  %685 = vmatprep.mubr.f32.mxu1 %v10417_v3 }
  0x59   :  { %5709 = vmatmul.mubr.msk.f32.gmra.mxu0 %vm200_vm2, %v176_v17  ;;  %5735 = vmatmul.mubr.msk.f32.gmra.mxu1 %vm200_vm2, %v7251_v44  ;;  %v1114_v17 = vrot.slane %v6999_v28, 3 }
  0x5a   :  { %428 = vmatprep.mubr.f32.mxu0 %v10417_v3  ;;  %691 = vmatprep.mubr.f32.mxu1 %v10417_v3 }
  0x5b   :  { %v1115_v2 = vsel %vm1105_vm4, %v1113_v52, %v1114_v17  ;;  %v1117_v15 = vsel %vm1105_vm4, %v1114_v17, %v1116_v7  ;;  %v1127_v17 = vrot.slane %v7148_v9, 3 }
  0x5d   :  { %5710 = vmatmul.mubr.msk.f32.gmra.mxu0 %vm200_vm2, %v179_v1  ;;  %5736 = vmatmul.mubr.msk.f32.gmra.mxu1 %vm200_vm2, %v7277_v58  ;;  %v738_v1 = vsel %vm728_vm3, %v736_v47, %v737_v51  ;;  %v1125_v47 = vrot.slane %v7136_v6, 3 }
  0x5e   :  { %434 = vmatprep.mubr.f32.mxu0 %v10417_v3  ;;  %697 = vmatprep.mubr.f32.mxu1 %v10417_v3 }
  0x61   :  { %5711 = vmatmul.mubr.msk.f32.gmra.mxu0 %vm200_vm2, %v181_v5  ;;  %5737 = vmatmul.mubr.msk.f32.gmra.mxu1 %vm200_vm2, %v7282_v59  ;;  %v739_v5 = vrot.slane %v7019_v34, 2 }
  0x62   :  { %440 = vmatprep.mubr.f32.mxu0 %v10417_v3  ;;  %703 = vmatprep.mubr.f32.mxu1 %v10417_v3 }
  0x63   :  { %v740_v13 = vsel %vm728_vm3, %v737_v51, %v739_v5 }
  0x65   :  { %5712 = vmatmul.mubr.msk.f32.gmra.mxu0 %vm200_vm2, %v183_v12  ;;  %5738 = vmatmul.mubr.msk.f32.gmra.mxu1 %vm200_vm2, %v7300_v63  ;;  %v5810_v12 = vld [vmem:[%s10424_s20 + $0x100] sm:$0xff] }
  0x66   :  { %446 = vmatprep.mubr.f32.mxu0 %v10417_v3  ;;  %709 = vmatprep.mubr.f32.mxu1 %v10417_v3 }
  0x69   :  { %5713 = vmatmul.mubr.msk.f32.gmra.mxu0 %vm200_vm2, %v186_v20  ;;  %5739 = vmatmul.mubr.msk.f32.gmra.mxu1 %vm200_vm2, %v7324_v8  ;;  %v741_v20 = vrot.slane %v7044_v41, 2 }
  0x6a   :  { %452 = vmatprep.mubr.f32.mxu0 %v10417_v3  ;;  %715 = vmatprep.mubr.f32.mxu1 %v10417_v3 }
  0x6d   :  { %5714 = vmatmul.mubr.msk.f32.gmra.mxu0 %vm200_vm2, %v188_v29  ;;  %5740 = vmatmul.mubr.msk.f32.gmra.mxu1 %vm200_vm2, %v7329_v11  ;;  %v743_v29 = vrot.slane %v7082_v54, 2 }
  0x6e   :  { %458 = vmatprep.mubr.f32.mxu0 %v10417_v3  ;;  %721 = vmatprep.mubr.f32.mxu1 %v10417_v3 }
  0x6f   :  { %v745_v40 = vsel %vm728_vm3, %v743_v29, %v744_v30 }
  0x71   :  { %5715 = vmatmul.mubr.msk.f32.gmra.mxu0 %vm200_vm2, %v190_v32  ;;  %5741 = vmatmul.mubr.msk.f32.gmra.mxu1 %vm200_vm2, %v7342_v16  ;;  %v742_v32 = vsel %vm728_vm3, %v739_v5, %v741_v20  ;;  %v1130_v5 = vrot.slane %v7167_v14, 3  ;;  %v757_v20 = vrot.slane %v7191_v24, 2 }
  0x72   :  { %912 = vmatprep.mubr.f32.mxu0 %v10417_v3  ;;  %1289 = vmatprep.mubr.f32.mxu1 %v10417_v3 }
  0x75   :  { %5752 = vmatmul.mubr.msk.f32.vlgmr.msra.gmra.mxu0 %vm200_vm2, %v7077_v53  ;;  %5786 = vmatmul.mubr.msk.f32.vlgmr.msra.gmra.mxu1 %vm200_vm2, %v7092_v56  ;;  %v1110_v53 = vsel %vm1105_vm4, %v1107_v50, %v1109_v36  ;;  %v1111_v56 = vrot.slane %v6981_v23, 3  ;;  %v5813_v50 = vld [vmem:[%s10424_s20 + $0x118] sm:$0xff] }
  0x76   :  { %918 = vmatprep.mubr.f32.mxu0 %v10417_v3  ;;  %1295 = vmatprep.mubr.f32.mxu1 %v10417_v3 }
  0x77   :  { %5819 = vmatpush1.msk.msra.mxu0 %vm249_vm0, %v5816_v37  ;;  %v1112_v49 = vsel %vm1105_vm4, %v1109_v36, %v1111_v56  ;;  %v1120_v36 = vrot.slane %v7082_v54, 3  ;;  %v1121_v37 = vrot.slane %v7087_v55, 3 }
  0x78   :  { %1627 = vmatprep.subr.mxu0 %v5815_v42 }
  0x79   :  { %5753 = vmatmul.mubr.msk.f32.gmra.mxu0 %vm200_vm2, %v733_v43  ;;  %5787 = vmatmul.mubr.msk.f32.gmra.mxu1 %vm200_vm2, %v1110_v53  ;;  %v1122_v42 = vsel %vm1105_vm4, %v1120_v36, %v1121_v37  ;;  %v746_v43 = vrot.slane %v7117_v0, 2  ;;  %v1123_v53 = vrot.slane %v7117_v0, 3  ;;  %v759_v36 = vsel %vm728_vm3, %v757_v20, %v758_v22 }
  0x7a   :  { %924 = vmatprep.mubr.f32.mxu0 %v10417_v3  ;;  %1301 = vmatprep.mubr.f32.mxu1 %v10417_v3 }
  0x7b   :  { %1628 = vmatpush1.msra.mxu0 %v5814_v45  ;;  %v747_v56 = vsel %vm728_vm3, %v744_v30, %v746_v43  ;;  %v1124_v45 = vsel %vm1105_vm4, %v1121_v37, %v1123_v53  ;;  %v1126_v52 = vsel %vm1105_vm4, %v1123_v53, %v1125_v47  ;;  %v765_v47 = vrot.slane %v7238_v39, 2 }
  0x7c   :  { %1629 = vmatprep.subr.mxu0 %v5813_v50  ;;  %v750_v50 = vrot.slane %v7148_v9, 2 }
  0x7d   :  { %5754 = vmatmul.mubr.msk.f32.gmra.mxu0 %vm200_vm2, %v735_v46  ;;  %5788 = vmatmul.mubr.msk.f32.gmra.mxu1 %vm200_vm2, %v1112_v49  ;;  %v748_v46 = vrot.slane %v7136_v6, 2  ;;  %v751_v49 = vrot.slane %v7153_v10, 2 }
  0x7e   :  { %930 = vmatprep.mubr.f32.mxu0 %v10417_v3  ;;  %1307 = vmatprep.mubr.f32.mxu1 %v10417_v3 }
  0x7f   :  { %1630 = vmatpush1.msra.mxu0 %v5812_v61  ;;  %v749_v51 = vsel %vm728_vm3, %v746_v43, %v748_v46  ;;  %v1128_v61 = vrot.slane %v7153_v10, 3  ;;  %v764_v46 = vrot.slane %v7233_v38, 2 }
  0x80   :  { %1631 = vmatprep.subr.mxu0 %v5811_v62  ;;  %v752_v62 = vsel %vm728_vm3, %v750_v50, %v751_v49 }
  0x81   :  { %5755 = vmatmul.mubr.msk.f32.gmra.mxu0 %vm200_vm2, %v738_v1  ;;  %5789 = vmatmul.mubr.msk.f32.gmra.mxu1 %vm200_vm2, %v1115_v2  ;;  %v1129_v1 = vsel %vm1105_vm4, %v1127_v17, %v1128_v61  ;;  %v753_v2 = vrot.slane %v7167_v14, 2  ;;  %v766_v17 = vsel %vm728_vm3, %v764_v46, %v765_v47  ;;  %v783_v46 = vrot.slane %v7354_v26, 2 }
  0x82   :  { %936 = vmatprep.mubr.f32.mxu0 %v10417_v3  ;;  %1313 = vmatprep.mubr.f32.mxu1 %v10417_v3 }
  0x83   :  { %1632 = vmatpush1.msra.mxu0 %v5810_v12  ;;  %v754_v7 = vsel %vm728_vm3, %v751_v49, %v753_v2  ;;  %v1131_v12 = vsel %vm1105_vm4, %v1128_v61, %v1130_v5 }
  0x84   :  { %2236 = vmatprep.subr.mxu0 %v10417_v3 }
  0x85   :  { %5756 = vmatmul.mubr.msk.f32.gmra.mxu0 %vm200_vm2, %v740_v13  ;;  %5790 = vmatmul.mubr.msk.f32.gmra.mxu1 %vm200_vm2, %v1117_v15  ;;  %v755_v13 = vrot.slane %v7179_v19, 2  ;;  %v1132_v15 = vrot.slane %v7179_v19, 3 }
  0x86   :  { %942 = vmatprep.mubr.f32.mxu0 %v10417_v3  ;;  %1319 = vmatprep.mubr.f32.mxu1 %v10417_v3 }
  0x87   :  { %v756_v29 = vsel %vm728_vm3, %v753_v2, %v755_v13  ;;  %v1133_v30 = vsel %vm1105_vm4, %v1130_v5, %v1132_v15  ;;  %v1148_v13 = vrot.slane %v7277_v58, 3  ;;  %v1149_v15 = vrot.slane %v7282_v59, 3 }
  0x89   :  { %5757 = vmatmul.mubr.msk.f32.gmra.mxu0 %vm200_vm2, %v742_v32  ;;  %5791 = vmatmul.mubr.msk.f32.gmra.mxu1 %vm200_vm2, %v1119_v33  ;;  %v1134_v32 = vrot.slane %v7191_v24, 3  ;;  %v1135_v33 = vrot.slane %v7196_v25, 3 }
  0x8a   :  { %948 = vmatprep.mubr.f32.mxu0 %v10417_v3  ;;  %1325 = vmatprep.mubr.f32.mxu1 %v10417_v3 }
  0x8b   :  { %v1136_v37 = vsel %vm1105_vm4, %v1134_v32, %v1135_v33 }
  0x8d   :  { %5758 = vmatmul.mubr.msk.f32.gmra.mxu0 %vm200_vm2, %v745_v40  ;;  %5792 = vmatmul.mubr.msk.f32.gmra.mxu1 %vm200_vm2, %v1122_v42  ;;  %v760_v40 = vrot.slane %v7209_v31, 2  ;;  %v1137_v42 = vrot.slane %v7209_v31, 3 }
  0x8e   :  { %954 = vmatprep.mubr.f32.mxu0 %v10417_v3  ;;  %1331 = vmatprep.mubr.f32.mxu1 %v10417_v3 }
  0x8f   :  { %v761_v43 = vsel %vm728_vm3, %v758_v22, %v760_v40  ;;  %v1138_v53 = vsel %vm1105_vm4, %v1135_v33, %v1137_v42  ;;  %v1150_v22 = vsel %vm1105_vm4, %v1148_v13, %v1149_v15 }
  0x91   :  { %5759 = vmatmul.mubr.msk.f32.gmra.mxu0 %vm200_vm2, %v747_v56  ;;  %5793 = vmatmul.mubr.msk.f32.gmra.mxu1 %vm200_vm2, %v1124_v45  ;;  %v762_v56 = vrot.slane %v7221_v35, 2  ;;  %v1139_v45 = vrot.slane %v7221_v35, 3 }
  0x92   :  { %960 = vmatprep.mubr.f32.mxu0 %v10417_v3  ;;  %1337 = vmatprep.mubr.f32.mxu1 %v10417_v3 }
  0x93   :  { %v763_v50 = vsel %vm728_vm3, %v760_v40, %v762_v56  ;;  %v1140_v49 = vsel %vm1105_vm4, %v1137_v42, %v1139_v45  ;;  %v1155_v40 = vrot.slane %v7324_v8, 3  ;;  %v1156_v42 = vrot.slane %v7329_v11, 3 }
  0x94   :  { %v781_v56 = vrot.slane %v7342_v16, 2  ;;  %v1158_v45 = vrot.slane %v7342_v16, 3 }
  0x95   :  { %5760 = vmatmul.mubr.msk.f32.gmra.mxu0 %vm200_vm2, %v749_v51  ;;  %5794 = vmatmul.mubr.msk.f32.gmra.mxu1 %vm200_vm2, %v1126_v52  ;;  %v1141_v51 = vrot.slane %v7233_v38, 3  ;;  %v1142_v52 = vrot.slane %v7238_v39, 3  ;;  %v769_v38 = vrot.slane %v7263_v48, 2  ;;  %v1146_v39 = vrot.slane %v7263_v48, 3 }
  0x96   :  { %966 = vmatprep.mubr.f32.mxu0 %v10417_v3  ;;  %1343 = vmatprep.mubr.f32.mxu1 %v10417_v3  ;;  %v771_v48 = vrot.slane %v7277_v58, 2  ;;  %v776_v58 = vrot.slane %v7312_v4, 2  ;;  %v784_v16 = vsel %vm728_vm3, %v781_v56, %v783_v46 }
  0x97   :  { %v1143_v61 = vsel %vm1105_vm4, %v1141_v51, %v1142_v52 }
  0x99   :  { %5761 = vmatmul.mubr.msk.f32.gmra.mxu0 %vm200_vm2, %v752_v62  ;;  %5795 = vmatmul.mubr.msk.f32.gmra.mxu1 %vm200_vm2, %v1129_v1  ;;  %v767_v62 = vrot.slane %v7251_v44, 2  ;;  %v1144_v1 = vrot.slane %v7251_v44, 3 }
  0x9a   :  { %972 = vmatprep.mubr.f32.mxu0 %v10417_v3  ;;  %1349 = vmatprep.mubr.f32.mxu1 %v10417_v3 }
  0x9b   :  { %v768_v2 = vsel %vm728_vm3, %v765_v47, %v767_v62  ;;  %v1145_v5 = vsel %vm1105_vm4, %v1142_v52, %v1144_v1  ;;  %v770_v44 = vsel %vm728_vm3, %v767_v62, %v769_v38  ;;  %v1160_v47 = vrot.slane %v7354_v26, 3 }
  0x9c   :  { %v1485_v26 = vrot.slane %v6975_v21, 4 }
  0x9d   :  { %5762 = vmatmul.mubr.msk.f32.gmra.mxu0 %vm200_vm2, %v754_v7  ;;  %5796 = vmatmul.mubr.msk.f32.gmra.mxu1 %vm200_vm2, %v1131_v12  ;;  %v1147_v7 = vsel %vm1105_vm4, %v1144_v1, %v1146_v39  ;;  %v772_v12 = vrot.slane %v7282_v59, 2  ;;  %v1153_v59 = vrot.slane %v7312_v4, 3  ;;  %v778_v4 = vrot.slane %v7324_v8, 2 }
  0x9e   :  { %978 = vmatprep.mubr.f32.mxu0 %v10417_v3  ;;  %1355 = vmatprep.mubr.f32.mxu1 %v10417_v3 }
  0x9f   :  { %v773_v20 = vsel %vm728_vm3, %v771_v48, %v772_v12 }
  0xa1   :  { %5763 = vmatmul.mubr.msk.f32.gmra.mxu0 %vm200_vm2, %v756_v29  ;;  %5797 = vmatmul.mubr.msk.f32.gmra.mxu1 %vm200_vm2, %v1133_v30  ;;  %v774_v29 = vrot.slane %v7300_v63, 2  ;;  %v1151_v30 = vrot.slane %v7300_v63, 3 }
  0xa2   :  { %984 = vmatprep.mubr.f32.mxu0 %v10417_v3  ;;  %1361 = vmatprep.mubr.f32.mxu1 %v10417_v3 }
  0xa3   :  { %v775_v32 = vsel %vm728_vm3, %v772_v12, %v774_v29  ;;  %v1152_v33 = vsel %vm1105_vm4, %v1149_v15, %v1151_v30  ;;  %v777_v63 = vsel %vm728_vm3, %v774_v29, %v776_v58  ;;  %v1492_v12 = vrot.slane %v7019_v34, 4 }
  0xa5   :  { %5764 = vmatmul.mubr.msk.f32.gmra.mxu0 %vm200_vm2, %v759_v36  ;;  %5798 = vmatmul.mubr.msk.f32.gmra.mxu1 %vm200_vm2, %v1136_v37  ;;  %v1154_v36 = vsel %vm1105_vm4, %v1151_v30, %v1153_v59  ;;  %v779_v37 = vrot.slane %v7329_v11, 2  ;;  %v1159_v11 = vsel %vm1105_vm4, %v1156_v42, %v1158_v45  ;;  %v1494_v30 = vrot.slane %v7044_v41, 4 }
  0xa6   :  { %990 = vmatprep.mubr.f32.mxu0 %v10417_v3  ;;  %1367 = vmatprep.mubr.f32.mxu1 %v10417_v3 }
  0xa7   :  { %v782_v8 = vsel %vm728_vm3, %v779_v37, %v781_v56 }
  0xa9   :  { %5765 = vmatmul.mubr.msk.f32.gmra.mxu0 %vm200_vm2, %v761_v43  ;;  %5799 = vmatmul.mubr.msk.f32.gmra.mxu1 %vm200_vm2, %v1138_v53  ;;  %v780_v43 = vsel %vm728_vm3, %v778_v4, %v779_v37  ;;  %v1157_v53 = vsel %vm1105_vm4, %v1155_v40, %v1156_v42  ;;  %v2219_v4 = vld [vmem:[%s10427_s0 + $0x68] sm:$0xff]  ;;  %v1495_v40 = vsel %vm249_vm0, %v1492_v12, %v1494_v30  ;;  %v1496_v42 = vrot.slane %v7082_v54, 4  ;;  %v2218_v54 = vld [vmem:[%s10427_s0 + $0x60] sm:$0xff] }
  0xaa   :  { %996 = vmatprep.mubr.f32.mxu0 %v10417_v3  ;;  %1373 = vmatprep.mubr.f32.mxu1 %v10417_v3 }
  0xad   :  { %5766 = vmatmul.mubr.msk.f32.gmra.mxu0 %vm200_vm2, %v763_v50  ;;  %5800 = vmatmul.mubr.msk.f32.gmra.mxu1 %vm200_vm2, %v1140_v49  ;;  %v1161_v50 = vsel %vm1105_vm4, %v1158_v45, %v1160_v47  ;;  %v1930_v45 = vld [vmem:[%s10426_s1 + $0x60] sm:$0xff] }
  0xae   :  { %1002 = vmatprep.mubr.f32.mxu0 %v10417_v3  ;;  %1379 = vmatprep.mubr.f32.mxu1 %v10417_v3 }
  0xb1   :  { %5767 = vmatmul.mubr.msk.f32.gmra.mxu0 %vm200_vm2, %v766_v17  ;;  %5801 = vmatmul.mubr.msk.f32.gmra.mxu1 %vm200_vm2, %v1143_v61  ;;  %v1486_v17 = vsel %vm249_vm0, %v1483_v57, %v1485_v26  ;;  %v1487_v61 = vrot.slane %v6981_v23, 4  ;;  %v1490_v57 = vrot.slane %v6999_v28, 4 }
  0xb2   :  { %1008 = vmatprep.mubr.f32.mxu0 %v10417_v3  ;;  %1385 = vmatprep.mubr.f32.mxu1 %v10417_v3 }
  0xb3   :  { %v1491_v48 = vsel %vm249_vm0, %v1489_v18, %v1490_v57  ;;  %v1493_v34 = vsel %vm249_vm0, %v1490_v57, %v1492_v12  ;;  %v1926_v12 = vld [vmem:[%s10426_s1 + $0x40] sm:$0xff] }
  0xb5   :  { %5768 = vmatmul.mubr.msk.f32.gmra.mxu0 %vm200_vm2, %v768_v2  ;;  %5802 = vmatmul.mubr.msk.f32.gmra.mxu1 %vm200_vm2, %v1145_v5 }
  0xb6   :  { %1014 = vmatprep.mubr.f32.mxu0 %v10417_v3  ;;  %1391 = vmatprep.mubr.f32.mxu1 %v10417_v3 }
  0xb9   :  { %5769 = vmatmul.mubr.msk.f32.gmra.mxu0 %vm200_vm2, %v770_v44  ;;  %5803 = vmatmul.mubr.msk.f32.gmra.mxu1 %vm200_vm2, %v1147_v7 }
  0xba   :  { %1020 = vmatprep.mubr.f32.mxu0 %v10417_v3  ;;  %1397 = vmatprep.mubr.f32.mxu1 %v10417_v3 }
  0xbd   :  { %5770 = vmatmul.mubr.msk.f32.gmra.mxu0 %vm200_vm2, %v773_v20  ;;  %5804 = vmatmul.mubr.msk.f32.gmra.mxu1 %vm200_vm2, %v1150_v22  ;;  %v1933_v20 = vld [vmem:[%s10426_s1 + $0x78] sm:$0xff] }
  0xbe   :  { %1026 = vmatprep.mubr.f32.mxu0 %v10417_v3  ;;  %1403 = vmatprep.mubr.f32.mxu1 %v10417_v3  ;;  %v2221_v22 = vld [vmem:[%s10427_s0 + $0x78] sm:$0xff] }
  0xbf   :  { %2022 = vmatpush1.msra.mxu1 %v1933_v20  ;;  %v1503_v20 = vrot.slane %v7148_v9, 4  ;;  %v1925_v9 = vld [vmem:[%s10426_s1 + $0x38] sm:$0xff] }
  0xc0   :  { %2023 = vmatprep.subr.mxu1 %v10417_v3 }
  0xc1   :  { %5771 = vmatmul.mubr.msk.f32.gmra.mxu0 %vm200_vm2, %v775_v32  ;;  %5805 = vmatmul.mubr.msk.f32.gmra.mxu1 %vm200_vm2, %v1152_v33  ;;  %v1932_v32 = vld [vmem:[%s10426_s1 + $0x70] sm:$0xff] }
  0xc2   :  { %1032 = vmatprep.mubr.f32.mxu0 %v10417_v3  ;;  %1409 = vmatprep.mubr.f32.mxu1 %v10417_v3  ;;  %v2220_v33 = vld [vmem:[%s10427_s0 + $0x70] sm:$0xff] }
  0xc3   :  { %2024 = vmatpush1.msra.mxu1 %v1932_v32  ;;  %v2214_v32 = vld [vmem:[%s10427_s0 + $0x40] sm:$0xff] }
  0xc4   :  { %2025 = vmatprep.subr.mxu1 %v10417_v3 }
  0xc5   :  { %5772 = vmatmul.mubr.msk.f32.gmra.mxu0 %vm200_vm2, %v777_v63  ;;  %5806 = vmatmul.mubr.msk.f32.gmra.mxu1 %vm200_vm2, %v1154_v36  ;;  %v1931_v36 = vld [vmem:[%s10426_s1 + $0x68] sm:$0xff] }
  0xc6   :  { %1038 = vmatprep.mubr.f32.mxu0 %v10417_v3  ;;  %1415 = vmatprep.mubr.f32.mxu1 %v10417_v3 }
  0xc7   :  { %2026 = vmatpush1.msra.mxu1 %v1931_v36 }
  0xc8   :  { %2027 = vmatprep.subr.mxu1 %v10417_v3 }
  0xc9   :  { %5773 = vmatmul.mubr.msk.f32.gmra.mxu0 %vm200_vm2, %v780_v43  ;;  %5807 = vmatmul.mubr.msk.f32.gmra.mxu1 %vm200_vm2, %v1157_v53  ;;  %v1497_v43 = vrot.slane %v7087_v55, 4 }
  0xca   :  { %1044 = vmatprep.mubr.f32.mxu0 %v10417_v3  ;;  %1421 = vmatprep.mubr.f32.mxu1 %v10417_v3 }
  0xcb   :  { %v1498_v47 = vsel %vm249_vm0, %v1496_v42, %v1497_v43  ;;  %2028 = vmatpush1.msra.mxu1 %v1930_v45  ;;  %v2212_v45 = vld [vmem:[%s10427_s0 + $0x30] sm:$0xff] }
  0xcc   :  { %2029 = vmatprep.subr.mxu1 %v10417_v3 }
  0xcd   :  { %5774 = vmatmul.mubr.msk.f32.gmra.mxu0 %vm200_vm2, %v782_v8  ;;  %5808 = vmatmul.mubr.msk.f32.gmra.mxu1 %vm200_vm2, %v1159_v11  ;;  %v1929_v11 = vld [vmem:[%s10426_s1 + $0x58] sm:$0xff] }
  0xce   :  { %1050 = vmatprep.mubr.f32.mxu0 %v10417_v3  ;;  %1427 = vmatprep.mubr.f32.mxu1 %v10417_v3 }
  0xcf   :  { %2030 = vmatpush1.msra.mxu1 %v1929_v11 }
  0xd0   :  { %2031 = vmatprep.subr.mxu1 %v10417_v3 }
  0xd1   :  { %5775 = vmatmul.mubr.msk.f32.gmra.mxu0 %vm200_vm2, %v784_v16  ;;  %5809 = vmatmul.mubr.msk.f32.gmra.mxu1 %vm200_vm2, %v1161_v50  ;;  %v1499_v16 = vrot.slane %v7117_v0, 4 }
  0xd2   :  { %1665 = vmatprep.mubr.f32.mxu0 %v10417_v3 }
  0xd5   :  { %v322_v49 = vpop.f32.mrf.mxu0  ;;  %v585_v51 = vpop.f32.mrf.mxu1  ;;  %5820 = vmatmul.mubr.msk.f32.vlgmr.msra.gmra.mxu0 %vm200_vm2, %v7287_v60  ;;  %v1488_v60 = vsel %vm249_vm0, %v1485_v26, %v1487_v61  ;;  %v2216_v61 = vld [vmem:[%s10427_s0 + $0x50] sm:$0xff] }
  0xd6   :  { %v7607_v52 = vadd.f32 %v585_v51, %v322_v49  ;;  %1671 = vmatprep.mubr.f32.mxu0 %v10417_v3  ;;  %2237 = vmatpush1.msra.mxu0 %v2221_v22  ;;  %v2217_v49 = vld [vmem:[%s10427_s0 + $0x58] sm:$0xff]  ;;  %v1928_v51 = vld [vmem:[%s10426_s1 + $0x50] sm:$0xff]  ;;  %v1504_v22 = vrot.slane %v7153_v10, 4 }
  0xd7   :  { %v7614_v62 = vpop.f32.mrf.mxu0  ;;  %v7616_v1 = vpop.f32.mrf.mxu1  ;;  %2238 = vmatprep.subr.mxu0 %v10417_v3  ;;  %2032 = vmatpush1.msra.mxu1 %v1928_v51  ;;  %v2211_v51 = vld [vmem:[%s10427_s0 + $0x28] sm:$0xff] }
  0xd8   :  { %2239 = vmatpush1.msra.mxu0 %v2220_v33  ;;  %2033 = vmatprep.subr.mxu1 %v10417_v3  ;;  %v1505_v36 = vsel %vm249_vm0, %v1503_v20, %v1504_v22  ;;  %v1920_v20 = vld [vmem:[%s10426_s1 + $0x10] sm:$0xff] }
  0xd9   :  { %v328_v21 = vpop.f32.mrf.mxu0  ;;  %v591_v38 = vpop.f32.mrf.mxu1  ;;  %5821 = vmatmul.mubr.msk.f32.gmra.mxu0 %vm200_vm2, %v1486_v17  ;;  %2240 = vmatprep.subr.mxu0 %v10417_v3 }
  0xda   :  { %v7619_v39 = vadd.f32 %v591_v38, %v328_v21  ;;  %1677 = vmatprep.mubr.f32.mxu0 %v10417_v3  ;;  %2241 = vmatpush1.msra.mxu0 %v2219_v4  ;;  %v1500_v38 = vsel %vm249_vm0, %v1497_v43, %v1499_v16  ;;  %v1506_v4 = vrot.slane %v7167_v14, 4  ;;  %v1924_v43 = vld [vmem:[%s10426_s1 + $0x30] sm:$0xff] }
  0xdb   :  { %v7625_v2 = vpop.f32.mrf.mxu0  ;;  %v7627_v23 = vpop.f32.mrf.mxu1  ;;  %2242 = vmatprep.subr.mxu0 %v10417_v3 }
  0xdc   :  { %2243 = vmatpush1.msra.mxu0 %v2218_v54  ;;  %v1507_v11 = vsel %vm249_vm0, %v1504_v22, %v1506_v4 }
  0xdd   :  { %v334_v5 = vpop.f32.mrf.mxu0  ;;  %v597_v44 = vpop.f32.mrf.mxu1  ;;  %5822 = vmatmul.mubr.msk.f32.gmra.mxu0 %vm200_vm2, %v1488_v60  ;;  %2244 = vmatprep.subr.mxu0 %v10417_v3  ;;  %v1501_v60 = vrot.slane %v7136_v6, 4 }
  0xde   :  { %v7630_v7 = vadd.f32 %v597_v44, %v334_v5  ;;  %1683 = vmatprep.mubr.f32.mxu0 %v10417_v3  ;;  %2245 = vmatpush1.msra.mxu0 %v2217_v49  ;;  %v1927_v5 = vld [vmem:[%s10426_s1 + $0x48] sm:$0xff] }
  0xdf   :  { %v7635_v13 = vpop.f32.mrf.mxu0  ;;  %v7637_v27 = vpop.f32.mrf.mxu1  ;;  %2246 = vmatprep.subr.mxu0 %v10417_v3  ;;  %v2215_v44 = vld [vmem:[%s10427_s0 + $0x48] sm:$0xff]  ;;  %2034 = vmatpush1.msra.mxu1 %v1927_v5  ;;  %v1510_v5 = vrot.slane %v7191_v24, 4  ;;  %v2209_v24 = vld [vmem:[%s10427_s0 + $0x18] sm:$0xff] }
  0xe0   :  { %2247 = vmatpush1.msra.mxu0 %v2216_v61  ;;  %2035 = vmatprep.subr.mxu1 %v10417_v3  ;;  %v2210_v61 = vld [vmem:[%s10427_s0 + $0x20] sm:$0xff] }
  0xe1   :  { %v340_v28 = vpop.f32.mrf.mxu0  ;;  %v603_v15 = vpop.f32.mrf.mxu1  ;;  %5823 = vmatmul.mubr.msk.f32.gmra.mxu0 %vm200_vm2, %v1491_v48  ;;  %2248 = vmatprep.subr.mxu0 %v10417_v3 }
  0xe2   :  { %v7646_v29 = vadd.f32 %v603_v15, %v340_v28  ;;  %1689 = vmatprep.mubr.f32.mxu0 %v10417_v3  ;;  %v1502_v15 = vsel %vm249_vm0, %v1499_v16, %v1501_v60  ;;  %2249 = vmatpush1.msra.mxu0 %v2215_v44  ;;  %v1511_v44 = vrot.slane %v7196_v25, 4 }
  0xe3   :  { %v7651_v58 = vpop.f32.mrf.mxu0  ;;  %v7653_v59 = vpop.f32.mrf.mxu1  ;;  %2250 = vmatprep.subr.mxu0 %v10417_v3  ;;  %2036 = vmatpush1.msra.mxu1 %v1926_v12  ;;  %v1921_v12 = vld [vmem:[%s10426_s1 + $0x18] sm:$0xff] }
  0xe4   :  { %2037 = vmatprep.subr.mxu1 %v10417_v3  ;;  %2251 = vmatpush1.msra.mxu0 %v2214_v32  ;;  %v1512_v32 = vsel %vm249_vm0, %v1510_v5, %v1511_v44 }
  0xe5   :  { %v346_v41 = vpop.f32.mrf.mxu0  ;;  %v609_v63 = vpop.f32.mrf.mxu1  ;;  %5824 = vmatmul.mubr.msk.f32.gmra.mxu0 %vm200_vm2, %v1493_v34  ;;  %2252 = vmatprep.subr.mxu0 %v10417_v3 }
  0xe6   :  { %v7671_v37 = vadd.f32 %v609_v63, %v346_v41  ;;  %1695 = vmatprep.mubr.f32.mxu0 %v10417_v3  ;;  %v2213_v41 = vld [vmem:[%s10427_s0 + $0x38] sm:$0xff]  ;;  %2038 = vmatpush1.msra.mxu1 %v1925_v9  ;;  %v1513_v9 = vrot.slane %v7209_v31, 4 }
  0xe7   :  { %v7677_v53 = vpop.f32.mrf.mxu0  ;;  %v7679_v56 = vpop.f32.mrf.mxu1  ;;  %2253 = vmatpush1.msra.mxu0 %v2213_v41  ;;  %2039 = vmatprep.subr.mxu1 %v10417_v3  ;;  %v2208_v41 = vld [vmem:[%s10427_s0 + $0x10] sm:$0xff] }
  0xe8   :  { %2254 = vmatprep.subr.mxu0 %v10417_v3  ;;  %2040 = vmatpush1.msra.mxu1 %v1924_v43  ;;  %v2207_v43 = vld [vmem:[%s10427_s0 + $0x8] sm:$0xff] }
  0xe9   :  { %v352_v55 = vpop.f32.mrf.mxu0  ;;  %v615_v8 = vpop.f32.mrf.mxu1  ;;  %5825 = vmatmul.mubr.msk.f32.gmra.mxu0 %vm200_vm2, %v1495_v40  ;;  %2041 = vmatprep.subr.mxu1 %v10417_v3 }
  0xea   :  { %v7694_v46 = vadd.f32 %v615_v8, %v352_v55  ;;  %1701 = vmatprep.mubr.f32.mxu0 %v10417_v3  ;;  %v1923_v55 = vld [vmem:[%s10426_s1 + $0x28] sm:$0xff]  ;;  %2255 = vmatpush1.msra.mxu0 %v2212_v45 }
  0xeb   :  { %v7699_v50 = vpop.f32.mrf.mxu0  ;;  %v7701_v26 = vpop.f32.mrf.mxu1  ;;  %2256 = vmatprep.subr.mxu0 %v10417_v3  ;;  %2042 = vmatpush1.msra.mxu1 %v1923_v55 }
  0xec   :  { %2043 = vmatprep.subr.mxu1 %v10417_v3  ;;  %2257 = vmatpush1.msra.mxu0 %v2211_v51  ;;  %v2206_v51 = vld [vmem:[%s10427_s0] sm:$0xff] }
  0xed   :  { %v358_v0 = vpop.f32.mrf.mxu0  ;;  %v621_v17 = vpop.f32.mrf.mxu1  ;;  %5826 = vmatmul.mubr.msk.f32.gmra.mxu0 %vm200_vm2, %v1498_v47  ;;  %v1508_v47 = vrot.slane %v7179_v19, 4  ;;  %2258 = vmatprep.subr.mxu0 %v10417_v3 }
  0xee   :  { %v7716_v21 = vadd.f32 %v621_v17, %v358_v0  ;;  %1707 = vmatprep.mubr.f32.mxu0 %v10417_v3  ;;  %v1922_v0 = vld [vmem:[%s10426_s1 + $0x20] sm:$0xff]  ;;  %2259 = vmatpush1.msra.mxu0 %v2210_v61 }
  0xef   :  { %v7721_v18 = vpop.f32.mrf.mxu0  ;;  %v7723_v57 = vpop.f32.mrf.mxu1  ;;  %v1509_v60 = vsel %vm249_vm0, %v1506_v4, %v1508_v47  ;;  %2044 = vmatpush1.msra.mxu1 %v1922_v0  ;;  %2260 = vmatprep.subr.mxu0 %v10417_v3  ;;  %v1918_v47 = vld [vmem:[%s10426_s1] sm:$0xff] }
  0xf0   :  { %2045 = vmatprep.subr.mxu1 %v10417_v3  ;;  %2261 = vmatpush1.msra.mxu0 %v2209_v24 }
  0xf1   :  { %v364_v6 = vpop.f32.mrf.mxu0  ;;  %v627_v48 = vpop.f32.mrf.mxu1  ;;  %5827 = vmatmul.mubr.msk.f32.gmra.mxu0 %vm200_vm2, %v1500_v38  ;;  %2046 = vmatpush1.msra.mxu1 %v1921_v12 }
  0xf2   :  { %v7738_v28 = vadd.f32 %v627_v48, %v364_v6  ;;  %1713 = vmatprep.mubr.f32.mxu0 %v10417_v3  ;;  %2047 = vmatprep.subr.mxu1 %v10417_v3 }
  0xf3   :  { %v7744_v34 = vpop.f32.mrf.mxu0  ;;  %v7746_v30 = vpop.f32.mrf.mxu1  ;;  %2262 = vmatprep.subr.mxu0 %v10417_v3  ;;  %2048 = vmatpush1.msra.mxu1 %v1920_v20  ;;  %v1946_v20 = vld [vmem:[%s10426_s1 + $0xe0] sm:$0xff] }
  0xf4   :  { %10428 = vst [vmem:[#allocation2_spill] sm:$0xff] %v7746_v30  ;;  %2049 = vmatprep.subr.mxu1 %v10417_v3  ;;  %2263 = vmatpush1.msra.mxu0 %v2208_v41  ;;  %v2234_v41 = vld [vmem:[%s10427_s0 + $0xe0] sm:$0xff] }
  0xf5   :  { %v370_v10 = vpop.f32.mrf.mxu0  ;;  %v633_v33 = vpop.f32.mrf.mxu1  ;;  %5828 = vmatmul.mubr.msk.f32.gmra.mxu0 %vm200_vm2, %v1502_v15  ;;  %2264 = vmatprep.subr.mxu0 %v10417_v3 }
  0xf6   :  { %v7761_v63 = vadd.f32 %v633_v33, %v370_v10  ;;  %1719 = vmatprep.mubr.f32.mxu0 %v10417_v3  ;;  %2265 = vmatpush1.msra.mxu0 %v2207_v43 }
  0xf7   :  { %v7766_v40 = vpop.f32.mrf.mxu0  ;;  %v7768_v42 = vpop.f32.mrf.mxu1  ;;  %2266 = vmatprep.subr.mxu0 %v10417_v3 }
  0xf8   :  { %10429 = vst [vmem:[#allocation3_spill] sm:$0xff] %v7766_v40  ;;  %10430 = vst [vmem:[#allocation4_spill] sm:$0xff] %v7768_v42  ;;  %2267 = vmatpush1.msra.mxu0 %v2206_v51  ;;  %v2233_v51 = vld [vmem:[%s10427_s0 + $0xd8] sm:$0xff] }
  0xf9   :  { %v376_v14 = vpop.f32.mrf.mxu0  ;;  %v639_v54 = vpop.f32.mrf.mxu1  ;;  %5829 = vmatmul.mubr.msk.f32.gmra.mxu0 %vm200_vm2, %v1505_v36  ;;  %v1919_v36 = vld [vmem:[%s10426_s1 + $0x8] sm:$0xff]  ;;  %2272 = vmatprep.subr.mxu0 %v10417_v3 }
  0xfa   :  { %v7783_v8 = vadd.f32 %v639_v54, %v376_v14  ;;  %1725 = vmatprep.mubr.f32.mxu0 %v10417_v3  ;;  %v1514_v14 = vsel %vm249_vm0, %v1511_v44, %v1513_v9  ;;  %v1515_v54 = vrot.slane %v7221_v35, 4  ;;  %2050 = vmatpush1.msra.mxu1 %v1919_v36  ;;  %v6793_v44 = vld [vmem:[%s10425_s23 + $0xa8] sm:$0xff] }
  0xfb   :  { %v7788_v16 = vpop.f32.mrf.mxu0  ;;  %v7790_v49 = vpop.f32.mrf.mxu1  ;;  %2051 = vmatprep.subr.mxu1 %v10417_v3  ;;  %v1518_v12 = vrot.slane %v6793_v44, 4 }
  0xfc   :  { %10431 = vst [vmem:[#allocation5_spill] sm:$0xff] %v7788_v16  ;;  %10432 = vst [vmem:[#allocation6_spill] sm:$0xff] %v7790_v49  ;;  %v1516_v61 = vsel %vm249_vm0, %v1513_v9, %v1515_v54  ;;  %2052 = vmatpush1.msra.mxu1 %v1918_v47  ;;  %v1945_v47 = vld [vmem:[%s10426_s1 + $0xd8] sm:$0xff] }
  0xfd   :  { %v382_v19 = vpop.f32.mrf.mxu0  ;;  %v645_v17 = vpop.f32.mrf.mxu1  ;;  %5830 = vmatmul.mubr.msk.f32.gmra.mxu0 %vm200_vm2, %v1507_v11  ;;  %2057 = vmatprep.subr.mxu1 %v10417_v3 }
  0xfe   :  { %v7805_v38 = vadd.f32 %v645_v17, %v382_v19  ;;  %1731 = vmatprep.mubr.f32.mxu0 %v10417_v3  ;;  %v1947_v19 = vld [vmem:[%s10426_s1 + $0xe8] sm:$0xff] }
  0xff   :  { %v7811_v6 = vpop.f32.mrf.mxu0  ;;  %v7813_v48 = vpop.f32.mrf.mxu1  ;;  %2058 = vmatpush2.msra.mxu1 %v1947_v19  ;;  %v1944_v19 = vld [vmem:[%s10426_s1 + $0xd0] sm:$0xff] }
 0x100   :  { %10433 = vst [vmem:[#allocation7_spill] sm:$0xff] %v7811_v6  ;;  %10434 = vst [vmem:[#allocation8_spill] sm:$0xff] %v7813_v48  ;;  %2059 = vmatprep.subr.mxu1 %v10417_v3 }
 0x101   :  { %v388_v25 = vpop.f32.mrf.mxu0  ;;  %v651_v15 = vpop.f32.mrf.mxu1  ;;  %5831 = vmatmul.mubr.msk.f32.gmra.mxu0 %vm200_vm2, %v1509_v60  ;;  %v6792_v60 = vld [vmem:[%s10425_s23 + $0xa0] sm:$0xff]  ;;  %2060 = vmatpush2.msra.mxu1 %v1946_v20 }
 0x102   :  { %v7828_v22 = vadd.f32 %v651_v15, %v388_v25  ;;  %1737 = vmatprep.mubr.f32.mxu0 %v10417_v3  ;;  %v1517_v5 = vrot.slane %v6792_v60, 4  ;;  %v2235_v15 = vld [vmem:[%s10427_s0 + $0xe8] sm:$0xff]  ;;  %2061 = vmatprep.subr.mxu1 %v10417_v3 }
 0x103   :  { %v7833_v10 = vpop.f32.mrf.mxu0  ;;  %v7835_v33 = vpop.f32.mrf.mxu1  ;;  %2273 = vmatpush2.msra.mxu0 %v2235_v15  ;;  %2062 = vmatpush2.msra.mxu1 %v1945_v47 }
 0x104   :  { %10435 = vst [vmem:[#allocation9_spill] sm:$0xff] %v7833_v10  ;;  %10436 = vst [vmem:[#allocation10_spill] sm:$0xff] %v7835_v33  ;;  %2274 = vmatprep.subr.mxu0 %v10417_v3  ;;  %2063 = vmatprep.subr.mxu1 %v10417_v3 }
 0x105   :  { %v394_v31 = vpop.f32.mrf.mxu0  ;;  %v657_v4 = vpop.f32.mrf.mxu1  ;;  %5832 = vmatmul.mubr.msk.f32.gmra.mxu0 %vm200_vm2, %v1512_v32  ;;  %2064 = vmatpush2.msra.mxu1 %v1944_v19 }
 0x106   :  { %v7850_v45 = vadd.f32 %v657_v4, %v394_v31  ;;  %1743 = vmatprep.mubr.f32.mxu0 %v10417_v3  ;;  %v1519_v31 = vsel %vm249_vm0, %v1517_v5, %v1518_v12  ;;  %v6794_v4 = vld [vmem:[%s10425_s23 + $0xb0] sm:$0xff]  ;;  %2275 = vmatpush2.msra.mxu0 %v2234_v41  ;;  %v6795_v5 = vld [vmem:[%s10425_s23 + $0xb8] sm:$0xf] }
 0x107   :  { %v7855_v55 = vpop.f32.mrf.mxu0  ;;  %v7857_v11 = vpop.f32.mrf.mxu1  ;;  %v1520_v43 = vrot.slane %v6794_v4, 4  ;;  %2276 = vmatprep.subr.mxu0 %v10417_v3  ;;  %v1522_v44 = vrot.slane %v6795_v5, 4  ;;  %2065 = vmatprep.subr.mxu1 %v10417_v3 }
 0x108   :  { %10437 = vst [vmem:[#allocation11_spill] sm:$0xff] %v7855_v55  ;;  %10438 = vst [vmem:[#allocation12_spill] sm:$0xff] %v7857_v11  ;;  %2277 = vmatpush2.msra.mxu0 %v2233_v51  ;;  %v6796_v51 = vld [vmem:[%s10425_s23 + $0xc0] sm:$0xff] }
 0x109   :  { %v400_v35 = vpop.f32.mrf.mxu0  ;;  %v663_v0 = vpop.f32.mrf.mxu1  ;;  %5833 = vmatmul.mubr.msk.f32.gmra.mxu0 %vm200_vm2, %v1514_v14  ;;  %v1521_v60 = vsel %vm249_vm0, %v1518_v12, %v1520_v43  ;;  %2278 = vmatprep.subr.mxu0 %v10417_v3  ;;  %v1943_v12 = vld [vmem:[%s10426_s1 + $0xc8] sm:$0xff]  ;;  %v1523_v47 = vsel %vm249_vm0, %v1520_v43, %v1522_v44  ;;  %v1942_v43 = vld [vmem:[%s10426_s1 + $0xc0] sm:$0xff] }
 0x10a   :  { %v7872_v17 = vadd.f32 %v663_v0, %v400_v35  ;;  %1749 = vmatprep.mubr.f32.mxu0 %v10417_v3  ;;  %2066 = vmatpush2.msra.mxu1 %v1943_v12  ;;  %v2230_v44 = vld [vmem:[%s10427_s0 + $0xc0] sm:$0xff]  ;;  %v1941_v12 = vld [vmem:[%s10426_s1 + $0xb8] sm:$0xff] }
 0x10b   :  { %v7882_v24 = vpop.f32.mrf.mxu0  ;;  %v7884_v25 = vpop.f32.mrf.mxu1  ;;  %2067 = vmatprep.subr.mxu1 %v10417_v3 }
 0x10c   :  { %10439 = vst [vmem:[#allocation13_spill] sm:$0xff] %v7882_v24  ;;  %10440 = vst [vmem:[#allocation14_spill] sm:$0xff] %v7884_v25  ;;  %2068 = vmatpush2.msra.mxu1 %v1942_v43 }
 0x10d   :  { %v406_v32 = vpop.f32.mrf.mxu0  ;;  %v669_v9 = vpop.f32.mrf.mxu1  ;;  %5834 = vmatmul.mubr.msk.f32.gmra.mxu0 %vm200_vm2, %v1516_v61  ;;  %2069 = vmatprep.subr.mxu1 %v10417_v3 }
 0x10e   :  { %v7899_v36 = vadd.f32 %v669_v9, %v406_v32  ;;  %1755 = vmatprep.mubr.f32.mxu0 %v10417_v3  ;;  %v2232_v32 = vld [vmem:[%s10427_s0 + $0xd0] sm:$0xff]  ;;  %2070 = vmatpush2.msra.mxu1 %v1941_v12 }
 0x10f   :  { %v7906_v14 = vpop.f32.mrf.mxu0  ;;  %v7908_v54 = vpop.f32.mrf.mxu1  ;;  %2279 = vmatpush2.msra.mxu0 %v2232_v32  ;;  %2071 = vmatprep.subr.mxu1 %v10417_v3 }
 0x110   :  { %10441 = vst [vmem:[#allocation15_spill] sm:$0xff] %v7906_v14  ;;  %10442 = vst [vmem:[#allocation16_spill] sm:$0xff] %v7908_v54  ;;  %2280 = vmatprep.subr.mxu0 %v10417_v3 }
 0x111   :  { %v412_v35 = vpop.f32.mrf.mxu0  ;;  %v675_v0 = vpop.f32.mrf.mxu1  ;;  %5835 = vmatmul.mubr.msk.f32.gmra.mxu0 %vm200_vm2, %v1519_v31  ;;  %v2231_v31 = vld [vmem:[%s10427_s0 + $0xc8] sm:$0xff] }
 0x112   :  { %v7923_v61 = vadd.f32 %v675_v0, %v412_v35  ;;  %1761 = vmatprep.mubr.f32.mxu0 %v10417_v3  ;;  %v1524_v35 = vrot.slane %v6796_v51, 4  ;;  %v6797_v0 = vld [vmem:[%s10425_s23 + $0xc8] sm:$0xff]  ;;  %2281 = vmatpush2.msra.mxu0 %v2231_v31  ;;  %v6798_v51 = vld [vmem:[%s10425_s23 + $0xd0] sm:$0xff] }
 0x113   :  { %v7930_v15 = vpop.f32.mrf.mxu0  ;;  %v7932_v20 = vpop.f32.mrf.mxu1  ;;  %v1525_v19 = vrot.slane %v6797_v0, 4  ;;  %2282 = vmatprep.subr.mxu0 %v10417_v3  ;;  %v1527_v0 = vrot.slane %v6798_v51, 4 }
 0x114   :  { %10443 = vst [vmem:[#allocation17_spill] sm:$0xff] %v7930_v15  ;;  %10444 = vst [vmem:[#allocation18_spill] sm:$0xff] %v7932_v20  ;;  %2283 = vmatpush2.msra.mxu0 %v2230_v44  ;;  %v2228_v44 = vld [vmem:[%s10427_s0 + $0xb0] sm:$0xff] }
 0x115   :  { %v418_v9 = vpop.f32.mrf.mxu0  ;;  %v681_v41 = vpop.f32.mrf.mxu1  ;;  %5836 = vmatmul.mubr.msk.f32.gmra.mxu0 %vm200_vm2, %v1521_v60  ;;  %v1526_v31 = vsel %vm249_vm0, %v1524_v35, %v1525_v19  ;;  %2284 = vmatprep.subr.mxu0 %v10417_v3  ;;  %v1940_v35 = vld [vmem:[%s10426_s1 + $0xb0] sm:$0xff]  ;;  %v1528_v12 = vsel %vm249_vm0, %v1525_v19, %v1527_v0  ;;  %v2227_v19 = vld [vmem:[%s10427_s0 + $0xa8] sm:$0xff] }
 0x116   :  { %v7947_v4 = vadd.f32 %v681_v41, %v418_v9  ;;  %1767 = vmatprep.mubr.f32.mxu0 %v10417_v3  ;;  %2072 = vmatpush2.msra.mxu1 %v1940_v35  ;;  %v1938_v35 = vld [vmem:[%s10426_s1 + $0xa0] sm:$0xff] }
 0x117   :  { %v7957_v60 = vpop.f32.mrf.mxu0  ;;  %v7959_v5 = vpop.f32.mrf.mxu1  ;;  %2073 = vmatprep.subr.mxu1 %v10417_v3 }
 0x118   :  { %10445 = vst [vmem:[#allocation19_spill] sm:$0xff] %v7957_v60  ;;  %10446 = vst [vmem:[#allocation20_spill] sm:$0xff] %v7959_v5 }
 0x119   :  { %v424_v9 = vpop.f32.mrf.mxu0  ;;  %v687_v32 = vpop.f32.mrf.mxu1  ;;  %5837 = vmatmul.mubr.msk.f32.gmra.mxu0 %vm200_vm2, %v1523_v47 }
 0x11a   :  { %v7974_v41 = vadd.f32 %v687_v32, %v424_v9  ;;  %1773 = vmatprep.mubr.f32.mxu0 %v10417_v3  ;;  %v2229_v9 = vld [vmem:[%s10427_s0 + $0xb8] sm:$0xff] }
 0x11b   :  { %v7981_v5 = vpop.f32.mrf.mxu0  ;;  %v7983_v47 = vpop.f32.mrf.mxu1  ;;  %2285 = vmatpush2.msra.mxu0 %v2229_v9 }
 0x11c   :  { %10447 = vst [vmem:[#allocation21_spill] sm:$0xff] %v7981_v5  ;;  %10448 = vst [vmem:[#allocation22_spill] sm:$0xff] %v7983_v47  ;;  %v6799_v47 = vld [vmem:[%s10425_s23 + $0xd8] sm:$0xf]  ;;  %2286 = vmatprep.subr.mxu0 %v10417_v3 }
 0x11d   :  { %v430_v32 = vpop.f32.mrf.mxu0  ;;  %v693_v43 = vpop.f32.mrf.mxu1  ;;  %5838 = vmatmul.mubr.msk.f32.gmra.mxu0 %vm200_vm2, %v1526_v31  ;;  %v1529_v5 = vrot.slane %v6799_v47, 4 }
 0x11e   :  { %v7998_v51 = vadd.f32 %v693_v43, %v430_v32  ;;  %1779 = vmatprep.mubr.f32.mxu0 %v10417_v3  ;;  %v1939_v32 = vld [vmem:[%s10426_s1 + $0xa8] sm:$0xff]  ;;  %2287 = vmatpush2.msra.mxu0 %v2228_v44 }
 0x11f   :  { %v8005_v60 = vpop.f32.mrf.mxu0  ;;  %v8007_v31 = vpop.f32.mrf.mxu1  ;;  %2288 = vmatprep.subr.mxu0 %v10417_v3  ;;  %v1530_v44 = vsel %vm249_vm0, %v1527_v0, %v1529_v5  ;;  %2074 = vmatpush2.msra.mxu1 %v1939_v32  ;;  %v2226_v5 = vld [vmem:[%s10427_s0 + $0xa0] sm:$0xff]  ;;  %v1937_v0 = vld [vmem:[%s10426_s1 + $0x98] sm:$0xff] }
 0x120   :  { %10449 = vst [vmem:[#allocation23_spill] sm:$0xff] %v8005_v60  ;;  %10450 = vst [vmem:[#allocation24_spill] sm:$0xff] %v8007_v31  ;;  %v6800_v31 = vld [vmem:[%s10425_s23 + $0xe0] sm:$0xff]  ;;  %2289 = vmatpush2.msra.mxu0 %v2227_v19  ;;  %2075 = vmatprep.subr.mxu1 %v10417_v3  ;;  %v2225_v19 = vld [vmem:[%s10427_s0 + $0x98] sm:$0xff] }
 0x121   :  { %v436_v47 = vpop.f32.mrf.mxu0  ;;  %v699_v9 = vpop.f32.mrf.mxu1  ;;  %5839 = vmatmul.mubr.msk.f32.gmra.mxu0 %vm200_vm2, %v1528_v12  ;;  %v1531_v60 = vrot.slane %v6800_v31, 4  ;;  %v6801_v12 = vld [vmem:[%s10425_s23 + $0xe8] sm:$0xff]  ;;  %2290 = vmatprep.subr.mxu0 %v10417_v3 }
 0x122   :  { %v8022_v43 = vadd.f32 %v699_v9, %v436_v47  ;;  %1785 = vmatprep.mubr.f32.mxu0 %v10417_v3  ;;  %v1532_v20 = vrot.slane %v6801_v12, 4  ;;  %2076 = vmatpush2.msra.mxu1 %v1938_v35  ;;  %v6802_v35 = vld [vmem:[%s10425_s23 + $0xf0] sm:$0xff] }
 0x123   :  { %v8032_v15 = vpop.f32.mrf.mxu0  ;;  %v8034_v54 = vpop.f32.mrf.mxu1  ;;  %2077 = vmatprep.subr.mxu1 %v10417_v3  ;;  %v1534_v12 = vrot.slane %v6802_v35, 4  ;;  %2291 = vmatpush2.msra.mxu0 %v2226_v5 }
 0x124   :  { %10451 = vst [vmem:[#allocation25_spill] sm:$0xff] %v8032_v15  ;;  %10452 = vst [vmem:[#allocation26_spill] sm:$0xff] %v8034_v54  ;;  %v1533_v9 = vsel %vm249_vm0, %v1531_v60, %v1532_v20  ;;  %2292 = vmatprep.subr.mxu0 %v10417_v3  ;;  %2078 = vmatpush2.msra.mxu1 %v1937_v0  ;;  %v2224_v60 = vld [vmem:[%s10427_s0 + $0x90] sm:$0xff]  ;;  %v1935_v0 = vld [vmem:[%s10426_s1 + $0x88] sm:$0xff] }
 0x125   :  { %v442_v31 = vpop.f32.mrf.mxu0  ;;  %v705_v32 = vpop.f32.mrf.mxu1  ;;  %5840 = vmatmul.mubr.msk.f32.gmra.mxu0 %vm200_vm2, %v1530_v44  ;;  %2079 = vmatprep.subr.mxu1 %v10417_v3 }
 0x126   :  { %v8049_v47 = vadd.f32 %v705_v32, %v442_v31  ;;  %1791 = vmatprep.mubr.f32.mxu0 %v10417_v3  ;;  %v1936_v31 = vld [vmem:[%s10426_s1 + $0x90] sm:$0xff]  ;;  %2293 = vmatpush2.msra.mxu0 %v2225_v19  ;;  %v1535_v19 = vsel %vm249_vm0, %v1532_v20, %v1534_v12  ;;  %v1934_v20 = vld [vmem:[%s10426_s1 + $0x80] sm:$0xff] }
 0x127   :  { %v8056_v54 = vpop.f32.mrf.mxu0  ;;  %v8058_v44 = vpop.f32.mrf.mxu1  ;;  %2294 = vmatprep.subr.mxu0 %v10417_v3  ;;  %2080 = vmatpush2.msra.mxu1 %v1936_v31 }
 0x128   :  { %10453 = vst [vmem:[#allocation27_spill] sm:$0xff] %v8056_v54  ;;  %10454 = vst [vmem:[#allocation28_spill] sm:$0xff] %v8058_v44  ;;  %v6803_v44 = vld [vmem:[%s10425_s23 + $0xf8] sm:$0xf]  ;;  %2295 = vmatpush2.msra.mxu0 %v2224_v60  ;;  %2081 = vmatprep.subr.mxu1 %v10417_v3  ;;  %v2222_v60 = vld [vmem:[%s10427_s0 + $0x80] sm:$0xff] }
 0x129   :  { %v448_v32 = vpop.f32.mrf.mxu0  ;;  %v711_v5 = vpop.f32.mrf.mxu1  ;;  %5841 = vmatmul.mubr.msk.f32.gmra.mxu0 %vm200_vm2, %v1533_v9  ;;  %v1536_v54 = vrot.slane %v6803_v44, 4  ;;  %2296 = vmatprep.subr.mxu0 %v10417_v3 }
 0x12a   :  { %v8073_v35 = vadd.f32 %v711_v5, %v448_v32  ;;  %1797 = vmatprep.mubr.f32.mxu0 %v10417_v3  ;;  %v2223_v32 = vld [vmem:[%s10427_s0 + $0x88] sm:$0xff]  ;;  %2082 = vmatpush2.msra.mxu1 %v1935_v0 }
 0x12b   :  { %v8080_v15 = vpop.f32.mrf.mxu0  ;;  %v8082_v9 = vpop.f32.mrf.mxu1  ;;  %2083 = vmatprep.subr.mxu1 %v10417_v3  ;;  %v1537_v0 = vsel %vm249_vm0, %v1534_v12, %v1536_v54  ;;  %2297 = vmatpush2.msra.mxu0 %v2223_v32 }
 0x12c   :  { %10455 = vst [vmem:[#allocation29_spill] sm:$0xff] %v8080_v15  ;;  %10456 = vst [vmem:[#allocation30_spill] sm:$0xff] %v8082_v9  ;;  %2298 = vmatprep.subr.mxu0 %v10417_v3  ;;  %2084 = vmatpush2.msra.mxu1 %v1934_v20 }
 0x12d   :  { %v454_v44 = vpop.f32.mrf.mxu0  ;;  %v717_v31 = vpop.f32.mrf.mxu1  ;;  %5842 = vmatmul.mubr.msk.f32.gmra.mxu0 %vm200_vm2, %v1535_v19  ;;  %2506 = vmatprep.subr.mxu1 %v10417_v3 }
 0x12e   :  { %v8097_v5 = vadd.f32 %v717_v31, %v454_v44  ;;  %1803 = vmatprep.mubr.f32.mxu0 %v10417_v3  ;;  %2299 = vmatpush2.msra.mxu0 %v2222_v60 }
 0x12f   :  { %v8101_v9 = vpop.f32.mrf.mxu0  ;;  %v8103_v15 = vpop.f32.mrf.mxu1 }
 0x130   :  { %10457 = vst [vmem:[#allocation31_spill] sm:$0xff] %v8101_v9  ;;  %10458 = vst [vmem:[#allocation32_spill] sm:$0xff] %v8103_v15 }
 0x131   :  { %v460_v19 = vpop.f32.mrf.mxu0  ;;  %v723_v14 = vpop.f32.mrf.mxu1  ;;  %5843 = vmatmul.mubr.msk.f32.gmra.mxu0 %vm200_vm2, %v1537_v0 }
 0x132   :  { %v8108_v44 = vadd.f32 %v723_v14, %v460_v19 }
 0x133   :  { %v8110_v31 = vpop.f32.mrf.mxu0  ;;  %v8112_v54 = vpop.f32.mrf.mxu1 }
 0x134   :  { %10459 = vst [vmem:[#allocation33_spill] sm:$0xff] %v8110_v31  ;;  %10460 = vst [vmem:[#allocation34_spill] sm:$0xff] %v8112_v54 }
 0x135   :  { %v914_v12 = vpop.f32.mrf.mxu0  ;;  %v8114_v32 = vpop.f32.mrf.mxu1 }
 0x136   :  { %v8117_v15 = vadd.f32 %v914_v12, %v7607_v52 }
 0x137   :  { %v8119_v20 = vpop.f32.mrf.mxu0  ;;  %v8121_v60 = vpop.f32.mrf.mxu1 }
 0x139   :  { %v920_v3 = vpop.f32.mrf.mxu0  ;;  %v8128_v0 = vpop.f32.mrf.mxu1 }
 0x13a   :  { %v8124_v9 = vadd.f32 %v920_v3, %v7619_v39 }
 0x13b   :  { %v8126_v14 = vpop.f32.mrf.mxu0  ;;  %v8133_v31 = vpop.f32.mrf.mxu1 }
 0x13d   :  { %v926_v19 = vpop.f32.mrf.mxu0  ;;  %v8140_v24 = vpop.f32.mrf.mxu1 }
 0x13e   :  { %v8131_v54 = vadd.f32 %v926_v19, %v7630_v7 }
 0x13f   :  { %v8135_v52 = vpop.f32.mrf.mxu0  ;;  %v8147_v55 = vpop.f32.mrf.mxu1 }
 0x141   :  { %v932_v12 = vpop.f32.mrf.mxu0  ;;  %v8154_v10 = vpop.f32.mrf.mxu1 }
 0x142   :  { %v8138_v25 = vadd.f32 %v932_v12, %v7646_v29 }
 0x143   :  { %v8142_v3 = vpop.f32.mrf.mxu0  ;;  %v8161_v6 = vpop.f32.mrf.mxu1 }
 0x145   :  { %v938_v39 = vpop.f32.mrf.mxu0  ;;  %v8168_v16 = vpop.f32.mrf.mxu1 }
 0x146   :  { %v8145_v11 = vadd.f32 %v938_v39, %v7671_v37 }
 0x147   :  { %v8149_v7 = vpop.f32.mrf.mxu0  ;;  %v8175_v40 = vpop.f32.mrf.mxu1 }
 0x149   :  { %v944_v19 = vpop.f32.mrf.mxu0  ;;  %v8182_v30 = vpop.f32.mrf.mxu1 }
 0x14a   :  { %v8152_v33 = vadd.f32 %v944_v19, %v7694_v46 }
 0x14b   :  { %v8156_v29 = vpop.f32.mrf.mxu0 }
 0x14d   :  { %v950_v12 = vpop.f32.mrf.mxu0 }
 0x14e   :  { %v8159_v48 = vadd.f32 %v950_v12, %v7716_v21 }
 0x14f   :  { %v8163_v37 = vpop.f32.mrf.mxu0 }
 0x150   :  { %10461 = vst [vmem:[#allocation35_spill] sm:$0xff] %v8159_v48 }
 0x151   :  { %v956_v39 = vpop.f32.mrf.mxu0 }
 0x152   :  { %v8166_v49 = vadd.f32 %v956_v39, %v7738_v28 }
 0x153   :  { %v8170_v46 = vpop.f32.mrf.mxu0 }
 0x154   :  { %10462 = vst [vmem:[#allocation36_spill] sm:$0xff] %v8166_v49  ;;  %10463 = vst [vmem:[#allocation37_spill] sm:$0xff] %v8170_v46  ;;  %v8189_v46 = vpop.f32.mrf.mxu1 }
 0x155   :  { %v962_v19 = vpop.f32.mrf.mxu0 }
 0x156   :  { %v8173_v42 = vadd.f32 %v962_v19, %v7761_v63 }
 0x157   :  { %v8177_v21 = vpop.f32.mrf.mxu0 }
 0x158   :  { %10464 = vst [vmem:[#allocation38_spill] sm:$0xff] %v8173_v42  ;;  %10465 = vst [vmem:[#allocation39_spill] sm:$0xff] %v8177_v21  ;;  %v8196_v21 = vpop.f32.mrf.mxu1 }
 0x159   :  { %v968_v12 = vpop.f32.mrf.mxu0 }
 0x15a   :  { %v8180_v48 = vadd.f32 %v968_v12, %v7783_v8 }
 0x15b   :  { %v8184_v28 = vpop.f32.mrf.mxu0 }
 0x15c   :  { %10466 = vst [vmem:[#allocation40_spill] sm:$0xff] %v8180_v48  ;;  %10467 = vst [vmem:[#allocation41_spill] sm:$0xff] %v8184_v28  ;;  %v8203_v28 = vpop.f32.mrf.mxu1 }
 0x15d   :  { %v974_v39 = vpop.f32.mrf.mxu0 }
 0x15e   :  { %v8187_v49 = vadd.f32 %v974_v39, %v7805_v38 }
 0x15f   :  { %v8191_v63 = vpop.f32.mrf.mxu0 }
 0x160   :  { %10468 = vst [vmem:[#allocation42_spill] sm:$0xff] %v8187_v49  ;;  %10469 = vst [vmem:[#allocation43_spill] sm:$0xff] %v8191_v63  ;;  %v8210_v63 = vpop.f32.mrf.mxu1 }
 0x161   :  { %v980_v19 = vpop.f32.mrf.mxu0 }
 0x162   :  { %v8194_v42 = vadd.f32 %v980_v19, %v7828_v22 }
 0x163   :  { %v8198_v8 = vpop.f32.mrf.mxu0 }
 0x164   :  { %10470 = vst [vmem:[#allocation44_spill] sm:$0xff] %v8194_v42  ;;  %10471 = vst [vmem:[#allocation45_spill] sm:$0xff] %v8198_v8  ;;  %v8217_v8 = vpop.f32.mrf.mxu1 }
 0x165   :  { %v986_v12 = vpop.f32.mrf.mxu0 }
 0x166   :  { %v8201_v48 = vadd.f32 %v986_v12, %v7850_v45 }
 0x167   :  { %v8205_v38 = vpop.f32.mrf.mxu0 }
 0x168   :  { %10472 = vst [vmem:[#allocation46_spill] sm:$0xff] %v8201_v48  ;;  %10473 = vst [vmem:[#allocation47_spill] sm:$0xff] %v8205_v38  ;;  %v8224_v38 = vpop.f32.mrf.mxu1 }
 0x169   :  { %v992_v39 = vpop.f32.mrf.mxu0 }
 0x16a   :  { %v8208_v49 = vadd.f32 %v992_v39, %v7872_v17 }
 0x16b   :  { %v8212_v22 = vpop.f32.mrf.mxu0 }
 0x16c   :  { %10474 = vst [vmem:[#allocation48_spill] sm:$0xff] %v8208_v49  ;;  %10475 = vst [vmem:[#allocation49_spill] sm:$0xff] %v8212_v22  ;;  %v8231_v22 = vpop.f32.mrf.mxu1 }
 0x16d   :  { %v998_v19 = vpop.f32.mrf.mxu0 }
 0x16e   :  { %v8215_v42 = vadd.f32 %v998_v19, %v7899_v36 }
 0x16f   :  { %v8219_v45 = vpop.f32.mrf.mxu0 }
 0x170   :  { %10476 = vst [vmem:[#allocation50_spill] sm:$0xff] %v8215_v42  ;;  %10477 = vst [vmem:[#allocation51_spill] sm:$0xff] %v8219_v45  ;;  %v8238_v45 = vpop.f32.mrf.mxu1 }
 0x171   :  { %v1004_v12 = vpop.f32.mrf.mxu0 }
 0x172   :  { %v8222_v48 = vadd.f32 %v1004_v12, %v7923_v61 }
 0x173   :  { %v8226_v17 = vpop.f32.mrf.mxu0 }
 0x174   :  { %10478 = vst [vmem:[#allocation52_spill] sm:$0xff] %v8222_v48  ;;  %10479 = vst [vmem:[#allocation53_spill] sm:$0xff] %v8226_v17  ;;  %v8245_v17 = vpop.f32.mrf.mxu1 }
 0x175   :  { %v1010_v39 = vpop.f32.mrf.mxu0 }
 0x176   :  { %v8229_v49 = vadd.f32 %v1010_v39, %v7947_v4 }
 0x177   :  { %v8233_v36 = vpop.f32.mrf.mxu0 }
 0x178   :  { %10480 = vst [vmem:[#allocation54_spill] sm:$0xff] %v8229_v49  ;;  %10481 = vst [vmem:[#allocation55_spill] sm:$0xff] %v8233_v36  ;;  %v8252_v36 = vpop.f32.mrf.mxu1 }
 0x179   :  { %v1016_v19 = vpop.f32.mrf.mxu0  ;;  %10487 = vst [vmem:[#allocation61_spill] sm:$0xff] %v8252_v36 }
 0x17a   :  { %v8236_v42 = vadd.f32 %v1016_v19, %v7974_v41 }
 0x17b   :  { %v8240_v61 = vpop.f32.mrf.mxu0 }
 0x17c   :  { %10482 = vst [vmem:[#allocation56_spill] sm:$0xff] %v8236_v42  ;;  %10483 = vst [vmem:[#allocation57_spill] sm:$0xff] %v8240_v61  ;;  %v8259_v61 = vpop.f32.mrf.mxu1 }
 0x17d   :  { %v1022_v12 = vpop.f32.mrf.mxu0 }
 0x17e   :  { %v8243_v48 = vadd.f32 %v1022_v12, %v7998_v51 }
 0x17f   :  { %v8247_v4 = vpop.f32.mrf.mxu0 }
 0x180   :  { %10484 = vst [vmem:[#allocation58_spill] sm:$0xff] %v8243_v48  ;;  %10485 = vst [vmem:[#allocation59_spill] sm:$0xff] %v8247_v4  ;;  %v8266_v4 = vpop.f32.mrf.mxu1 }
 0x181   :  { %v1028_v39 = vpop.f32.mrf.mxu0 }
 0x182   :  { %v8250_v49 = vadd.f32 %v1028_v39, %v8022_v43  ;;  %v1860_v39 = vlaneseq  ;;  %v8273_v36 = vpop.f32.mrf.mxu1 }
 0x183   :  { %v8254_v41 = vpop.f32.mrf.mxu0 }
 0x184   :  { %10486 = vst [vmem:[#allocation60_spill] sm:$0xff] %v8250_v49  ;;  %10488 = vst [vmem:[#allocation62_spill] sm:$0xff] %v8254_v41 }
 0x185   :  { %v1034_v19 = vpop.f32.mrf.mxu0 }
 0x186   :  { %v8257_v42 = vadd.f32 %v1034_v19, %v8049_v47  ;;  %v8277_v19 = vshrl.u32 %v1860_v39, 7  ;;  %v594_v39 = vadd.f32 %v7627_v23, %v7625_v2 }
 0x187   :  { %v8261_v51 = vpop.f32.mrf.mxu0 }
 0x188   :  { %10489 = vst [vmem:[#allocation63_spill] sm:$0xff] %v8257_v42  ;;  %10490 = vst [vmem:[#allocation64_spill] sm:$0xff] %v8261_v51  ;;  %v588_v42 = vadd.f32 %v7616_v1, %v7614_v62  ;;  %v8286_v51 = vpop.f32.mrf.mxu1  ;;  %v1858_v62 = vld [vmem:[%s10397_s2] sm:$0x3]  ;;  %v1434_v1 = vadd.f32 %v8114_v32, %v8117_v15  ;;  %v10495_v2 = vsub.s32 0, %v8277_v19  ;;  %v600_v15 = vadd.f32 %v7637_v27, %v7635_v13 }
 0x189   :  { %v1040_v12 = vpop.f32.mrf.mxu0  ;;  %v606_v13 = vadd.f32 %v7653_v59, %v7651_v58 }
 0x18a   :  { %v8264_v48 = vadd.f32 %v1040_v12, %v8073_v35  ;;  %v1058_v12 = vadd.f32 %v8119_v20, %v588_v42  ;;  %v1060_v20 = vadd.f32 %v8126_v14, %v594_v39  ;;  %v8308_v23 = vrot.slane %v1858_v62, %v10495_v2 }
 0x18b   :  { %v8268_v43 = vpop.f32.mrf.mxu0  ;;  %v1062_v39 = vadd.f32 %v8135_v52, %v600_v15 }
 0x18c   :  { %10491 = vst [vmem:[#allocation65_spill] sm:$0xff] %v8264_v48  ;;  %10492 = vst [vmem:[#allocation66_spill] sm:$0xff] %v8268_v43  ;;  %v10419_v43 = vsub.s32 1, %v8277_v19 }
 0x18d   :  { %v1046_v49 = vpop.f32.mrf.mxu0 }
 0x18e   :  { %v8271_v41 = vadd.f32 %v1046_v49, %v8097_v5  ;;  %v8304_v5 = vpop.f32.mrf.mxu1 }
 0x18f   :  { %v8275_v47 = vpop.f32.mrf.mxu0 }
 0x191   :  { %v1052_v35 = vpop.f32.mrf.mxu0 }
 0x192   :  { %v8283_v48 = vadd.f32 %v1052_v35, %v8108_v44  ;;  %v1435_v44 = vadd.f32 %v8121_v60, %v1058_v12  ;;  %v8302_v35 = vrot.slane %v1858_v62, %v10419_v43  ;;  %v1436_v60 = vadd.f32 %v8128_v0, %v8124_v9 }
 0x193   :  { %v8288_v49 = vpop.f32.mrf.mxu0  ;;  %v1437_v12 = vadd.f32 %v8133_v31, %v1060_v20  ;;  %v1438_v9 = vadd.f32 %v8140_v24, %v8131_v54  ;;  %v1439_v0 = vadd.f32 %v8147_v55, %v1062_v39  ;;  %v1440_v55 = vadd.f32 %v8154_v10, %v8138_v25 }
 0x194   :  { %10493 = vst [vmem:[#allocation67_spill] sm:$0xff] %v8283_v48  ;;  %10494 = vst [vmem:[#allocation68_spill] sm:$0xff] %v8288_v49 }
 0x195   :  { %v1667_v42 = vpop.f32.mrf.mxu0 }
 0x196   :  { %v1810_v48 = vadd.f32 %v1667_v42, %v1434_v1  ;;  %v8317_v42 = vpop.f32.mrf.mxu1 }
 0x197   :  { %v1669_v49 = vpop.f32.mrf.mxu0 }
 0x198   :  { %v1811_v32 = vadd.f32 %v1669_v49, %v1435_v44  ;;  %v1870_v62 = vadd.f32 %v8308_v23, %v1810_v48  ;;  %v1064_v48 = vadd.f32 %v8142_v3, %v606_v13  ;;  %v8329_v49 = vpop.f32.mrf.mxu1  ;;  %v612_v44 = vadd.f32 %v7679_v56, %v7677_v53 }
 0x199   :  { %v1673_v14 = vpop.f32.mrf.mxu0 }
 0x19a   :  { %v1871_v1 = vadd.f32 %v8302_v35, %v1811_v32  ;;  %v1812_v2 = vadd.f32 %v1673_v14, %v1436_v60  ;;  %v1441_v54 = vadd.f32 %v8161_v6, %v1064_v48  ;;  %v1066_v3 = vadd.f32 %v8149_v7, %v612_v44  ;;  %v8341_v32 = vpop.f32.mrf.mxu1 }
 0x19b   :  { %v1675_v43 = vpop.f32.mrf.mxu0  ;;  %v618_v14 = vadd.f32 %v7701_v26, %v7699_v50  ;;  %v1442_v6 = vadd.f32 %v8168_v16, %v8145_v11 }
 0x19c   :  { %v1813_v27 = vadd.f32 %v1675_v43, %v1437_v12  ;;  %5844 = vmatprep.mubr.msk.f32.mxu1 %vm1948_vm5, %v1871_v1  ;;  %5868 = vmatprep.mubr.msk.f32.mxu0 %vm1948_vm5, %v1871_v1  ;;  %v1872_v58 = vadd.f32 %v8308_v23, %v1812_v2  ;;  %v1443_v25 = vadd.f32 %v8175_v40, %v1066_v3  ;;  %v8353_v1 = vpop.f32.mrf.mxu1 }
 0x19d   :  { %v1679_v31 = vpop.f32.mrf.mxu0  ;;  %2086 = vmatmul.mubr.f32.vlgmr.msra.gmra.mxu1 %v1870_v62  ;;  %2301 = vmatmul.mubr.f32.vlgmr.msra.gmra.mxu0 %v1870_v62  ;;  %v1068_v7 = vadd.f32 %v8156_v29, %v618_v14  ;;  %v624_v2 = vadd.f32 %v7723_v57, %v7721_v18  ;;  %v1444_v40 = vadd.f32 %v8182_v30, %v8152_v33  ;;  %v10497_v30 = vld [vmem:[#allocation35_spill] sm:$0xff] }
 0x19e   :  { %v1873_v52 = vadd.f32 %v8302_v35, %v1813_v27  ;;  %v1814_v59 = vadd.f32 %v1679_v31, %v1438_v9  ;;  %v8365_v9 = vpop.f32.mrf.mxu1  ;;  %v1446_v33 = vadd.f32 %v8196_v21, %v10497_v30  ;;  %v10501_v21 = vld [vmem:[#allocation36_spill] sm:$0xff] }
 0x19f   :  { %v1681_v43 = vpop.f32.mrf.mxu0  ;;  %v1445_v11 = vadd.f32 %v8189_v46, %v1068_v7  ;;  %v1070_v29 = vadd.f32 %v8163_v37, %v624_v2 }
 0x1a0   :  { %v1815_v20 = vadd.f32 %v1681_v43, %v1439_v0  ;;  %5845 = vmatprep.mubr.msk.f32.mxu1 %vm1948_vm5, %v1873_v52  ;;  %5869 = vmatprep.mubr.msk.f32.mxu0 %vm1948_vm5, %v1873_v52  ;;  %v1874_v53 = vadd.f32 %v8308_v23, %v1814_v59  ;;  %v10496_v0 = vld [vmem:[#allocation2_spill] sm:$0xff]  ;;  %v8377_v44 = vpop.f32.mrf.mxu1 }
 0x1a1   :  { %v1685_v24 = vpop.f32.mrf.mxu0  ;;  %2091 = vmatmul.mubr.f32.gmra.mxu1 %v1872_v58  ;;  %2306 = vmatmul.mubr.f32.gmra.mxu0 %v1872_v58  ;;  %v630_v48 = vadd.f32 %v10496_v0, %v7744_v34  ;;  %v1447_v46 = vadd.f32 %v8203_v28, %v1070_v29  ;;  %v10498_v58 = vld [vmem:[#allocation37_spill] sm:$0xff]  ;;  %v1448_v28 = vadd.f32 %v8210_v63, %v10501_v21  ;;  %v10505_v63 = vld [vmem:[#allocation38_spill] sm:$0xff]  ;;  %v10508_v0 = vld [vmem:[#allocation8_spill] sm:$0xff] }
 0x1a2   :  { %v1875_v15 = vadd.f32 %v8302_v35, %v1815_v20  ;;  %v1816_v56 = vadd.f32 %v1685_v24, %v1440_v55  ;;  %v10499_v24 = vld [vmem:[#allocation3_spill] sm:$0xff] }
 0x1a3   :  { %v1687_v60 = vpop.f32.mrf.mxu0  ;;  %v1072_v59 = vadd.f32 %v10498_v58, %v630_v48 }
 0x1a4   :  { %v1817_v12 = vadd.f32 %v1687_v60, %v1441_v54  ;;  %5846 = vmatprep.mubr.msk.f32.mxu1 %vm1948_vm5, %v1875_v15  ;;  %5870 = vmatprep.mubr.msk.f32.mxu0 %vm1948_vm5, %v1875_v15  ;;  %v1876_v50 = vadd.f32 %v8308_v23, %v1816_v56  ;;  %v10500_v54 = vld [vmem:[#allocation4_spill] sm:$0xff]  ;;  %v10502_v60 = vld [vmem:[#allocation39_spill] sm:$0xff] }
 0x1a5   :  { %v1691_v10 = vpop.f32.mrf.mxu0  ;;  %2096 = vmatmul.mubr.f32.gmra.mxu1 %v1874_v53  ;;  %2311 = vmatmul.mubr.f32.gmra.mxu0 %v1874_v53  ;;  %v636_v3 = vadd.f32 %v10500_v54, %v10499_v24  ;;  %v1449_v56 = vadd.f32 %v8217_v8, %v1072_v59  ;;  %v1450_v8 = vadd.f32 %v8224_v38, %v10505_v63  ;;  %v10509_v38 = vld [vmem:[#allocation40_spill] sm:$0xff]  ;;  %v10512_v24 = vld [vmem:[#allocation10_spill] sm:$0xff] }
 0x1a6   :  { %v1877_v39 = vadd.f32 %v8302_v35, %v1817_v12  ;;  %v1818_v26 = vadd.f32 %v1691_v10, %v1442_v6  ;;  %v8389_v6 = vpop.f32.mrf.mxu1 }
 0x1a7   :  { %v1693_v62 = vpop.f32.mrf.mxu0  ;;  %v1074_v14 = vadd.f32 %v10502_v60, %v636_v3 }
 0x1a8   :  { %v1819_v13 = vadd.f32 %v1693_v62, %v1443_v25  ;;  %5847 = vmatprep.mubr.msk.f32.mxu1 %vm1948_vm5, %v1877_v39  ;;  %5871 = vmatprep.mubr.msk.f32.mxu0 %vm1948_vm5, %v1877_v39  ;;  %v1878_v18 = vadd.f32 %v8308_v23, %v1818_v26  ;;  %v10503_v39 = vld [vmem:[#allocation5_spill] sm:$0xff]  ;;  %v8401_v29 = vpop.f32.mrf.mxu1 }
 0x1a9   :  { %v1697_v16 = vpop.f32.mrf.mxu0  ;;  %2101 = vmatmul.mubr.f32.gmra.mxu1 %v1876_v50  ;;  %2316 = vmatmul.mubr.f32.gmra.mxu0 %v1876_v50  ;;  %v10504_v50 = vld [vmem:[#allocation6_spill] sm:$0xff] }
 0x1aa   :  { %v1879_v27 = vadd.f32 %v8302_v35, %v1819_v13  ;;  %v1820_v57 = vadd.f32 %v1697_v16, %v1444_v40  ;;  %v642_v26 = vadd.f32 %v10504_v50, %v10503_v39  ;;  %v1451_v13 = vadd.f32 %v8231_v22, %v1074_v14  ;;  %v10506_v40 = vld [vmem:[#allocation41_spill] sm:$0xff]  ;;  %v8413_v59 = vpop.f32.mrf.mxu1  ;;  %v10517_v39 = vld [vmem:[#allocation12_spill] sm:$0xff] }
 0x1ab   :  { %v1699_v31 = vpop.f32.mrf.mxu0  ;;  %v1452_v22 = vadd.f32 %v8238_v45, %v10509_v38  ;;  %v10513_v45 = vld [vmem:[#allocation42_spill] sm:$0xff] }
 0x1ac   :  { %v1821_v52 = vadd.f32 %v1699_v31, %v1445_v11  ;;  %5848 = vmatprep.mubr.msk.f32.mxu1 %vm1948_vm5, %v1879_v27  ;;  %5872 = vmatprep.mubr.msk.f32.mxu0 %vm1948_vm5, %v1879_v27  ;;  %v1880_v34 = vadd.f32 %v8308_v23, %v1820_v57  ;;  %v1076_v16 = vadd.f32 %v10506_v40, %v642_v26  ;;  %v10507_v31 = vld [vmem:[#allocation7_spill] sm:$0xff]  ;;  %v8425_v14 = vpop.f32.mrf.mxu1 }
 0x1ad   :  { %v1703_v37 = vpop.f32.mrf.mxu0  ;;  %2106 = vmatmul.mubr.f32.gmra.mxu1 %v1878_v18  ;;  %2321 = vmatmul.mubr.f32.gmra.mxu0 %v1878_v18  ;;  %v648_v48 = vadd.f32 %v10508_v0, %v10507_v31  ;;  %v10521_v31 = vld [vmem:[#allocation14_spill] sm:$0xff] }
 0x1ae   :  { %v1881_v43 = vadd.f32 %v8302_v35, %v1821_v52  ;;  %v1822_v20 = vadd.f32 %v1703_v37, %v1446_v33  ;;  %v1453_v33 = vadd.f32 %v8245_v17, %v1076_v16  ;;  %v10510_v37 = vld [vmem:[#allocation43_spill] sm:$0xff]  ;;  %v10514_v17 = vld [vmem:[#allocation61_spill] sm:$0xff]  ;;  %v8437_v16 = vpop.f32.mrf.mxu1 }
 0x1af   :  { %v1705_v55 = vpop.f32.mrf.mxu0 }
 0x1b0   :  { %v1823_v15 = vadd.f32 %v1705_v55, %v1447_v46  ;;  %5849 = vmatprep.mubr.msk.f32.mxu1 %vm1948_vm5, %v1881_v43  ;;  %5873 = vmatprep.mubr.msk.f32.mxu0 %vm1948_vm5, %v1881_v43  ;;  %v1882_v10 = vadd.f32 %v8308_v23, %v1822_v20  ;;  %v1078_v46 = vadd.f32 %v10510_v37, %v648_v48  ;;  %v10511_v55 = vld [vmem:[#allocation9_spill] sm:$0xff]  ;;  %v8449_v37 = vpop.f32.mrf.mxu1 }
 0x1b1   :  { %v1709_v53 = vpop.f32.mrf.mxu0  ;;  %2111 = vmatmul.mubr.f32.gmra.mxu1 %v1880_v34  ;;  %2326 = vmatmul.mubr.f32.gmra.mxu0 %v1880_v34  ;;  %v654_v54 = vadd.f32 %v10512_v24, %v10511_v55 }
 0x1b2   :  { %v1883_v12 = vadd.f32 %v8302_v35, %v1823_v15  ;;  %v1824_v25 = vadd.f32 %v1709_v53, %v1448_v28  ;;  %v1454_v15 = vadd.f32 %v10514_v17, %v10513_v45  ;;  %v1455_v28 = vadd.f32 %v8259_v61, %v1078_v46  ;;  %v10515_v53 = vld [vmem:[#allocation45_spill] sm:$0xff]  ;;  %v10527_v45 = vld [vmem:[#allocation51_spill] sm:$0xff] }
 0x1b3   :  { %v1711_v7 = vpop.f32.mrf.mxu0 }
 0x1b4   :  { %v1825_v62 = vadd.f32 %v1711_v7, %v1449_v56  ;;  %5850 = vmatprep.mubr.msk.f32.mxu1 %vm1948_vm5, %v1883_v12  ;;  %5874 = vmatprep.mubr.msk.f32.mxu0 %vm1948_vm5, %v1883_v12  ;;  %v1884_v27 = vadd.f32 %v8308_v23, %v1824_v25  ;;  %v1080_v56 = vadd.f32 %v10515_v53, %v654_v54  ;;  %v10516_v7 = vld [vmem:[#allocation11_spill] sm:$0xff] }
 0x1b5   :  { %v1715_v2 = vpop.f32.mrf.mxu0  ;;  %2116 = vmatmul.mubr.f32.gmra.mxu1 %v1882_v10  ;;  %2331 = vmatmul.mubr.f32.gmra.mxu0 %v1882_v10  ;;  %v660_v50 = vadd.f32 %v10517_v39, %v10516_v7 }
 0x1b6   :  { %v1885_v11 = vadd.f32 %v8302_v35, %v1825_v62  ;;  %v1826_v18 = vadd.f32 %v1715_v2, %v1450_v8  ;;  %v10518_v62 = vld [vmem:[#allocation44_spill] sm:$0xff]  ;;  %v1457_v8 = vadd.f32 %v8273_v36, %v1080_v56  ;;  %v10519_v2 = vld [vmem:[#allocation47_spill] sm:$0xff] }
 0x1b7   :  { %v1717_v57 = vpop.f32.mrf.mxu0  ;;  %v1456_v61 = vadd.f32 %v8266_v4, %v10518_v62  ;;  %v10522_v4 = vld [vmem:[#allocation46_spill] sm:$0xff] }
 0x1b8   :  { %v1827_v52 = vadd.f32 %v1717_v57, %v1451_v13  ;;  %5851 = vmatprep.mubr.msk.f32.mxu1 %vm1948_vm5, %v1885_v11  ;;  %5875 = vmatprep.mubr.msk.f32.mxu0 %vm1948_vm5, %v1885_v11  ;;  %v1886_v43 = vadd.f32 %v8308_v23, %v1826_v18  ;;  %v1082_v13 = vadd.f32 %v10519_v2, %v660_v50  ;;  %v10520_v57 = vld [vmem:[#allocation13_spill] sm:$0xff] }
 0x1b9   :  { %v1721_v30 = vpop.f32.mrf.mxu0  ;;  %2121 = vmatmul.mubr.f32.gmra.mxu1 %v1884_v27  ;;  %2336 = vmatmul.mubr.f32.gmra.mxu0 %v1884_v27  ;;  %v666_v0 = vadd.f32 %v10521_v31, %v10520_v57  ;;  %v1458_v36 = vadd.f32 %v8286_v51, %v10522_v4  ;;  %v10526_v51 = vld [vmem:[#allocation48_spill] sm:$0xff]  ;;  %v10531_v50 = vld [vmem:[#allocation53_spill] sm:$0xff]  ;;  %v10535_v31 = vld [vmem:[#allocation55_spill] sm:$0xff] }
 0x1ba   :  { %v1887_v58 = vadd.f32 %v8302_v35, %v1827_v52  ;;  %v1828_v34 = vadd.f32 %v1721_v30, %v1452_v22  ;;  %v1459_v38 = vadd.f32 %v8304_v5, %v1082_v13  ;;  %v10523_v22 = vld [vmem:[#allocation49_spill] sm:$0xff]  ;;  %v1460_v5 = vadd.f32 %v8317_v42, %v10526_v51  ;;  %v10530_v42 = vld [vmem:[#allocation50_spill] sm:$0xff]  ;;  %v10532_v13 = vld [vmem:[#allocation19_spill] sm:$0xff] }
 0x1bb   :  { %v1723_v20 = vpop.f32.mrf.mxu0  ;;  %v1084_v30 = vadd.f32 %v10523_v22, %v666_v0  ;;  %v10536_v22 = vld [vmem:[#allocation21_spill] sm:$0xff] }
 0x1bc   :  { %v1829_v3 = vadd.f32 %v1723_v20, %v1453_v33  ;;  %5852 = vmatprep.mubr.msk.f32.mxu1 %vm1948_vm5, %v1887_v58  ;;  %5876 = vmatprep.mubr.msk.f32.mxu0 %vm1948_vm5, %v1887_v58  ;;  %v1888_v12 = vadd.f32 %v8308_v23, %v1828_v34  ;;  %v10524_v34 = vld [vmem:[#allocation15_spill] sm:$0xff]  ;;  %v10525_v20 = vld [vmem:[#allocation16_spill] sm:$0xff] }
 0x1bd   :  { %v1727_v21 = vpop.f32.mrf.mxu0  ;;  %2126 = vmatmul.mubr.f32.gmra.mxu1 %v1886_v43  ;;  %2341 = vmatmul.mubr.f32.gmra.mxu0 %v1886_v43  ;;  %v672_v55 = vadd.f32 %v10525_v20, %v10524_v34  ;;  %v10539_v34 = vld [vmem:[#allocation57_spill] sm:$0xff] }
 0x1be   :  { %v1889_v60 = vadd.f32 %v8302_v35, %v1829_v3  ;;  %v1830_v10 = vadd.f32 %v1727_v21, %v1454_v15  ;;  %v1461_v3 = vadd.f32 %v8329_v49, %v1084_v30  ;;  %v8461_v21 = vpop.f32.mrf.mxu1  ;;  %v1462_v49 = vadd.f32 %v8341_v32, %v10530_v42  ;;  %v10534_v32 = vld [vmem:[#allocation52_spill] sm:$0xff]  ;;  %v10537_v30 = vld [vmem:[#allocation22_spill] sm:$0xff] }
 0x1bf   :  { %v1729_v25 = vpop.f32.mrf.mxu0  ;;  %v1086_v17 = vadd.f32 %v10527_v45, %v672_v55  ;;  %v10541_v45 = vld [vmem:[#allocation24_spill] sm:$0xff] }
 0x1c0   :  { %v1831_v26 = vadd.f32 %v1729_v25, %v1455_v28  ;;  %5853 = vmatprep.mubr.msk.f32.mxu1 %vm1948_vm5, %v1889_v60  ;;  %5877 = vmatprep.mubr.msk.f32.mxu0 %vm1948_vm5, %v1889_v60  ;;  %v1890_v11 = vadd.f32 %v8308_v23, %v1830_v10  ;;  %v10528_v60 = vld [vmem:[#allocation17_spill] sm:$0xff] }
 0x1c1   :  { %v1733_v63 = vpop.f32.mrf.mxu0  ;;  %2131 = vmatmul.mubr.f32.gmra.mxu1 %v1888_v12  ;;  %2346 = vmatmul.mubr.f32.gmra.mxu0 %v1888_v12  ;;  %v10529_v12 = vld [vmem:[#allocation18_spill] sm:$0xff]  ;;  %v1463_v39 = vadd.f32 %v8353_v1, %v1086_v17  ;;  %v1464_v1 = vadd.f32 %v8365_v9, %v10534_v32 }
 0x1c2   :  { %v1891_v40 = vadd.f32 %v8302_v35, %v1831_v26  ;;  %v1832_v27 = vadd.f32 %v1733_v63, %v1456_v61  ;;  %v678_v10 = vadd.f32 %v10529_v12, %v10528_v60  ;;  %v8473_v61 = vpop.f32.mrf.mxu1  ;;  %v10538_v9 = vld [vmem:[#allocation54_spill] sm:$0xff] }
 0x1c3   :  { %v1735_v18 = vpop.f32.mrf.mxu0 }
 0x1c4   :  { %v1833_v48 = vadd.f32 %v1735_v18, %v1457_v8  ;;  %5854 = vmatprep.mubr.msk.f32.mxu1 %vm1948_vm5, %v1891_v40  ;;  %5878 = vmatprep.mubr.msk.f32.mxu0 %vm1948_vm5, %v1891_v40  ;;  %v1892_v46 = vadd.f32 %v8308_v23, %v1832_v27  ;;  %v1088_v26 = vadd.f32 %v10531_v50, %v678_v10  ;;  %v10533_v40 = vld [vmem:[#allocation20_spill] sm:$0xff]  ;;  %v8485_v4 = vpop.f32.mrf.mxu1 }
 0x1c5   :  { %v1739_v52 = vpop.f32.mrf.mxu0  ;;  %2136 = vmatmul.mubr.f32.gmra.mxu1 %v1890_v11  ;;  %2351 = vmatmul.mubr.f32.gmra.mxu0 %v1890_v11  ;;  %v684_v11 = vadd.f32 %v10533_v40, %v10532_v13 }
 0x1c6   :  { %v1893_v33 = vadd.f32 %v8302_v35, %v1833_v48  ;;  %v1834_v58 = vadd.f32 %v1739_v52, %v1458_v36  ;;  %v1465_v57 = vadd.f32 %v8377_v44, %v1088_v26  ;;  %v1466_v44 = vadd.f32 %v8389_v6, %v10538_v9  ;;  %v10542_v6 = vld [vmem:[#allocation56_spill] sm:$0xff]  ;;  %v10552_v9 = vld [vmem:[#allocation29_spill] sm:$0xff] }
 0x1c7   :  { %v1741_v43 = vpop.f32.mrf.mxu0  ;;  %v1090_v0 = vadd.f32 %v10535_v31, %v684_v11 }
 0x1c8   :  { %v1835_v24 = vadd.f32 %v1741_v43, %v1459_v38  ;;  %5855 = vmatprep.mubr.msk.f32.mxu1 %vm1948_vm5, %v1893_v33  ;;  %5879 = vmatprep.mubr.msk.f32.mxu0 %vm1948_vm5, %v1893_v33  ;;  %v1894_v28 = vadd.f32 %v8308_v23, %v1834_v58  ;;  %v690_v33 = vadd.f32 %v10537_v30, %v10536_v22 }
 0x1c9   :  { %v1745_v54 = vpop.f32.mrf.mxu0  ;;  %2141 = vmatmul.mubr.f32.gmra.mxu1 %v1892_v46  ;;  %2356 = vmatmul.mubr.f32.gmra.mxu0 %v1892_v46  ;;  %v1467_v43 = vadd.f32 %v8401_v29, %v1090_v0  ;;  %v1468_v29 = vadd.f32 %v8413_v59, %v10542_v6  ;;  %v10546_v59 = vld [vmem:[#allocation58_spill] sm:$0xff]  ;;  %v10557_v6 = vld [vmem:[#allocation32_spill] sm:$0xff] }
 0x1ca   :  { %v1895_v15 = vadd.f32 %v8302_v35, %v1835_v24  ;;  %v1836_v53 = vadd.f32 %v1745_v54, %v1460_v5  ;;  %v1092_v20 = vadd.f32 %v10539_v34, %v690_v33  ;;  %v1413_v24 = vpop.f32.mrf.mxu1 }
 0x1cb   :  { %v1747_v56 = vpop.f32.mrf.mxu0 }
 0x1cc   :  { %v1837_v25 = vadd.f32 %v1747_v56, %v1461_v3  ;;  %5856 = vmatprep.mubr.msk.f32.mxu1 %vm1948_vm5, %v1895_v15  ;;  %5880 = vmatprep.mubr.msk.f32.mxu0 %vm1948_vm5, %v1895_v15  ;;  %v1896_v63 = vadd.f32 %v8308_v23, %v1836_v53  ;;  %v10540_v3 = vld [vmem:[#allocation23_spill] sm:$0xff]  ;;  %v1469_v53 = vadd.f32 %v8425_v14, %v1092_v20  ;;  %v1417_v10 = vpop.f32.mrf.mxu1 }
 0x1cd   :  { %v1751_v7 = vpop.f32.mrf.mxu0  ;;  %2146 = vmatmul.mubr.f32.gmra.mxu1 %v1894_v28  ;;  %2361 = vmatmul.mubr.f32.gmra.mxu0 %v1894_v28  ;;  %v696_v17 = vadd.f32 %v10541_v45, %v10540_v3  ;;  %v10543_v56 = vld [vmem:[#allocation59_spill] sm:$0xff]  ;;  %v1470_v14 = vadd.f32 %v8437_v16, %v10546_v59  ;;  %v10550_v16 = vld [vmem:[#allocation60_spill] sm:$0xff] }
 0x1ce   :  { %v1897_v62 = vadd.f32 %v8302_v35, %v1837_v25  ;;  %v1838_v8 = vadd.f32 %v1751_v7, %v1462_v49  ;;  %v10544_v7 = vld [vmem:[#allocation25_spill] sm:$0xff]  ;;  %v1419_v40 = vpop.f32.mrf.mxu1 }
 0x1cf   :  { %v1753_v2 = vpop.f32.mrf.mxu0  ;;  %v1094_v60 = vadd.f32 %v10543_v56, %v696_v17 }
 0x1d0   :  { %v1839_v27 = vadd.f32 %v1753_v2, %v1463_v39  ;;  %5857 = vmatprep.mubr.msk.f32.mxu1 %vm1948_vm5, %v1897_v62  ;;  %5881 = vmatprep.mubr.msk.f32.mxu0 %vm1948_vm5, %v1897_v62  ;;  %v1898_v36 = vadd.f32 %v8308_v23, %v1838_v8  ;;  %v10545_v39 = vld [vmem:[#allocation26_spill] sm:$0xff]  ;;  %v1423_v22 = vpop.f32.mrf.mxu1 }
 0x1d1   :  { %v1757_v18 = vpop.f32.mrf.mxu0  ;;  %2151 = vmatmul.mubr.f32.gmra.mxu1 %v1896_v63  ;;  %2366 = vmatmul.mubr.f32.gmra.mxu0 %v1896_v63  ;;  %v702_v50 = vadd.f32 %v10545_v39, %v10544_v7  ;;  %v1471_v63 = vadd.f32 %v8449_v37, %v1094_v60  ;;  %v10547_v8 = vld [vmem:[#allocation62_spill] sm:$0xff]  ;;  %v1472_v37 = vadd.f32 %v8461_v21, %v10550_v16  ;;  %v10554_v21 = vld [vmem:[#allocation63_spill] sm:$0xff]  ;;  %v10559_v39 = vld [vmem:[#allocation33_spill] sm:$0xff] }
 0x1d2   :  { %v1899_v48 = vadd.f32 %v8302_v35, %v1839_v27  ;;  %v1840_v52 = vadd.f32 %v1757_v18, %v1464_v1  ;;  %v10548_v1 = vld [vmem:[#allocation27_spill] sm:$0xff]  ;;  %v10549_v18 = vld [vmem:[#allocation28_spill] sm:$0xff] }
 0x1d3   :  { %v1759_v38 = vpop.f32.mrf.mxu0  ;;  %v1096_v2 = vadd.f32 %v10547_v8, %v702_v50  ;;  %v10560_v50 = vld [vmem:[#allocation34_spill] sm:$0xff] }
 0x1d4   :  { %v1841_v46 = vadd.f32 %v1759_v38, %v1465_v57  ;;  %5858 = vmatprep.mubr.msk.f32.mxu1 %vm1948_vm5, %v1899_v48  ;;  %5882 = vmatprep.mubr.msk.f32.mxu0 %vm1948_vm5, %v1899_v48  ;;  %v1900_v51 = vadd.f32 %v8308_v23, %v1840_v52  ;;  %v708_v57 = vadd.f32 %v10549_v18, %v10548_v1 }
 0x1d5   :  { %v1763_v58 = vpop.f32.mrf.mxu0  ;;  %2156 = vmatmul.mubr.f32.gmra.mxu1 %v1898_v36  ;;  %2371 = vmatmul.mubr.f32.gmra.mxu0 %v1898_v36  ;;  %v1473_v48 = vadd.f32 %v8473_v61, %v1096_v2  ;;  %v10551_v36 = vld [vmem:[#allocation64_spill] sm:$0xff]  ;;  %v1474_v61 = vadd.f32 %v8485_v4, %v10554_v21  ;;  %v10558_v4 = vld [vmem:[#allocation65_spill] sm:$0xff] }
 0x1d6   :  { %v1901_v55 = vadd.f32 %v8302_v35, %v1841_v46  ;;  %v1842_v5 = vadd.f32 %v1763_v58, %v1466_v44  ;;  %v1098_v52 = vadd.f32 %v10551_v36, %v708_v57  ;;  %v10553_v44 = vld [vmem:[#allocation30_spill] sm:$0xff] }
 0x1d7   :  { %v1765_v54 = vpop.f32.mrf.mxu0  ;;  %v714_v58 = vadd.f32 %v10553_v44, %v10552_v9 }
 0x1d8   :  { %v1843_v15 = vadd.f32 %v1765_v54, %v1467_v43  ;;  %5859 = vmatprep.mubr.msk.f32.mxu1 %vm1948_vm5, %v1901_v55  ;;  %5883 = vmatprep.mubr.msk.f32.mxu0 %vm1948_vm5, %v1901_v55  ;;  %v1902_v25 = vadd.f32 %v8308_v23, %v1842_v5  ;;  %v1475_v20 = vadd.f32 %v1413_v24, %v1098_v52  ;;  %v10555_v55 = vld [vmem:[#allocation66_spill] sm:$0xff]  ;;  %v1425_v54 = vpop.f32.mrf.mxu1  ;;  %v2446_v52 = vld [vmem:[%s10398_s5 + $0x8] sm:$0xff] }
 0x1d9   :  { %v1769_v28 = vpop.f32.mrf.mxu0  ;;  %2161 = vmatmul.mubr.f32.gmra.mxu1 %v1900_v51  ;;  %2376 = vmatmul.mubr.f32.gmra.mxu0 %v1900_v51  ;;  %v1100_v51 = vadd.f32 %v10555_v55, %v714_v58 }
 0x1da   :  { %v1903_v12 = vadd.f32 %v8302_v35, %v1843_v15  ;;  %v1844_v42 = vadd.f32 %v1769_v28, %v1468_v29  ;;  %v10556_v15 = vld [vmem:[#allocation31_spill] sm:$0xff] }
 0x1db   :  { %v1771_v49 = vpop.f32.mrf.mxu0  ;;  %v720_v29 = vadd.f32 %v10557_v6, %v10556_v15  ;;  %v1477_v56 = vadd.f32 %v1419_v40, %v1100_v51 }
 0x1dc   :  { %v1845_v26 = vadd.f32 %v1771_v49, %v1469_v53  ;;  %5860 = vmatprep.mubr.msk.f32.mxu1 %vm1948_vm5, %v1903_v12  ;;  %5884 = vmatprep.mubr.msk.f32.mxu0 %vm1948_vm5, %v1903_v12  ;;  %v1904_v11 = vadd.f32 %v8308_v23, %v1844_v42  ;;  %v1476_v53 = vadd.f32 %v1417_v10, %v10558_v4 }
 0x1dd   :  { %v1775_v62 = vpop.f32.mrf.mxu0  ;;  %2166 = vmatmul.mubr.f32.gmra.mxu1 %v1902_v25  ;;  %2381 = vmatmul.mubr.f32.gmra.mxu0 %v1902_v25  ;;  %v1102_v60 = vadd.f32 %v8275_v47, %v720_v29  ;;  %v1429_v25 = vpop.f32.mrf.mxu1  ;;  %v1478_v10 = vadd.f32 %v1423_v22, %v8271_v41 }
 0x1de   :  { %v1905_v13 = vadd.f32 %v8302_v35, %v1845_v26  ;;  %v1846_v27 = vadd.f32 %v1775_v62, %v1470_v14  ;;  %v726_v26 = vadd.f32 %v10560_v50, %v10559_v39  ;;  %v10561_v62 = vld [vmem:[#allocation68_spill] sm:$0xff] }
 0x1df   :  { %v1777_v32 = vpop.f32.mrf.mxu0  ;;  %v1479_v47 = vadd.f32 %v1425_v54, %v1102_v60  ;;  %v1431_v2 = vpop.f32.mrf.mxu1 }
 0x1e0   :  { %v1847_v31 = vadd.f32 %v1777_v32, %v1471_v63  ;;  %5861 = vmatprep.mubr.msk.f32.mxu1 %vm1948_vm5, %v1905_v13  ;;  %5885 = vmatprep.mubr.msk.f32.mxu0 %vm1948_vm5, %v1905_v13  ;;  %v1906_v30 = vadd.f32 %v8308_v23, %v1846_v27  ;;  %v1104_v63 = vadd.f32 %v10561_v62, %v726_v26  ;;  %v10562_v32 = vld [vmem:[#allocation67_spill] sm:$0xff] }
 0x1e1   :  { %v1781_v0 = vpop.f32.mrf.mxu0  ;;  %2171 = vmatmul.mubr.f32.gmra.mxu1 %v1904_v11  ;;  %2386 = vmatmul.mubr.f32.gmra.mxu0 %v1904_v11  ;;  %v1480_v41 = vadd.f32 %v1429_v25, %v10562_v32 }
 0x1e2   :  { %v1907_v38 = vadd.f32 %v8302_v35, %v1847_v31  ;;  %v1848_v33 = vadd.f32 %v1781_v0, %v1472_v37  ;;  %v1481_v18 = vadd.f32 %v1431_v2, %v1104_v63 }
 0x1e3   :  { %v1783_v46 = vpop.f32.mrf.mxu0 }
 0x1e4   :  { %v1849_v43 = vadd.f32 %v1783_v46, %v1473_v48  ;;  %5862 = vmatprep.mubr.msk.f32.mxu1 %vm1948_vm5, %v1907_v38  ;;  %5886 = vmatprep.mubr.msk.f32.mxu0 %vm1948_vm5, %v1907_v38  ;;  %v1908_v3 = vadd.f32 %v8308_v23, %v1848_v33 }
 0x1e5   :  { %v1787_v34 = vpop.f32.mrf.mxu0  ;;  %2176 = vmatmul.mubr.f32.gmra.mxu1 %v1906_v30  ;;  %2391 = vmatmul.mubr.f32.gmra.mxu0 %v1906_v30 }
 0x1e6   :  { %v1909_v5 = vadd.f32 %v8302_v35, %v1849_v43  ;;  %v1850_v45 = vadd.f32 %v1787_v34, %v1474_v61 }
 0x1e7   :  { %v1789_v17 = vpop.f32.mrf.mxu0 }
 0x1e8   :  { %v1851_v28 = vadd.f32 %v1789_v17, %v1475_v20  ;;  %5863 = vmatprep.mubr.msk.f32.mxu1 %vm1948_vm5, %v1909_v5  ;;  %5887 = vmatprep.mubr.msk.f32.mxu0 %vm1948_vm5, %v1909_v5  ;;  %v1910_v42 = vadd.f32 %v8308_v23, %v1850_v45 }
 0x1e9   :  { %v1793_v24 = vpop.f32.mrf.mxu0  ;;  %2181 = vmatmul.mubr.f32.gmra.mxu1 %v1908_v3  ;;  %2396 = vmatmul.mubr.f32.gmra.mxu0 %v1908_v3 }
 0x1ea   :  { %v1911_v12 = vadd.f32 %v8302_v35, %v1851_v28  ;;  %v1852_v49 = vadd.f32 %v1793_v24, %v1476_v53 }
 0x1eb   :  { %v1795_v7 = vpop.f32.mrf.mxu0 }
 0x1ec   :  { %v1853_v59 = vadd.f32 %v1795_v7, %v1477_v56  ;;  %5864 = vmatprep.mubr.msk.f32.mxu1 %vm1948_vm5, %v1911_v12  ;;  %5888 = vmatprep.mubr.msk.f32.mxu0 %vm1948_vm5, %v1911_v12  ;;  %v1912_v13 = vadd.f32 %v8308_v23, %v1852_v49 }
 0x1ed   :  { %v1799_v14 = vpop.f32.mrf.mxu0  ;;  %2186 = vmatmul.mubr.f32.gmra.mxu1 %v1910_v42  ;;  %2401 = vmatmul.mubr.f32.gmra.mxu0 %v1910_v42 }
 0x1ee   :  { %v1913_v8 = vadd.f32 %v8302_v35, %v1853_v59  ;;  %v1854_v40 = vadd.f32 %v1799_v14, %v1478_v10 }
 0x1ef   :  { %v1801_v11 = vpop.f32.mrf.mxu0 }
 0x1f0   :  { %v1855_v27 = vadd.f32 %v1801_v11, %v1479_v47  ;;  %5865 = vmatprep.mubr.msk.f32.mxu1 %vm1948_vm5, %v1913_v8  ;;  %5889 = vmatprep.mubr.msk.f32.mxu0 %vm1948_vm5, %v1913_v8  ;;  %v1914_v31 = vadd.f32 %v8308_v23, %v1854_v40 }
 0x1f1   :  { %v1805_v1 = vpop.f32.mrf.mxu0  ;;  %2191 = vmatmul.mubr.f32.gmra.mxu1 %v1912_v13  ;;  %2406 = vmatmul.mubr.f32.gmra.mxu0 %v1912_v13 }
 0x1f2   :  { %v1915_v57 = vadd.f32 %v8302_v35, %v1855_v27  ;;  %v1856_v16 = vadd.f32 %v1805_v1, %v1480_v41 }
 0x1f3   :  { %v1807_v37 = vpop.f32.mrf.mxu0 }
 0x1f4   :  { %v1857_v0 = vadd.f32 %v1807_v37, %v1481_v18  ;;  %5866 = vmatprep.mubr.msk.f32.mxu1 %vm1948_vm5, %v1915_v57  ;;  %5890 = vmatprep.mubr.msk.f32.mxu0 %vm1948_vm5, %v1915_v57  ;;  %v1916_v36 = vadd.f32 %v8308_v23, %v1856_v16 }
 0x1f5   :  { %2196 = vmatmul.mubr.f32.gmra.mxu1 %v1914_v31  ;;  %2411 = vmatmul.mubr.f32.gmra.mxu0 %v1914_v31 }
 0x1f6   :  { %v1917_v48 = vadd.f32 %v8302_v35, %v1857_v0 }
 0x1f8   :  { %5867 = vmatprep.mubr.msk.f32.mxu1 %vm1948_vm5, %v1917_v48  ;;  %5891 = vmatprep.mubr.msk.f32.mxu0 %vm1948_vm5, %v1917_v48 }
 0x1f9   :  { %2201 = vmatmul.mubr.f32.gmra.mxu1 %v1916_v36  ;;  %2416 = vmatmul.mubr.f32.gmra.mxu0 %v1916_v36 }
 0x1fa   :  { %5892 = vmatprep.mubr.msk.f32.mxu1 %vm2469_vm6, %v2446_v52 }
 0x25d   :  { %v2087_v38 = vpop.f32.mrf.mxu1  ;;  %v2302_v22 = vpop.f32.mrf.mxu0 }
 0x25e   :  { %v8568_v30 = vmax.f32 %v2087_v38, %v2302_v22 }
 0x25f   :  { %v2089_v35 = vpop.f32.mrf.mxu1  ;;  %v2304_v33 = vpop.f32.mrf.mxu0 }
 0x261   :  { %v2092_v23 = vpop.f32.mrf.mxu1  ;;  %v2307_v46 = vpop.f32.mrf.mxu0 }
 0x262   :  { %v8570_v9 = vmax.f32 %v2092_v23, %v2307_v46 }
 0x263   :  { %v2094_v44 = vpop.f32.mrf.mxu1  ;;  %v2309_v58 = vpop.f32.mrf.mxu0 }
 0x265   :  { %v2097_v43 = vpop.f32.mrf.mxu1  ;;  %v2312_v21 = vpop.f32.mrf.mxu0 }
 0x266   :  { %v8572_v61 = vmax.f32 %v2097_v43, %v2312_v21 }
 0x267   :  { %v2099_v34 = vpop.f32.mrf.mxu1  ;;  %v2314_v20 = vpop.f32.mrf.mxu0 }
 0x268   :  { %v10563_v34 = vmov 0.0  }
 0x269   :  { %v2102_v55 = vpop.f32.mrf.mxu1  ;;  %v2317_v51 = vpop.f32.mrf.mxu0 }
 0x26a   :  { %v8574_v5 = vmax.f32 %v2102_v55, %v2317_v51 }
 0x26b   :  { %v2104_v54 = vpop.f32.mrf.mxu1  ;;  %v2319_v3 = vpop.f32.mrf.mxu0 }
 0x26d   :  { %v2107_v45 = vpop.f32.mrf.mxu1  ;;  %v2322_v17 = vpop.f32.mrf.mxu0 }
 0x26e   :  { %v8576_v15 = vmax.f32 %v2107_v45, %v2322_v17 }
 0x26f   :  { %v2109_v6 = vpop.f32.mrf.mxu1  ;;  %v2324_v29 = vpop.f32.mrf.mxu0 }
 0x271   :  { %v8578_v28 = vpop.f32.mrf.mxu1  ;;  %v8580_v4 = vpop.f32.mrf.mxu0 }
 0x273   :  { %v2114_v53 = vpop.f32.mrf.mxu1  ;;  %v2329_v24 = vpop.f32.mrf.mxu0 }
 0x275   :  { %v8582_v56 = vpop.f32.mrf.mxu1  ;;  %v8584_v60 = vpop.f32.mrf.mxu0 }
 0x277   :  { %v2119_v12 = vpop.f32.mrf.mxu1  ;;  %v2334_v25 = vpop.f32.mrf.mxu0 }
 0x279   :  { %v8586_v42 = vpop.f32.mrf.mxu1  ;;  %v8588_v49 = vpop.f32.mrf.mxu0 }
 0x27b   :  { %v2124_v7 = vpop.f32.mrf.mxu1  ;;  %v2339_v39 = vpop.f32.mrf.mxu0 }
 0x27d   :  { %v8590_v50 = vpop.f32.mrf.mxu1  ;;  %v2342_v26 = vpop.f32.mrf.mxu0 }
 0x27f   :  { %v2129_v59 = vpop.f32.mrf.mxu1  ;;  %v2344_v10 = vpop.f32.mrf.mxu0 }
 0x280   :  { %v8631_v59 = vmax.f32 %v8590_v50, %v2342_v26  ;;  %v8643_v50 = vmax.f32 %v8582_v56, %v8584_v60 }
 0x281   :  { %v2132_v14 = vpop.f32.mrf.mxu1  ;;  %v2347_v47 = vpop.f32.mrf.mxu0 }
 0x282   :  { %v8626_v25 = vmax.f32 %v2132_v14, %v2347_v47 }
 0x283   :  { %v2134_v62 = vpop.f32.mrf.mxu1  ;;  %v2349_v63 = vpop.f32.mrf.mxu0 }
 0x284   :  { %v8637_v63 = vmax.f32 %v8586_v42, %v8588_v49  ;;  %v8649_v42 = vmax.f32 %v8578_v28, %v8580_v4 }
 0x285   :  { %v2137_v8 = vpop.f32.mrf.mxu1  ;;  %v2352_v2 = vpop.f32.mrf.mxu0 }
 0x286   :  { %v8618_v53 = vmax.f32 %v2137_v8, %v2352_v2 }
 0x287   :  { %v2139_v13 = vpop.f32.mrf.mxu1  ;;  %v2354_v40 = vpop.f32.mrf.mxu0 }
 0x289   :  { %v2142_v11 = vpop.f32.mrf.mxu1  ;;  %v2357_v27 = vpop.f32.mrf.mxu0 }
 0x28a   :  { %v8614_v17 = vmax.f32 %v2142_v11, %v2357_v27 }
 0x28b   :  { %v2144_v32 = vpop.f32.mrf.mxu1  ;;  %v2359_v41 = vpop.f32.mrf.mxu0 }
 0x28d   :  { %v2147_v1 = vpop.f32.mrf.mxu1  ;;  %v2362_v18 = vpop.f32.mrf.mxu0 }
 0x28e   :  { %v8606_v54 = vmax.f32 %v2147_v1, %v2362_v18 }
 0x28f   :  { %v2149_v57 = vpop.f32.mrf.mxu1  ;;  %v2364_v31 = vpop.f32.mrf.mxu0 }
 0x291   :  { %v2152_v16 = vpop.f32.mrf.mxu1  ;;  %v2367_v37 = vpop.f32.mrf.mxu0 }
 0x292   :  { %v8602_v20 = vmax.f32 %v2152_v16, %v2367_v37 }
 0x293   :  { %v2154_v0 = vpop.f32.mrf.mxu1  ;;  %v2369_v48 = vpop.f32.mrf.mxu0 }
 0x295   :  { %v2157_v36 = vpop.f32.mrf.mxu1  ;;  %v2372_v52 = vpop.f32.mrf.mxu0 }
 0x296   :  { %v8594_v58 = vmax.f32 %v2157_v36, %v2372_v52 }
 0x297   :  { %v2159_v38 = vpop.f32.mrf.mxu1  ;;  %v2374_v22 = vpop.f32.mrf.mxu0 }
 0x298   :  { %v2445_v38 = vld [vmem:[%s10398_s5] sm:$0xff]  ;;  %v2448_v22 = vld [vmem:[%s10398_s5 + $0x18] sm:$0xff] }
 0x299   :  { %v2162_v35 = vpop.f32.mrf.mxu1  ;;  %v2377_v33 = vpop.f32.mrf.mxu0 }
 0x29a   :  { %v8592_v23 = vmax.f32 %v2162_v35, %v2377_v33  ;;  %v2447_v35 = vld [vmem:[%s10398_s5 + $0x10] sm:$0xff]  ;;  %v2450_v33 = vld [vmem:[%s10398_s5 + $0x28] sm:$0xff] }
 0x29b   :  { %v2164_v46 = vpop.f32.mrf.mxu1  ;;  %v2379_v44 = vpop.f32.mrf.mxu0 }
 0x29c   :  { %2507 = vmatpush1.msra.mxu1 %v8592_v23  ;;  %v2452_v46 = vld [vmem:[%s10398_s5 + $0x38] sm:$0xff]  ;;  %v2451_v44 = vld [vmem:[%s10398_s5 + $0x30] sm:$0xff] }
 0x29d   :  { %v8597_v43 = vpop.f32.mrf.mxu1  ;;  %v8599_v21 = vpop.f32.mrf.mxu0  ;;  %2508 = vmatprep.subr.mxu1 %v10563_v34 }
 0x29e   :  { %2509 = vmatpush1.msra.mxu1 %v8594_v58  ;;  %v8697_v52 = vmax.f32 %v8597_v43, %v8599_v21  ;;  %v2453_v43 = vld [vmem:[%s10398_s5 + $0x40] sm:$0xff]  ;;  %v2456_v21 = vld [vmem:[%s10398_s5 + $0x58] sm:$0xff] }
 0x29f   :  { %v2169_v55 = vpop.f32.mrf.mxu1  ;;  %v2384_v51 = vpop.f32.mrf.mxu0  ;;  %2510 = vmatprep.subr.mxu1 %v10563_v34 }
 0x2a0   :  { %2511 = vmatpush1.msra.mxu1 %v8602_v20  ;;  %v2458_v55 = vld [vmem:[%s10398_s5 + $0x68] sm:$0xff]  ;;  %v2457_v51 = vld [vmem:[%s10398_s5 + $0x60] sm:$0xff] }
 0x2a1   :  { %v8609_v3 = vpop.f32.mrf.mxu1  ;;  %v8611_v45 = vpop.f32.mrf.mxu0  ;;  %2512 = vmatprep.subr.mxu1 %v10563_v34 }
 0x2a2   :  { %2513 = vmatpush1.msra.mxu1 %v8606_v54  ;;  %v8691_v36 = vmax.f32 %v8609_v3, %v8611_v45  ;;  %v2459_v3 = vld [vmem:[%s10398_s5 + $0x70] sm:$0xff]  ;;  %v2462_v45 = vld [vmem:[%s10398_s5 + $0x88] sm:$0xff] }
 0x2a3   :  { %v2174_v6 = vpop.f32.mrf.mxu1  ;;  %v2389_v29 = vpop.f32.mrf.mxu0  ;;  %2514 = vmatprep.subr.mxu1 %v10563_v34 }
 0x2a4   :  { %2515 = vmatpush1.msra.mxu1 %v8614_v17  ;;  %v2467_v6 = vld [vmem:[%s10398_s5 + $0xb0] sm:$0xff]  ;;  %v2632_v29 = vld [vmem:[%s10399_s6 + $0x8] sm:$0xff] }
 0x2a5   :  { %v8621_v24 = vpop.f32.mrf.mxu1  ;;  %v8623_v12 = vpop.f32.mrf.mxu0  ;;  %2516 = vmatprep.subr.mxu1 %v10563_v34 }
 0x2a6   :  { %2517 = vmatpush1.msra.mxu1 %v8618_v53  ;;  %v8685_v48 = vmax.f32 %v8621_v24, %v8623_v12  ;;  %v2634_v24 = vld [vmem:[%s10399_s6 + $0x18] sm:$0xff]  ;;  %v2633_v12 = vld [vmem:[%s10399_s6 + $0x10] sm:$0xff] }
 0x2a7   :  { %v2179_v7 = vpop.f32.mrf.mxu1  ;;  %v2394_v39 = vpop.f32.mrf.mxu0  ;;  %2518 = vmatprep.subr.mxu1 %v10563_v34 }
 0x2a8   :  { %2519 = vmatpush1.msra.mxu1 %v8626_v25  ;;  %v2635_v7 = vld [vmem:[%s10399_s6 + $0x20] sm:$0xff]  ;;  %v2638_v39 = vld [vmem:[%s10399_s6 + $0x38] sm:$0xff] }
 0x2a9   :  { %v2182_v10 = vpop.f32.mrf.mxu1  ;;  %v2397_v62 = vpop.f32.mrf.mxu0  ;;  %2520 = vmatprep.subr.mxu1 %v10563_v34 }
 0x2aa   :  { %2521 = vmatpush1.msra.mxu1 %v8631_v59  ;;  %v8679_v0 = vmax.f32 %v2182_v10, %v2397_v62  ;;  %v2640_v10 = vld [vmem:[%s10399_s6 + $0x48] sm:$0xff]  ;;  %v2639_v62 = vld [vmem:[%s10399_s6 + $0x40] sm:$0xff] }
 0x2ab   :  { %v2184_v14 = vpop.f32.mrf.mxu1  ;;  %v2399_v47 = vpop.f32.mrf.mxu0  ;;  %2522 = vmatprep.subr.mxu1 %v10563_v34 }
 0x2ac   :  { %2523 = vmatpush1.msra.mxu1 %v8637_v63  ;;  %v2641_v14 = vld [vmem:[%s10399_s6 + $0x50] sm:$0xff]  ;;  %v2644_v47 = vld [vmem:[%s10399_s6 + $0x68] sm:$0xff] }
 0x2ad   :  { %v2187_v26 = vpop.f32.mrf.mxu1  ;;  %v2402_v8 = vpop.f32.mrf.mxu0  ;;  %2524 = vmatprep.subr.mxu1 %v10563_v34 }
 0x2ae   :  { %2525 = vmatpush1.msra.mxu1 %v8643_v50  ;;  %v8675_v37 = vmax.f32 %v2187_v26, %v2402_v8  ;;  %v2646_v26 = vld [vmem:[%s10399_s6 + $0x78] sm:$0xff]  ;;  %v2645_v8 = vld [vmem:[%s10399_s6 + $0x70] sm:$0xff] }
 0x2af   :  { %v2189_v49 = vpop.f32.mrf.mxu1  ;;  %v2404_v2 = vpop.f32.mrf.mxu0  ;;  %2526 = vmatprep.subr.mxu1 %v10563_v34 }
 0x2b0   :  { %2527 = vmatpush1.msra.mxu1 %v8649_v42  ;;  %v2647_v49 = vld [vmem:[%s10399_s6 + $0x80] sm:$0xff]  ;;  %v2650_v2 = vld [vmem:[%s10399_s6 + $0x98] sm:$0xff] }
 0x2b1   :  { %v2192_v56 = vpop.f32.mrf.mxu1  ;;  %v2407_v60 = vpop.f32.mrf.mxu0  ;;  %2528 = vmatprep.subr.mxu1 %v10563_v34 }
 0x2b2   :  { %2529 = vmatpush1.msra.mxu1 %v8576_v15  ;;  %v8671_v16 = vmax.f32 %v2192_v56, %v2407_v60  ;;  %v2649_v56 = vld [vmem:[%s10399_s6 + $0x90] sm:$0xff]  ;;  %v2652_v60 = vld [vmem:[%s10399_s6 + $0xa8] sm:$0xff] }
 0x2b3   :  { %v2194_v13 = vpop.f32.mrf.mxu1  ;;  %v2409_v40 = vpop.f32.mrf.mxu0  ;;  %2530 = vmatprep.subr.mxu1 %v10563_v34 }
 0x2b4   :  { %2531 = vmatpush1.msra.mxu1 %v8574_v5  ;;  %v2651_v13 = vld [vmem:[%s10399_s6 + $0xa0] sm:$0xff]  ;;  %v2654_v40 = vld [vmem:[%s10399_s6 + $0xb8] sm:$0xff] }
 0x2b5   :  { %v2197_v28 = vpop.f32.mrf.mxu1  ;;  %v2412_v4 = vpop.f32.mrf.mxu0  ;;  %2532 = vmatprep.subr.mxu1 %v10563_v34 }
 0x2b6   :  { %2533 = vmatpush1.msra.mxu1 %v8572_v61  ;;  %v8667_v31 = vmax.f32 %v2197_v28, %v2412_v4  ;;  %v2653_v28 = vld [vmem:[%s10399_s6 + $0xb0] sm:$0xff]  ;;  %v5924_v4 = vld [vmem:[%s10400_s7 + $0x40] sm:$0xff] }
 0x2b7   :  { %v2199_v11 = vpop.f32.mrf.mxu1  ;;  %v2414_v27 = vpop.f32.mrf.mxu0  ;;  %2534 = vmatprep.subr.mxu1 %v10563_v34 }
 0x2b8   :  { %2535 = vmatpush1.msra.mxu1 %v8570_v9  ;;  %v2840_v11 = vld [vmem:[%s10400_s7] sm:$0xff] }
 0x2b9   :  { %v2202_v32 = vpop.f32.mrf.mxu1  ;;  %v2417_v41 = vpop.f32.mrf.mxu0  ;;  %2536 = vmatprep.subr.mxu1 %v10563_v34  ;;  %6437 = vmatprep.mubr.msk.f32.mxu0 %vm2848_vm7, %v2840_v11 }
 0x2ba   :  { %v8663_v1 = vmax.f32 %v2202_v32, %v2417_v41  ;;  %2537 = vmatpush1.msra.mxu1 %v8568_v30 }
 0x2bb   :  { %v2204_v18 = vpop.f32.mrf.mxu1  ;;  %v2419_v57 = vpop.f32.mrf.mxu0  ;;  %2554 = vmatprep.subr.mxu1 %v10563_v34 }
 0x2bc   :  { %2555 = vmatpush2.msra.mxu1 %v8663_v1 }
 0x2bd   :  { %2556 = vmatprep.subr.mxu1 %v10563_v34 }
 0x2be   :  { %2557 = vmatpush2.msra.mxu1 %v8667_v31 }
 0x2bf   :  { %2558 = vmatprep.subr.mxu1 %v10563_v34 }
 0x2c0   :  { %2559 = vmatpush2.msra.mxu1 %v8671_v16 }
 0x2c1   :  { %2560 = vmatprep.subr.mxu1 %v10563_v34 }
 0x2c2   :  { %2561 = vmatpush2.msra.mxu1 %v8675_v37 }
 0x2c3   :  { %2562 = vmatprep.subr.mxu1 %v10563_v34 }
 0x2c4   :  { %2563 = vmatpush2.msra.mxu1 %v8679_v0 }
 0x2c5   :  { %2564 = vmatprep.subr.mxu1 %v10563_v34 }
 0x2c6   :  { %2565 = vmatpush2.msra.mxu1 %v8685_v48 }
 0x2c7   :  { %2566 = vmatprep.subr.mxu1 %v10563_v34 }
 0x2c8   :  { %2567 = vmatpush2.msra.mxu1 %v8691_v36 }
 0x2c9   :  { %2568 = vmatprep.subr.mxu1 %v10563_v34 }
 0x2ca   :  { %2569 = vmatpush2.msra.mxu1 %v8697_v52 }
 0x2cb   :  { %2571 = vmatmul.mubr.f32.vlgmr.msra.gmra.mxu1 %v2445_v38  ;;  %2691 = vmatprep.subr.mxu1 %v10563_v34 }
 0x2cc   :  { %2692 = vmatpush1.msra.mxu1 %v8592_v23  ;;  %5893 = vmatprep.mubr.msk.f32.mxu1 %vm2469_vm6, %v2448_v22  ;;  %v2449_v23 = vld [vmem:[%s10398_s5 + $0x20] sm:$0xff] }
 0x2cd   :  { %2693 = vmatprep.subr.mxu1 %v10563_v34 }
 0x2ce   :  { %2694 = vmatpush1.msra.mxu1 %v8594_v58  ;;  %v2454_v58 = vld [vmem:[%s10398_s5 + $0x48] sm:$0xff] }
 0x2cf   :  { %2576 = vmatmul.mubr.f32.gmra.mxu1 %v2447_v35  ;;  %2695 = vmatprep.subr.mxu1 %v10563_v34 }
 0x2d0   :  { %2696 = vmatpush1.msra.mxu1 %v8602_v20  ;;  %5894 = vmatprep.mubr.msk.f32.mxu1 %vm2469_vm6, %v2450_v33  ;;  %v2455_v20 = vld [vmem:[%s10398_s5 + $0x50] sm:$0xff] }
 0x2d1   :  { %2697 = vmatprep.subr.mxu1 %v10563_v34 }
 0x2d2   :  { %2698 = vmatpush1.msra.mxu1 %v8606_v54  ;;  %v2460_v54 = vld [vmem:[%s10398_s5 + $0x78] sm:$0xff] }
 0x2d3   :  { %2581 = vmatmul.mubr.f32.gmra.mxu1 %v2449_v23  ;;  %2699 = vmatprep.subr.mxu1 %v10563_v34 }
 0x2d4   :  { %2700 = vmatpush1.msra.mxu1 %v8614_v17  ;;  %5895 = vmatprep.mubr.msk.f32.mxu1 %vm2469_vm6, %v2452_v46  ;;  %v2468_v17 = vld [vmem:[%s10398_s5 + $0xb8] sm:$0xff] }
 0x2d5   :  { %2701 = vmatprep.subr.mxu1 %v10563_v34 }
 0x2d6   :  { %2702 = vmatpush1.msra.mxu1 %v8618_v53  ;;  %v2631_v53 = vld [vmem:[%s10399_s6] sm:$0xff] }
 0x2d7   :  { %2586 = vmatmul.mubr.f32.gmra.mxu1 %v2451_v44  ;;  %2703 = vmatprep.subr.mxu1 %v10563_v34 }
 0x2d8   :  { %2704 = vmatpush1.msra.mxu1 %v8626_v25  ;;  %5896 = vmatprep.mubr.msk.f32.mxu1 %vm2469_vm6, %v2454_v58  ;;  %v2636_v25 = vld [vmem:[%s10399_s6 + $0x28] sm:$0xff] }
 0x2d9   :  { %2705 = vmatprep.subr.mxu1 %v10563_v34 }
 0x2da   :  { %2706 = vmatpush1.msra.mxu1 %v8631_v59  ;;  %v2637_v59 = vld [vmem:[%s10399_s6 + $0x30] sm:$0xff] }
 0x2db   :  { %2591 = vmatmul.mubr.f32.gmra.mxu1 %v2453_v43  ;;  %2707 = vmatprep.subr.mxu1 %v10563_v34 }
 0x2dc   :  { %2708 = vmatpush1.msra.mxu1 %v8637_v63  ;;  %5897 = vmatprep.mubr.msk.f32.mxu1 %vm2469_vm6, %v2456_v21  ;;  %v2642_v63 = vld [vmem:[%s10399_s6 + $0x58] sm:$0xff] }
 0x2dd   :  { %2709 = vmatprep.subr.mxu1 %v10563_v34 }
 0x2de   :  { %2710 = vmatpush1.msra.mxu1 %v8643_v50  ;;  %v2643_v50 = vld [vmem:[%s10399_s6 + $0x60] sm:$0xff] }
 0x2df   :  { %2596 = vmatmul.mubr.f32.gmra.mxu1 %v2455_v20  ;;  %2711 = vmatprep.subr.mxu1 %v10563_v34 }
 0x2e0   :  { %2712 = vmatpush1.msra.mxu1 %v8649_v42  ;;  %5898 = vmatprep.mubr.msk.f32.mxu1 %vm2469_vm6, %v2458_v55  ;;  %v2648_v42 = vld [vmem:[%s10399_s6 + $0x88] sm:$0xff] }
 0x2e1   :  { %2713 = vmatprep.subr.mxu1 %v10563_v34 }
 0x2e2   :  { %2714 = vmatpush1.msra.mxu1 %v8576_v15  ;;  %v2464_v15 = vld [vmem:[%s10398_s5 + $0x98] sm:$0xff] }
 0x2e3   :  { %2601 = vmatmul.mubr.f32.gmra.mxu1 %v2457_v51  ;;  %2715 = vmatprep.subr.mxu1 %v10563_v34 }
 0x2e4   :  { %2716 = vmatpush1.msra.mxu1 %v8574_v5  ;;  %5899 = vmatprep.mubr.msk.f32.mxu1 %vm2469_vm6, %v2460_v54  ;;  %v2461_v5 = vld [vmem:[%s10398_s5 + $0x80] sm:$0xff] }
 0x2e5   :  { %2717 = vmatprep.subr.mxu1 %v10563_v34 }
 0x2e6   :  { %2718 = vmatpush1.msra.mxu1 %v8572_v61  ;;  %v2466_v61 = vld [vmem:[%s10398_s5 + $0xa8] sm:$0xff] }
 0x2e7   :  { %2606 = vmatmul.mubr.f32.gmra.mxu1 %v2459_v3  ;;  %2719 = vmatprep.subr.mxu1 %v10563_v34 }
 0x2e8   :  { %2720 = vmatpush1.msra.mxu1 %v8570_v9  ;;  %5900 = vmatprep.mubr.msk.f32.mxu1 %vm2469_vm6, %v2462_v45  ;;  %v2463_v9 = vld [vmem:[%s10398_s5 + $0x90] sm:$0xff] }
 0x2e9   :  { %2721 = vmatprep.subr.mxu1 %v10563_v34 }
 0x2ea   :  { %2722 = vmatpush1.msra.mxu1 %v8568_v30  ;;  %v2465_v30 = vld [vmem:[%s10398_s5 + $0xa0] sm:$0xff] }
 0x2eb   :  { %2611 = vmatmul.mubr.f32.gmra.mxu1 %v2461_v5  ;;  %2739 = vmatprep.subr.mxu1 %v10563_v34 }
 0x2ec   :  { %2740 = vmatpush2.msra.mxu1 %v8663_v1  ;;  %5901 = vmatprep.mubr.msk.f32.mxu1 %vm2469_vm6, %v2464_v15 }
 0x2ed   :  { %2741 = vmatprep.subr.mxu1 %v10563_v34 }
 0x2ee   :  { %2742 = vmatpush2.msra.mxu1 %v8667_v31 }
 0x2ef   :  { %2616 = vmatmul.mubr.f32.gmra.mxu1 %v2463_v9  ;;  %2743 = vmatprep.subr.mxu1 %v10563_v34 }
 0x2f0   :  { %2744 = vmatpush2.msra.mxu1 %v8671_v16  ;;  %5902 = vmatprep.mubr.msk.f32.mxu1 %vm2469_vm6, %v2466_v61 }
 0x2f1   :  { %2745 = vmatprep.subr.mxu1 %v10563_v34 }
 0x2f2   :  { %2746 = vmatpush2.msra.mxu1 %v8675_v37 }
 0x2f3   :  { %2621 = vmatmul.mubr.f32.gmra.mxu1 %v2465_v30  ;;  %2747 = vmatprep.subr.mxu1 %v10563_v34 }
 0x2f4   :  { %2748 = vmatpush2.msra.mxu1 %v8679_v0  ;;  %5903 = vmatprep.mubr.msk.f32.mxu1 %vm2469_vm6, %v2468_v17 }
 0x2f5   :  { %2749 = vmatprep.subr.mxu1 %v10563_v34 }
 0x2f6   :  { %2750 = vmatpush2.msra.mxu1 %v8685_v48 }
 0x2f7   :  { %2626 = vmatmul.mubr.f32.gmra.mxu1 %v2467_v6  ;;  %2751 = vmatprep.subr.mxu1 %v10563_v34 }
 0x2f8   :  { %2752 = vmatpush2.msra.mxu1 %v8691_v36  ;;  %5904 = vmatprep.mubr.msk.f32.mxu1 %vm2469_vm6, %v2632_v29 }
 0x2f9   :  { %2753 = vmatprep.subr.mxu1 %v10563_v34 }
 0x2fa   :  { %2754 = vmatpush2.msra.mxu1 %v8697_v52 }
 0x2fb   :  { %2756 = vmatmul.mubr.f32.vlgmr.msra.gmra.mxu1 %v2631_v53 }
 0x2fc   :  { %5905 = vmatprep.mubr.msk.f32.mxu1 %vm2469_vm6, %v2634_v24 }
 0x2ff   :  { %2761 = vmatmul.mubr.f32.gmra.mxu1 %v2633_v12 }
 0x300   :  { %5906 = vmatprep.mubr.msk.f32.mxu1 %vm2469_vm6, %v2636_v25 }
 0x303   :  { %2766 = vmatmul.mubr.f32.gmra.mxu1 %v2635_v7 }
 0x304   :  { %5907 = vmatprep.mubr.msk.f32.mxu1 %vm2469_vm6, %v2638_v39 }
 0x307   :  { %2771 = vmatmul.mubr.f32.gmra.mxu1 %v2637_v59 }
 0x308   :  { %5908 = vmatprep.mubr.msk.f32.mxu1 %vm2469_vm6, %v2640_v10 }
 0x30b   :  { %2776 = vmatmul.mubr.f32.gmra.mxu1 %v2639_v62 }
 0x30c   :  { %5909 = vmatprep.mubr.msk.f32.mxu1 %vm2469_vm6, %v2642_v63 }
 0x30f   :  { %2781 = vmatmul.mubr.f32.gmra.mxu1 %v2641_v14 }
 0x310   :  { %5910 = vmatprep.mubr.msk.f32.mxu1 %vm2469_vm6, %v2644_v47 }
 0x313   :  { %2786 = vmatmul.mubr.f32.gmra.mxu1 %v2643_v50 }
 0x314   :  { %5911 = vmatprep.mubr.msk.f32.mxu1 %vm2469_vm6, %v2646_v26 }
 0x317   :  { %2791 = vmatmul.mubr.f32.gmra.mxu1 %v2645_v8 }
 0x318   :  { %5912 = vmatprep.mubr.msk.f32.mxu1 %vm2469_vm6, %v2648_v42 }
 0x31b   :  { %2796 = vmatmul.mubr.f32.gmra.mxu1 %v2647_v49 }
 0x31c   :  { %5913 = vmatprep.mubr.msk.f32.mxu1 %vm2469_vm6, %v2650_v2 }
 0x31f   :  { %2801 = vmatmul.mubr.f32.gmra.mxu1 %v2649_v56 }
 0x320   :  { %5914 = vmatprep.mubr.msk.f32.mxu1 %vm2469_vm6, %v2652_v60 }
 0x323   :  { %2806 = vmatmul.mubr.f32.gmra.mxu1 %v2651_v13 }
 0x324   :  { %5915 = vmatprep.mubr.msk.f32.mxu1 %vm2469_vm6, %v2654_v40 }
 0x327   :  { %2811 = vmatmul.mubr.f32.gmra.mxu1 %v2653_v28 }
 0x328   :  { %6473 = vmatprep.mubr.msk.f32.mxu1 %vm2848_vm7, %v5924_v4 }
 0x38b   :  { %v8922_v27 = vpop.f32.mrf.mxu1 }
 0x38d   :  { %v2574_v32 = vpop.f32.mrf.mxu1 }
 0x38f   :  { %v8924_v41 = vpop.f32.mrf.mxu1 }
 0x391   :  { %v2579_v1 = vpop.f32.mrf.mxu1 }
 0x393   :  { %v8926_v18 = vpop.f32.mrf.mxu1 }
 0x395   :  { %v2584_v57 = vpop.f32.mrf.mxu1 }
 0x397   :  { %v8928_v31 = vpop.f32.mrf.mxu1 }
 0x399   :  { %v2589_v16 = vpop.f32.mrf.mxu1 }
 0x39b   :  { %v8930_v37 = vpop.f32.mrf.mxu1 }
 0x39d   :  { %v2594_v0 = vpop.f32.mrf.mxu1 }
 0x39f   :  { %v8932_v48 = vpop.f32.mrf.mxu1 }
 0x3a1   :  { %v2599_v36 = vpop.f32.mrf.mxu1 }
 0x3a2   :  { %v5925_v36 = vld [vmem:[%s10400_s7 + $0x48] sm:$0xff] }
 0x3a3   :  { %v8934_v52 = vpop.f32.mrf.mxu1 }
 0x3a5   :  { %v2604_v38 = vpop.f32.mrf.mxu1 }
 0x3a6   :  { %v5926_v38 = vld [vmem:[%s10400_s7 + $0x50] sm:$0xff] }
 0x3a7   :  { %v2607_v22 = vpop.f32.mrf.mxu1 }
 0x3a9   :  { %v2609_v35 = vpop.f32.mrf.mxu1 }
 0x3aa   :  { %v2842_v35 = vld [vmem:[%s10400_s7 + $0x10] sm:$0xff] }
 0x3ab   :  { %v2612_v33 = vpop.f32.mrf.mxu1 }
 0x3ad   :  { %v2614_v23 = vpop.f32.mrf.mxu1 }
 0x3ae   :  { %v3007_v23 = vld [vmem:[%s10401_s8 + $0xe8] sm:$0xff] }
 0x3af   :  { %v2617_v46 = vpop.f32.mrf.mxu1 }
 0x3b1   :  { %v2619_v44 = vpop.f32.mrf.mxu1 }
 0x3b2   :  { %v5927_v44 = vld [vmem:[%s10400_s7 + $0x58] sm:$0xff] }
 0x3b3   :  { %v2622_v58 = vpop.f32.mrf.mxu1 }
 0x3b5   :  { %v2624_v43 = vpop.f32.mrf.mxu1 }
 0x3b6   :  { %v5928_v43 = vld [vmem:[%s10400_s7 + $0x60] sm:$0xff] }
 0x3b7   :  { %v2627_v21 = vpop.f32.mrf.mxu1 }
 0x3b9   :  { %v2629_v20 = vpop.f32.mrf.mxu1 }
 0x3ba   :  { %v3006_v20 = vld [vmem:[%s10401_s8 + $0xe0] sm:$0xff] }
 0x3bb   :  { %v8936_v55 = vpop.f32.mrf.mxu1 }
 0x3bc   :  { %v2816_v51 = vmax.f32 %v8922_v27, %v8936_v55  ;;  %v2841_v27 = vld [vmem:[%s10400_s7 + $0x8] sm:$0xff] }
 0x3bd   :  { %v2759_v54 = vpop.f32.mrf.mxu1  ;;  %v5963_v55 = vld [vmem:[%s10401_s8 + $0x1a8] sm:$0xff] }
 0x3be   :  { %v5962_v54 = vld [vmem:[%s10401_s8 + $0x1a0] sm:$0xff] }
 0x3bf   :  { %v8940_v3 = vpop.f32.mrf.mxu1 }
 0x3c1   :  { %v2764_v45 = vpop.f32.mrf.mxu1 }
 0x3c2   :  { %v5961_v45 = vld [vmem:[%s10401_s8 + $0x198] sm:$0xff] }
 0x3c3   :  { %v8942_v5 = vpop.f32.mrf.mxu1 }
 0x3c4   :  { %v2818_v16 = vmax.f32 %v8926_v18, %v8942_v5  ;;  %v5930_v5 = vld [vmem:[%s10400_s7 + $0x70] sm:$0xff] }
 0x3c5   :  { %v2769_v15 = vpop.f32.mrf.mxu1 }
 0x3c6   :  { %v9005_v18 = vmax.f32 %v2818_v16, 0.0  ;;  %v5960_v15 = vld [vmem:[%s10401_s8 + $0x190] sm:$0xff]  ;;  %v3003_v16 = vld [vmem:[%s10401_s8 + $0xc8] sm:$0xff] }
 0x3c7   :  { %v8944_v9 = vpop.f32.mrf.mxu1 }
 0x3c8   :  { %v2819_v1 = vmax.f32 %v8928_v31, %v8944_v9  ;;  %v2817_v31 = vmax.f32 %v8924_v41, %v8940_v3  ;;  %v5929_v3 = vld [vmem:[%s10400_s7 + $0x68] sm:$0xff]  ;;  %v2844_v9 = vld [vmem:[%s10400_s7 + $0x20] sm:$0xff] }
 0x3c9   :  { %v2774_v61 = vpop.f32.mrf.mxu1 }
 0x3ca   :  { %v8999_v0 = vmax.f32 %v2819_v1, 0.0  ;;  %v9011_v41 = vmax.f32 %v2817_v31, 0.0  ;;  %v5959_v61 = vld [vmem:[%s10401_s8 + $0x188] sm:$0xff]  ;;  %v3004_v1 = vld [vmem:[%s10401_s8 + $0xd0] sm:$0xff]  ;;  %v3002_v31 = vld [vmem:[%s10401_s8 + $0xc0] sm:$0xff] }
 0x3cb   :  { %v2777_v30 = vpop.f32.mrf.mxu1 }
 0x3cc   :  { %v2820_v11 = vmax.f32 %v8930_v37, %v2777_v30  ;;  %v2845_v30 = vld [vmem:[%s10400_s7 + $0x28] sm:$0xff] }
 0x3cd   :  { %v2779_v17 = vpop.f32.mrf.mxu1 }
 0x3ce   :  { %v8991_v37 = vmax.f32 %v2820_v11, 0.0  ;;  %v5958_v17 = vld [vmem:[%s10401_s8 + $0x180] sm:$0xff]  ;;  %v3005_v11 = vld [vmem:[%s10401_s8 + $0xd8] sm:$0xff] }
 0x3cf   :  { %v2782_v6 = vpop.f32.mrf.mxu1 }
 0x3d0   :  { %v2821_v28 = vmax.f32 %v8932_v48, %v2782_v6  ;;  %v9020_v48 = vmax.f32 %v2816_v51, 0.0  ;;  %v2843_v51 = vld [vmem:[%s10400_s7 + $0x18] sm:$0xff] }
 0x3d1   :  { %v2784_v29 = vpop.f32.mrf.mxu1  ;;  %v5931_v6 = vld [vmem:[%s10400_s7 + $0x78] sm:$0xff] }
 0x3d2   :  { %v8983_v57 = vmax.f32 %v2821_v28, 0.0  ;;  %v5957_v29 = vld [vmem:[%s10401_s8 + $0x178] sm:$0xff]  ;;  %v5940_v28 = vld [vmem:[%s10401_s8 + $0xf0] sm:$0xff] }
 0x3d3   :  { %v2787_v53 = vpop.f32.mrf.mxu1 }
 0x3d4   :  { %v2822_v13 = vmax.f32 %v8934_v52, %v2787_v53  ;;  %v5969_v52 = vld [vmem:[%s10401_s8 + $0x1d8] sm:$0xff]  ;;  %v2846_v53 = vld [vmem:[%s10400_s7 + $0x30] sm:$0xff] }
 0x3d5   :  { %v2789_v24 = vpop.f32.mrf.mxu1 }
 0x3d6   :  { %v8975_v32 = vmax.f32 %v2822_v13, 0.0  ;;  %v5956_v24 = vld [vmem:[%s10401_s8 + $0x170] sm:$0xff]  ;;  %v5941_v13 = vld [vmem:[%s10401_s8 + $0xf8] sm:$0xff] }
 0x3d7   :  { %v2792_v12 = vpop.f32.mrf.mxu1 }
 0x3d8   :  { %v2823_v56 = vmax.f32 %v2607_v22, %v2792_v12  ;;  %v5968_v22 = vld [vmem:[%s10401_s8 + $0x1d0] sm:$0xff]  ;;  %v5955_v12 = vld [vmem:[%s10401_s8 + $0x168] sm:$0xff] }
 0x3d9   :  { %v2794_v25 = vpop.f32.mrf.mxu1 }
 0x3da   :  { %v8968_v4 = vmax.f32 %v2823_v56, 0.0  ;;  %v2847_v25 = vld [vmem:[%s10400_s7 + $0x38] sm:$0xff]  ;;  %v5942_v56 = vld [vmem:[%s10401_s8 + $0x100] sm:$0xff] }
 0x3db   :  { %v2797_v7 = vpop.f32.mrf.mxu1 }
 0x3dc   :  { %v2824_v49 = vmax.f32 %v2612_v33, %v2797_v7  ;;  %v5967_v33 = vld [vmem:[%s10401_s8 + $0x1c8] sm:$0xff]  ;;  %v5954_v7 = vld [vmem:[%s10401_s8 + $0x160] sm:$0xff] }
 0x3dd   :  { %v2799_v39 = vpop.f32.mrf.mxu1 }
 0x3de   :  { %v8961_v40 = vmax.f32 %v2824_v49, 0.0  ;;  %v5953_v39 = vld [vmem:[%s10401_s8 + $0x158] sm:$0xff]  ;;  %v5943_v49 = vld [vmem:[%s10401_s8 + $0x108] sm:$0xff] }
 0x3df   :  { %v2802_v59 = vpop.f32.mrf.mxu1 }
 0x3e0   :  { %v2825_v8 = vmax.f32 %v2617_v46, %v2802_v59  ;;  %v5966_v46 = vld [vmem:[%s10401_s8 + $0x1c0] sm:$0xff]  ;;  %v5952_v59 = vld [vmem:[%s10401_s8 + $0x150] sm:$0xff] }
 0x3e1   :  { %v2804_v10 = vpop.f32.mrf.mxu1 }
 0x3e2   :  { %v8954_v60 = vmax.f32 %v2825_v8, 0.0  ;;  %v5951_v10 = vld [vmem:[%s10401_s8 + $0x148] sm:$0xff]  ;;  %v5944_v8 = vld [vmem:[%s10401_s8 + $0x110] sm:$0xff] }
 0x3e3   :  { %v2807_v62 = vpop.f32.mrf.mxu1 }
 0x3e4   :  { %v2826_v47 = vmax.f32 %v2622_v58, %v2807_v62  ;;  %v5965_v58 = vld [vmem:[%s10401_s8 + $0x1b8] sm:$0xff]  ;;  %v5950_v62 = vld [vmem:[%s10401_s8 + $0x140] sm:$0xff] }
 0x3e5   :  { %v2809_v63 = vpop.f32.mrf.mxu1 }
 0x3e6   :  { %v8948_v2 = vmax.f32 %v2826_v47, 0.0  ;;  %v5949_v63 = vld [vmem:[%s10401_s8 + $0x138] sm:$0xff]  ;;  %v5947_v47 = vld [vmem:[%s10401_s8 + $0x128] sm:$0xff] }
 0x3e7   :  { %v2812_v14 = vpop.f32.mrf.mxu1 }
 0x3e8   :  { %v2827_v50 = vmax.f32 %v2627_v21, %v2812_v14  ;;  %v5964_v21 = vld [vmem:[%s10401_s8 + $0x1b0] sm:$0xff] }
 0x3e9   :  { %v2814_v26 = vpop.f32.mrf.mxu1  ;;  %v5948_v14 = vld [vmem:[%s10401_s8 + $0x130] sm:$0xff] }
 0x3ea   :  { %v8946_v42 = vmax.f32 %v2827_v50, 0.0  ;;  %v5946_v50 = vld [vmem:[%s10401_s8 + $0x120] sm:$0xff]  ;;  %v5945_v26 = vld [vmem:[%s10401_s8 + $0x118] sm:$0xff] }
 0x3ec   :  { %6413 = vmatprep.subr.mxu0 %v8946_v42  ;;  %6449 = vmatprep.subr.mxu1 %v8946_v42 }
 0x3ed   :  { %6414 = vmatpush3.msra.mxu0 %v8946_v42  ;;  %6450 = vmatpush3.msra.mxu1 %v8946_v42 }
 0x3ee   :  { %6415 = vmatprep.subr.mxu0 %v8948_v2  ;;  %6451 = vmatprep.subr.mxu1 %v8948_v2 }
 0x3ef   :  { %6416 = vmatpush3.msra.mxu0 %v8948_v2  ;;  %6452 = vmatpush3.msra.mxu1 %v8948_v2 }
 0x3f0   :  { %6417 = vmatprep.subr.mxu0 %v8954_v60  ;;  %6453 = vmatprep.subr.mxu1 %v8954_v60 }
 0x3f1   :  { %6418 = vmatpush3.msra.mxu0 %v8954_v60  ;;  %6454 = vmatpush3.msra.mxu1 %v8954_v60 }
 0x3f2   :  { %6419 = vmatprep.subr.mxu0 %v8961_v40  ;;  %6455 = vmatprep.subr.mxu1 %v8961_v40 }
 0x3f3   :  { %6420 = vmatpush3.msra.mxu0 %v8961_v40  ;;  %6456 = vmatpush3.msra.mxu1 %v8961_v40 }
 0x3f4   :  { %6421 = vmatprep.subr.mxu0 %v8968_v4  ;;  %6457 = vmatprep.subr.mxu1 %v8968_v4 }
 0x3f5   :  { %6422 = vmatpush3.msra.mxu0 %v8968_v4  ;;  %6458 = vmatpush3.msra.mxu1 %v8968_v4 }
 0x3f6   :  { %6423 = vmatprep.subr.mxu0 %v8975_v32  ;;  %6459 = vmatprep.subr.mxu1 %v8975_v32 }
 0x3f7   :  { %6424 = vmatpush3.msra.mxu0 %v8975_v32  ;;  %6460 = vmatpush3.msra.mxu1 %v8975_v32 }
 0x3f8   :  { %6425 = vmatprep.subr.mxu0 %v8983_v57  ;;  %6461 = vmatprep.subr.mxu1 %v8983_v57 }
 0x3f9   :  { %6426 = vmatpush3.msra.mxu0 %v8983_v57  ;;  %6462 = vmatpush3.msra.mxu1 %v8983_v57 }
 0x3fa   :  { %6427 = vmatprep.subr.mxu0 %v8991_v37  ;;  %6463 = vmatprep.subr.mxu1 %v8991_v37 }
 0x3fb   :  { %6428 = vmatpush3.msra.mxu0 %v8991_v37  ;;  %6464 = vmatpush3.msra.mxu1 %v8991_v37 }
 0x3fc   :  { %6429 = vmatprep.subr.mxu0 %v8999_v0  ;;  %6465 = vmatprep.subr.mxu1 %v8999_v0 }
 0x3fd   :  { %6430 = vmatpush3.msra.mxu0 %v8999_v0  ;;  %6466 = vmatpush3.msra.mxu1 %v8999_v0 }
 0x3fe   :  { %6431 = vmatprep.subr.mxu0 %v9005_v18  ;;  %6467 = vmatprep.subr.mxu1 %v9005_v18 }
 0x3ff   :  { %6432 = vmatpush3.msra.mxu0 %v9005_v18  ;;  %6468 = vmatpush3.msra.mxu1 %v9005_v18 }
 0x400   :  { %6433 = vmatprep.subr.mxu0 %v9011_v41  ;;  %6469 = vmatprep.subr.mxu1 %v9011_v41 }
 0x401   :  { %6434 = vmatpush3.msra.mxu0 %v9011_v41  ;;  %6470 = vmatpush3.msra.mxu1 %v9011_v41 }
 0x402   :  { %6435 = vmatprep.subr.mxu0 %v9020_v48  ;;  %6471 = vmatprep.subr.mxu1 %v9020_v48 }
 0x403   :  { %6436 = vmatpush3.msra.mxu0 %v9020_v48  ;;  %6472 = vmatpush3.msra.mxu1 %v9020_v48 }
 0x404   :  { %6474 = vmatmul.mubr.msk.f32.vlgmr.msra.gmra.mxu1 %vm2848_vm7, %v5925_v36  ;;  %3204 = vmatprep.subr.mxu0 %v5969_v52  ;;  %v3001_v36 = vld [vmem:[%s10401_s8 + $0xb8] sm:$0xff]  ;;  %v3000_v52 = vld [vmem:[%s10401_s8 + $0xb0] sm:$0xff] }
 0x405   :  { %6438 = vmatmul.mubr.msk.f32.vlgmr.msra.gmra.mxu0 %vm2848_vm7, %v2841_v27  ;;  %6476 = vmatprep.mubr.msk.f32.mxu1 %vm2848_vm7, %v5926_v38  ;;  %v2999_v27 = vld [vmem:[%s10401_s8 + $0xa8] sm:$0xff]  ;;  %v2998_v38 = vld [vmem:[%s10401_s8 + $0xa0] sm:$0xff] }
 0x406   :  { %3205 = vmatpush1.msra.mxu0 %v5968_v22  ;;  %6440 = vmatprep.mubr.msk.f32.mxu0 %vm2848_vm7, %v2842_v35  ;;  %v2997_v22 = vld [vmem:[%s10401_s8 + $0x98] sm:$0xff]  ;;  %v2996_v35 = vld [vmem:[%s10401_s8 + $0x90] sm:$0xff] }
 0x407   :  { %3206 = vmatprep.subr.mxu0 %v5967_v33  ;;  %3341 = vmatprep.subr.mxu1 %v3007_v23  ;;  %v2995_v33 = vld [vmem:[%s10401_s8 + $0x88] sm:$0xff]  ;;  %v2994_v23 = vld [vmem:[%s10401_s8 + $0x80] sm:$0xff] }
 0x408   :  { %3207 = vmatpush1.msra.mxu0 %v5966_v46  ;;  %6477 = vmatmul.mubr.msk.f32.gmra.mxu1 %vm2848_vm7, %v5927_v44  ;;  %v2993_v46 = vld [vmem:[%s10401_s8 + $0x78] sm:$0xff]  ;;  %v2992_v44 = vld [vmem:[%s10401_s8 + $0x70] sm:$0xff] }
 0x409   :  { %3208 = vmatprep.subr.mxu0 %v5965_v58  ;;  %6479 = vmatprep.mubr.msk.f32.mxu1 %vm2848_vm7, %v5928_v43  ;;  %v2991_v58 = vld [vmem:[%s10401_s8 + $0x68] sm:$0xff]  ;;  %v2990_v43 = vld [vmem:[%s10401_s8 + $0x60] sm:$0xff] }
 0x40a   :  { %3209 = vmatpush1.msra.mxu0 %v5964_v21  ;;  %3342 = vmatpush1.msra.mxu1 %v3006_v20  ;;  %v2989_v21 = vld [vmem:[%s10401_s8 + $0x58] sm:$0xff]  ;;  %v2988_v20 = vld [vmem:[%s10401_s8 + $0x50] sm:$0xff] }
 0x40b   :  { %3210 = vmatprep.subr.mxu0 %v5963_v55  ;;  %6441 = vmatmul.mubr.msk.f32.gmra.mxu0 %vm2848_vm7, %v2843_v51  ;;  %v2987_v55 = vld [vmem:[%s10401_s8 + $0x48] sm:$0xff]  ;;  %v2986_v51 = vld [vmem:[%s10401_s8 + $0x40] sm:$0xff] }
 0x40c   :  { %3211 = vmatpush1.msra.mxu0 %v5962_v54  ;;  %6480 = vmatmul.mubr.msk.f32.gmra.mxu1 %vm2848_vm7, %v5929_v3  ;;  %v2985_v54 = vld [vmem:[%s10401_s8 + $0x38] sm:$0xff]  ;;  %v2984_v3 = vld [vmem:[%s10401_s8 + $0x30] sm:$0xff] }
 0x40d   :  { %3212 = vmatprep.subr.mxu0 %v5961_v45  ;;  %6482 = vmatprep.mubr.msk.f32.mxu1 %vm2848_vm7, %v5930_v5  ;;  %v2983_v45 = vld [vmem:[%s10401_s8 + $0x28] sm:$0xff]  ;;  %v2982_v5 = vld [vmem:[%s10401_s8 + $0x20] sm:$0xff] }
 0x40e   :  { %3213 = vmatpush1.msra.mxu0 %v5960_v15  ;;  %6443 = vmatprep.mubr.msk.f32.mxu0 %vm2848_vm7, %v2844_v9  ;;  %v2981_v15 = vld [vmem:[%s10401_s8 + $0x18] sm:$0xff]  ;;  %v2980_v9 = vld [vmem:[%s10401_s8 + $0x10] sm:$0xff] }
 0x40f   :  { %3214 = vmatprep.subr.mxu0 %v5959_v61  ;;  %6444 = vmatmul.mubr.msk.f32.gmra.mxu0 %vm2848_vm7, %v2845_v30  ;;  %v2979_v61 = vld [vmem:[%s10401_s8 + $0x8] sm:$0xff]  ;;  %v2978_v30 = vld [vmem:[%s10401_s8] sm:$0xff] }
 0x410   :  { %3215 = vmatpush1.msra.mxu0 %v5958_v17  ;;  %6483 = vmatmul.mubr.msk.f32.gmra.mxu1 %vm2848_vm7, %v5931_v6 }
 0x411   :  { %3216 = vmatprep.subr.mxu0 %v5957_v29  ;;  %6446 = vmatprep.mubr.msk.f32.mxu0 %vm2848_vm7, %v2846_v53 }
 0x412   :  { %3217 = vmatpush1.msra.mxu0 %v5956_v24  ;;  %3403 = vmatprep.mubr.f32.mxu1 %v10563_v34 }
 0x413   :  { %3218 = vmatprep.subr.mxu0 %v5955_v12  ;;  %6447 = vmatmul.mubr.msk.f32.gmra.mxu0 %vm2848_vm7, %v2847_v25 }
 0x414   :  { %3219 = vmatpush1.msra.mxu0 %v5954_v7  ;;  %3266 = vmatprep.mubr.f32.mxu0 %v10563_v34 }
 0x415   :  { %3220 = vmatprep.subr.mxu0 %v5953_v39  ;;  %3343 = vmatprep.subr.mxu1 %v3005_v11  ;;  %v5992_v11 = vld [vmem:[%s10400_s7 + $0xb0] sm:$0xff] }
 0x416   :  { %3221 = vmatpush1.msra.mxu0 %v5952_v59  ;;  %3344 = vmatpush1.msra.mxu1 %v3004_v1  ;;  %v5993_v1 = vld [vmem:[%s10400_s7 + $0xb8] sm:$0xff] }
 0x417   :  { %3222 = vmatprep.subr.mxu0 %v5951_v10  ;;  %3345 = vmatprep.subr.mxu1 %v3003_v16  ;;  %v6040_v16 = vld [vmem:[%s10400_s7 + $0xc0] sm:$0xff] }
 0x418   :  { %3223 = vmatpush1.msra.mxu0 %v5950_v62  ;;  %3346 = vmatpush1.msra.mxu1 %v3002_v31  ;;  %v6041_v31 = vld [vmem:[%s10400_s7 + $0xc8] sm:$0xff] }
 0x419   :  { %3224 = vmatprep.subr.mxu0 %v5949_v63  ;;  %3347 = vmatprep.subr.mxu1 %v3001_v36  ;;  %v6042_v36 = vld [vmem:[%s10400_s7 + $0xd0] sm:$0xff] }
 0x41a   :  { %3225 = vmatpush1.msra.mxu0 %v5948_v14  ;;  %3348 = vmatpush1.msra.mxu1 %v3000_v52  ;;  %v6043_v52 = vld [vmem:[%s10400_s7 + $0xd8] sm:$0xff] }
 0x41b   :  { %3226 = vmatprep.subr.mxu0 %v5947_v47  ;;  %3349 = vmatprep.subr.mxu1 %v2999_v27  ;;  %v6044_v27 = vld [vmem:[%s10400_s7 + $0xe0] sm:$0xff] }
 0x41c   :  { %3227 = vmatpush1.msra.mxu0 %v5946_v50  ;;  %3350 = vmatpush1.msra.mxu1 %v2998_v38  ;;  %v6046_v38 = vld [vmem:[%s10400_s7 + $0xf0] sm:$0xff] }
 0x41d   :  { %3228 = vmatprep.subr.mxu0 %v5945_v26  ;;  %3351 = vmatprep.subr.mxu1 %v2997_v22  ;;  %v5986_v26 = vld [vmem:[%s10400_s7 + $0x80] sm:$0xff]  ;;  %v6027_v22 = vld [vmem:[%s10401_s8 + $0x2a8] sm:$0xff] }
 0x41e   :  { %3229 = vmatpush1.msra.mxu0 %v5944_v8  ;;  %3352 = vmatpush1.msra.mxu1 %v2996_v35  ;;  %v5987_v8 = vld [vmem:[%s10400_s7 + $0x88] sm:$0xff]  ;;  %v6025_v35 = vld [vmem:[%s10401_s8 + $0x298] sm:$0xff] }
 0x41f   :  { %3230 = vmatprep.subr.mxu0 %v5943_v49  ;;  %3353 = vmatprep.subr.mxu1 %v2995_v33  ;;  %v5988_v49 = vld [vmem:[%s10400_s7 + $0x90] sm:$0xff]  ;;  %v6023_v33 = vld [vmem:[%s10401_s8 + $0x288] sm:$0xff] }
 0x420   :  { %3231 = vmatpush1.msra.mxu0 %v5942_v56  ;;  %3354 = vmatpush1.msra.mxu1 %v2994_v23  ;;  %v5989_v56 = vld [vmem:[%s10400_s7 + $0x98] sm:$0xff]  ;;  %v6095_v23 = vld [vmem:[%s10400_s7 + $0x108] sm:$0xff] }
 0x421   :  { %3232 = vmatprep.subr.mxu0 %v5941_v13  ;;  %3355 = vmatprep.subr.mxu1 %v2993_v46  ;;  %v5990_v13 = vld [vmem:[%s10400_s7 + $0xa0] sm:$0xff] }
 0x422   :  { %3233 = vmatpush1.msra.mxu0 %v5940_v28  ;;  %3356 = vmatpush1.msra.mxu1 %v2992_v44  ;;  %v5991_v28 = vld [vmem:[%s10400_s7 + $0xa8] sm:$0xff]  ;;  %v6022_v46 = vld [vmem:[%s10401_s8 + $0x280] sm:$0xff]  ;;  %v6020_v44 = vld [vmem:[%s10401_s8 + $0x270] sm:$0xff] }
 0x423   :  { %6485 = vmatprep.subr.mxu0 %v8946_v42  ;;  %3357 = vmatprep.subr.mxu1 %v2991_v58  ;;  %v6019_v58 = vld [vmem:[%s10401_s8 + $0x268] sm:$0xff] }
 0x424   :  { %3358 = vmatpush1.msra.mxu1 %v2990_v43  ;;  %v6097_v43 = vld [vmem:[%s10400_s7 + $0x118] sm:$0xff] }
 0x425   :  { %3359 = vmatprep.subr.mxu1 %v2989_v21  ;;  %v6018_v21 = vld [vmem:[%s10401_s8 + $0x260] sm:$0xff] }
 0x426   :  { %3360 = vmatpush1.msra.mxu1 %v2988_v20  ;;  %v6017_v20 = vld [vmem:[%s10401_s8 + $0x258] sm:$0xff] }
 0x427   :  { %3361 = vmatprep.subr.mxu1 %v2987_v55  ;;  %v6016_v55 = vld [vmem:[%s10401_s8 + $0x250] sm:$0xff] }
 0x428   :  { %3362 = vmatpush1.msra.mxu1 %v2986_v51  ;;  %v6015_v51 = vld [vmem:[%s10401_s8 + $0x248] sm:$0xff] }
 0x429   :  { %3363 = vmatprep.subr.mxu1 %v2985_v54  ;;  %v6099_v54 = vld [vmem:[%s10400_s7 + $0x128] sm:$0xff] }
 0x42a   :  { %3364 = vmatpush1.msra.mxu1 %v2984_v3  ;;  %v6100_v3 = vld [vmem:[%s10400_s7 + $0x130] sm:$0xff] }
 0x42b   :  { %3365 = vmatprep.subr.mxu1 %v2983_v45  ;;  %v6014_v45 = vld [vmem:[%s10401_s8 + $0x240] sm:$0xff] }
 0x42c   :  { %3366 = vmatpush1.msra.mxu1 %v2982_v5  ;;  %v6013_v5 = vld [vmem:[%s10401_s8 + $0x238] sm:$0xff] }
 0x42d   :  { %3367 = vmatprep.subr.mxu1 %v2981_v15  ;;  %v6012_v15 = vld [vmem:[%s10401_s8 + $0x230] sm:$0xff] }
 0x42e   :  { %3368 = vmatpush1.msra.mxu1 %v2980_v9  ;;  %v6011_v9 = vld [vmem:[%s10401_s8 + $0x228] sm:$0xff] }
 0x42f   :  { %3369 = vmatprep.subr.mxu1 %v2979_v61  ;;  %v6101_v61 = vld [vmem:[%s10400_s7 + $0x138] sm:$0xff] }
 0x430   :  { %3370 = vmatpush1.msra.mxu1 %v2978_v30  ;;  %v6010_v30 = vld [vmem:[%s10401_s8 + $0x220] sm:$0xff] }
 0x4c4   :  { %v6475_v17 = vpop.f32.mrf.mxu1 }
 0x4c5   :  { %v6439_v6 = vpop.f32.mrf.mxu0 }
 0x4c6   :  { %v3107_v29 = vpop.f32.mrf.mxu1 }
 0x4c7   :  { %5970 = vmatmul.mubr.msk.f32.vlgmr.msra.gmra.mxu0 %vm3177_vm8, %v3107_v29  ;;  %v2939_v53 = vpop.f32.mrf.mxu0  ;;  %v6007_v29 = vld [vmem:[%s10401_s8 + $0x208] sm:$0xff] }
 0x4c8   :  { %6486 = vmatpush3.msra.mxu0 %v8946_v42  ;;  %3272 = vmatprep.mubr.f32.mxu0 %v10563_v34  ;;  %v6478_v24 = vpop.f32.mrf.mxu1 }
 0x4c9   :  { %6487 = vmatprep.subr.mxu0 %v8948_v2  ;;  %5978 = vmatmul.mubr.msk.f32.vlgmr.msra.gmra.mxu1 %vm3177_vm8, %v2939_v53  ;;  %v6006_v53 = vld [vmem:[%s10401_s8 + $0x200] sm:$0xff] }
 0x4ca   :  { %6488 = vmatpush3.msra.mxu0 %v8948_v2  ;;  %3409 = vmatprep.mubr.f32.mxu1 %v10563_v34  ;;  %v3117_v25 = vpop.f32.mrf.mxu1 }
 0x4cb   :  { %6489 = vmatprep.subr.mxu0 %v8954_v60  ;;  %5971 = vmatmul.mubr.msk.f32.gmra.mxu0 %vm3177_vm8, %v6475_v17  ;;  %v6442_v12 = vpop.f32.mrf.mxu0  ;;  %v6009_v17 = vld [vmem:[%s10401_s8 + $0x218] sm:$0xff] }
 0x4cc   :  { %6490 = vmatpush3.msra.mxu0 %v8954_v60  ;;  %3278 = vmatprep.mubr.f32.mxu0 %v10563_v34  ;;  %v6481_v39 = vpop.f32.mrf.mxu1 }
 0x4cd   :  { %6491 = vmatprep.subr.mxu0 %v8961_v40  ;;  %5979 = vmatmul.mubr.msk.f32.gmra.mxu1 %vm3177_vm8, %v6439_v6  ;;  %v2949_v7 = vpop.f32.mrf.mxu0  ;;  %v6008_v6 = vld [vmem:[%s10401_s8 + $0x210] sm:$0xff] }
 0x4ce   :  { %6492 = vmatpush3.msra.mxu0 %v8961_v40  ;;  %3415 = vmatprep.mubr.f32.mxu1 %v10563_v34  ;;  %v3127_v10 = vpop.f32.mrf.mxu1 }
 0x4cf   :  { %6493 = vmatprep.subr.mxu0 %v8968_v4  ;;  %5972 = vmatmul.mubr.msk.f32.gmra.mxu0 %vm3177_vm8, %v3117_v25  ;;  %v6445_v59 = vpop.f32.mrf.mxu0  ;;  %v6003_v25 = vld [vmem:[%s10401_s8 + $0x1e8] sm:$0xff] }
 0x4d0   :  { %6494 = vmatpush3.msra.mxu0 %v8968_v4  ;;  %3284 = vmatprep.mubr.f32.mxu0 %v10563_v34  ;;  %v6484_v63 = vpop.f32.mrf.mxu1 }
 0x4d1   :  { %6495 = vmatprep.subr.mxu0 %v8975_v32  ;;  %5980 = vmatmul.mubr.msk.f32.gmra.mxu1 %vm3177_vm8, %v2949_v7  ;;  %v2959_v62 = vpop.f32.mrf.mxu0  ;;  %v6002_v7 = vld [vmem:[%s10401_s8 + $0x1e0] sm:$0xff] }
 0x4d2   :  { %6496 = vmatpush3.msra.mxu0 %v8975_v32  ;;  %3421 = vmatprep.mubr.f32.mxu1 %v10563_v34  ;;  %v3137_v47 = vpop.f32.mrf.mxu1 }
 0x4d3   :  { %6497 = vmatprep.subr.mxu0 %v8983_v57  ;;  %5973 = vmatmul.mubr.msk.f32.gmra.mxu0 %vm3177_vm8, %v6478_v24  ;;  %v6448_v14 = vpop.f32.mrf.mxu0  ;;  %v6005_v24 = vld [vmem:[%s10401_s8 + $0x1f8] sm:$0xff] }
 0x4d4   :  { %6498 = vmatpush3.msra.mxu0 %v8983_v57  ;;  %3290 = vmatprep.mubr.f32.mxu0 %v10563_v34 }
 0x4d5   :  { %6499 = vmatprep.subr.mxu0 %v8991_v37  ;;  %5981 = vmatmul.mubr.msk.f32.gmra.mxu1 %vm3177_vm8, %v6442_v12  ;;  %v2969_v50 = vpop.f32.mrf.mxu0  ;;  %v6004_v12 = vld [vmem:[%s10401_s8 + $0x1f0] sm:$0xff] }
 0x4d6   :  { %6500 = vmatpush3.msra.mxu0 %v8991_v37  ;;  %3427 = vmatprep.mubr.f32.mxu1 %v10563_v34 }
 0x4d7   :  { %6501 = vmatprep.subr.mxu0 %v8999_v0  ;;  %5974 = vmatmul.mubr.msk.f32.gmra.mxu0 %vm3177_vm8, %v3127_v10 }
 0x4d8   :  { %6502 = vmatpush3.msra.mxu0 %v8999_v0  ;;  %3296 = vmatprep.mubr.f32.mxu0 %v10563_v34 }
 0x4d9   :  { %6503 = vmatprep.subr.mxu0 %v9005_v18  ;;  %5982 = vmatmul.mubr.msk.f32.gmra.mxu1 %vm3177_vm8, %v2959_v62 }
 0x4da   :  { %6504 = vmatpush3.msra.mxu0 %v9005_v18  ;;  %3433 = vmatprep.mubr.f32.mxu1 %v10563_v34 }
 0x4db   :  { %6505 = vmatprep.subr.mxu0 %v9011_v41  ;;  %5975 = vmatmul.mubr.msk.f32.gmra.mxu0 %vm3177_vm8, %v6481_v39  ;;  %v6085_v39 = vld [vmem:[%s10401_s8 + $0x3b8] sm:$0xff] }
 0x4dc   :  { %6506 = vmatpush3.msra.mxu0 %v9011_v41  ;;  %3302 = vmatprep.mubr.f32.mxu0 %v10563_v34 }
 0x4dd   :  { %6507 = vmatprep.subr.mxu0 %v9020_v48  ;;  %5983 = vmatmul.mubr.msk.f32.gmra.mxu1 %vm3177_vm8, %v6445_v59 }
 0x4de   :  { %6508 = vmatpush3.msra.mxu0 %v9020_v48  ;;  %3439 = vmatprep.mubr.f32.mxu1 %v10563_v34 }
 0x4df   :  { %6521 = vmatprep.subr.mxu0 %v8946_v42  ;;  %5976 = vmatmul.mubr.msk.f32.gmra.mxu0 %vm3177_vm8, %v3137_v47 }
 0x4e0   :  { %3308 = vmatprep.mubr.f32.mxu0 %v10563_v34 }
 0x4e1   :  { %5984 = vmatmul.mubr.msk.f32.gmra.mxu1 %vm3177_vm8, %v2969_v50 }
 0x4e2   :  { %3445 = vmatprep.mubr.f32.mxu1 %v10563_v34 }
 0x4e3   :  { %5977 = vmatmul.mubr.msk.f32.gmra.mxu0 %vm3177_vm8, %v6484_v63 }
 0x4e4   :  { %6509 = vmatprep.mubr.msk.f32.mxu0 %vm2848_vm7, %v5986_v26 }
 0x4e5   :  { %5985 = vmatmul.mubr.msk.f32.gmra.mxu1 %vm3177_vm8, %v6448_v14 }
 0x4e6   :  { %3709 = vmatprep.mubr.f32.mxu1 %v10563_v34 }
 0x4e7   :  { %6510 = vmatmul.mubr.msk.f32.vlgmr.msra.gmra.mxu0 %vm2848_vm7, %v5987_v8 }
 0x4e8   :  { %6522 = vmatpush3.msra.mxu0 %v8946_v42  ;;  %6512 = vmatprep.mubr.msk.f32.mxu0 %vm2848_vm7, %v5988_v49 }
 0x4e9   :  { %6523 = vmatprep.subr.mxu0 %v8948_v2 }
 0x4ea   :  { %6524 = vmatpush3.msra.mxu0 %v8948_v2 }
 0x4eb   :  { %6525 = vmatprep.subr.mxu0 %v8954_v60  ;;  %6513 = vmatmul.mubr.msk.f32.gmra.mxu0 %vm2848_vm7, %v5989_v56 }
 0x4ec   :  { %6526 = vmatpush3.msra.mxu0 %v8954_v60  ;;  %6515 = vmatprep.mubr.msk.f32.mxu0 %vm2848_vm7, %v5990_v13 }
 0x4ed   :  { %6527 = vmatprep.subr.mxu0 %v8961_v40 }
 0x4ee   :  { %6528 = vmatpush3.msra.mxu0 %v8961_v40 }
 0x4ef   :  { %6529 = vmatprep.subr.mxu0 %v8968_v4  ;;  %6516 = vmatmul.mubr.msk.f32.gmra.mxu0 %vm2848_vm7, %v5991_v28 }
 0x4f0   :  { %6530 = vmatpush3.msra.mxu0 %v8968_v4  ;;  %6518 = vmatprep.mubr.msk.f32.mxu0 %vm2848_vm7, %v5992_v11 }
 0x4f1   :  { %6531 = vmatprep.subr.mxu0 %v8975_v32 }
 0x4f2   :  { %6532 = vmatpush3.msra.mxu0 %v8975_v32 }
 0x4f3   :  { %6533 = vmatprep.subr.mxu0 %v8983_v57  ;;  %6519 = vmatmul.mubr.msk.f32.gmra.mxu0 %vm2848_vm7, %v5993_v1 }
 0x4f4   :  { %6534 = vmatpush3.msra.mxu0 %v8983_v57  ;;  %6545 = vmatprep.mubr.msk.f32.mxu0 %vm2848_vm7, %v6040_v16 }
 0x4f5   :  { %6535 = vmatprep.subr.mxu0 %v8991_v37 }
 0x4f6   :  { %6536 = vmatpush3.msra.mxu0 %v8991_v37 }
 0x4f7   :  { %6537 = vmatprep.subr.mxu0 %v8999_v0 }
 0x4f8   :  { %6538 = vmatpush3.msra.mxu0 %v8999_v0 }
 0x4f9   :  { %6539 = vmatprep.subr.mxu0 %v9005_v18 }
 0x4fa   :  { %6540 = vmatpush3.msra.mxu0 %v9005_v18 }
 0x4fb   :  { %6541 = vmatprep.subr.mxu0 %v9011_v41 }
 0x4fc   :  { %6542 = vmatpush3.msra.mxu0 %v9011_v41 }
 0x4fd   :  { %6543 = vmatprep.subr.mxu0 %v9020_v48 }
 0x4fe   :  { %6544 = vmatpush3.msra.mxu0 %v9020_v48 }
 0x4ff   :  { %6557 = vmatprep.subr.mxu0 %v8946_v42  ;;  %6546 = vmatmul.mubr.msk.f32.vlgmr.msra.gmra.mxu0 %vm2848_vm7, %v6041_v31 }
 0x500   :  { %6558 = vmatpush3.msra.mxu0 %v8946_v42  ;;  %6548 = vmatprep.mubr.msk.f32.mxu0 %vm2848_vm7, %v6042_v36  ;;  %v6045_v42 = vld [vmem:[%s10400_s7 + $0xe8] sm:$0xff] }
 0x501   :  { %6559 = vmatprep.subr.mxu0 %v8948_v2 }
 0x502   :  { %6560 = vmatpush3.msra.mxu0 %v8948_v2  ;;  %v6047_v2 = vld [vmem:[%s10400_s7 + $0xf8] sm:$0xff] }
 0x503   :  { %6561 = vmatprep.subr.mxu0 %v8954_v60  ;;  %6549 = vmatmul.mubr.msk.f32.gmra.mxu0 %vm2848_vm7, %v6043_v52 }
 0x504   :  { %6562 = vmatpush3.msra.mxu0 %v8954_v60  ;;  %6551 = vmatprep.mubr.msk.f32.mxu0 %vm2848_vm7, %v6044_v27  ;;  %v6094_v60 = vld [vmem:[%s10400_s7 + $0x100] sm:$0xff] }
 0x505   :  { %6563 = vmatprep.subr.mxu0 %v8961_v40 }
 0x506   :  { %6564 = vmatpush3.msra.mxu0 %v8961_v40  ;;  %v6031_v40 = vld [vmem:[%s10401_s8 + $0x2c8] sm:$0xff] }
 0x507   :  { %6565 = vmatprep.subr.mxu0 %v8968_v4  ;;  %6552 = vmatmul.mubr.msk.f32.gmra.mxu0 %vm2848_vm7, %v6045_v42 }
 0x508   :  { %6566 = vmatpush3.msra.mxu0 %v8968_v4  ;;  %6554 = vmatprep.mubr.msk.f32.mxu0 %vm2848_vm7, %v6046_v38  ;;  %v6030_v4 = vld [vmem:[%s10401_s8 + $0x2c0] sm:$0xff] }
 0x509   :  { %6567 = vmatprep.subr.mxu0 %v8975_v32  ;;  %3647 = vmatprep.subr.mxu1 %v6031_v40 }
 0x50a   :  { %6568 = vmatpush3.msra.mxu0 %v8975_v32  ;;  %v6029_v32 = vld [vmem:[%s10401_s8 + $0x2b8] sm:$0xff]  ;;  %3648 = vmatpush1.msra.mxu1 %v6030_v4 }
 0x50b   :  { %6569 = vmatprep.subr.mxu0 %v8983_v57  ;;  %6555 = vmatmul.mubr.msk.f32.gmra.mxu0 %vm2848_vm7, %v6047_v2 }
 0x50c   :  { %6570 = vmatpush3.msra.mxu0 %v8983_v57  ;;  %6581 = vmatprep.mubr.msk.f32.mxu0 %vm2848_vm7, %v6094_v60  ;;  %v6028_v57 = vld [vmem:[%s10401_s8 + $0x2b0] sm:$0xff] }
 0x50d   :  { %6571 = vmatprep.subr.mxu0 %v8991_v37  ;;  %3649 = vmatprep.subr.mxu1 %v6029_v32 }
 0x50e   :  { %6572 = vmatpush3.msra.mxu0 %v8991_v37  ;;  %3650 = vmatpush1.msra.mxu1 %v6028_v57  ;;  %v6026_v37 = vld [vmem:[%s10401_s8 + $0x2a0] sm:$0xff] }
 0x50f   :  { %6573 = vmatprep.subr.mxu0 %v8999_v0  ;;  %3651 = vmatprep.subr.mxu1 %v6027_v22 }
 0x510   :  { %6574 = vmatpush3.msra.mxu0 %v8999_v0  ;;  %3652 = vmatpush1.msra.mxu1 %v6026_v37  ;;  %v6024_v0 = vld [vmem:[%s10401_s8 + $0x290] sm:$0xff] }
 0x511   :  { %6575 = vmatprep.subr.mxu0 %v9005_v18  ;;  %3653 = vmatprep.subr.mxu1 %v6025_v35 }
 0x512   :  { %6576 = vmatpush3.msra.mxu0 %v9005_v18  ;;  %3654 = vmatpush1.msra.mxu1 %v6024_v0  ;;  %v6096_v18 = vld [vmem:[%s10400_s7 + $0x110] sm:$0xff] }
 0x513   :  { %6577 = vmatprep.subr.mxu0 %v9011_v41  ;;  %3655 = vmatprep.subr.mxu1 %v6023_v33 }
 0x514   :  { %6578 = vmatpush3.msra.mxu0 %v9011_v41  ;;  %v6021_v41 = vld [vmem:[%s10401_s8 + $0x278] sm:$0xff]  ;;  %3656 = vmatpush1.msra.mxu1 %v6022_v46 }
 0x515   :  { %6579 = vmatprep.subr.mxu0 %v9020_v48  ;;  %3657 = vmatprep.subr.mxu1 %v6021_v41 }
 0x516   :  { %6580 = vmatpush3.msra.mxu0 %v9020_v48  ;;  %3658 = vmatpush1.msra.mxu1 %v6020_v44  ;;  %v6098_v48 = vld [vmem:[%s10400_s7 + $0x120] sm:$0xff] }
 0x517   :  { %6582 = vmatmul.mubr.msk.f32.vlgmr.msra.gmra.mxu0 %vm2848_vm7, %v6095_v23  ;;  %3659 = vmatprep.subr.mxu1 %v6019_v58 }
 0x518   :  { %6584 = vmatprep.mubr.msk.f32.mxu0 %vm2848_vm7, %v6096_v18  ;;  %4491 = vmatprep.subr.mxu0 %v10563_v34 }
 0x519   :  { %3660 = vmatpush1.msra.mxu1 %v6018_v21 }
 0x51a   :  { %3661 = vmatprep.subr.mxu1 %v6017_v20 }
 0x51b   :  { %6585 = vmatmul.mubr.msk.f32.gmra.mxu0 %vm2848_vm7, %v6097_v43  ;;  %3662 = vmatpush1.msra.mxu1 %v6016_v55 }
 0x51c   :  { %6587 = vmatprep.mubr.msk.f32.mxu0 %vm2848_vm7, %v6098_v48  ;;  %3663 = vmatprep.subr.mxu1 %v6015_v51 }
 0x51d   :  { %3664 = vmatpush1.msra.mxu1 %v6014_v45  ;;  %v6084_v45 = vld [vmem:[%s10401_s8 + $0x3b0] sm:$0xff] }
 0x51e   :  { %3665 = vmatprep.subr.mxu1 %v6013_v5 }
 0x51f   :  { %6588 = vmatmul.mubr.msk.f32.gmra.mxu0 %vm2848_vm7, %v6099_v54  ;;  %3666 = vmatpush1.msra.mxu1 %v6012_v15  ;;  %v6083_v15 = vld [vmem:[%s10401_s8 + $0x3a8] sm:$0xff] }
 0x520   :  { %6590 = vmatprep.mubr.msk.f32.mxu0 %vm2848_vm7, %v6100_v3  ;;  %3667 = vmatprep.subr.mxu1 %v6011_v9  ;;  %v6082_v9 = vld [vmem:[%s10401_s8 + $0x3a0] sm:$0xff] }
 0x521   :  { %3668 = vmatpush1.msra.mxu1 %v6010_v30  ;;  %v6080_v30 = vld [vmem:[%s10401_s8 + $0x390] sm:$0xff] }
 0x522   :  { %3669 = vmatprep.subr.mxu1 %v6009_v17 }
 0x523   :  { %6591 = vmatmul.mubr.msk.f32.gmra.mxu0 %vm2848_vm7, %v6101_v61  ;;  %3670 = vmatpush1.msra.mxu1 %v6008_v6  ;;  %v6081_v61 = vld [vmem:[%s10401_s8 + $0x398] sm:$0xff]  ;;  %v6079_v6 = vld [vmem:[%s10401_s8 + $0x388] sm:$0xff] }
 0x524   :  { %3671 = vmatprep.subr.mxu1 %v6007_v29  ;;  %v6078_v29 = vld [vmem:[%s10401_s8 + $0x380] sm:$0xff] }
 0x525   :  { %3672 = vmatpush1.msra.mxu1 %v6006_v53  ;;  %v6077_v53 = vld [vmem:[%s10401_s8 + $0x378] sm:$0xff] }
 0x526   :  { %3673 = vmatprep.subr.mxu1 %v6005_v24  ;;  %v6076_v24 = vld [vmem:[%s10401_s8 + $0x370] sm:$0xff] }
 0x527   :  { %3674 = vmatpush1.msra.mxu1 %v6004_v12 }
 0x528   :  { %3675 = vmatprep.subr.mxu1 %v6003_v25  ;;  %v6075_v25 = vld [vmem:[%s10401_s8 + $0x368] sm:$0xff] }
 0x529   :  { %3676 = vmatpush1.msra.mxu1 %v6002_v7  ;;  %v6074_v7 = vld [vmem:[%s10401_s8 + $0x360] sm:$0xff] }
 0x52a   :  { %3969 = vmatprep.subr.mxu1 %v6085_v39  ;;  %v6073_v39 = vld [vmem:[%s10401_s8 + $0x358] sm:$0xff] }
 0x587   :  { %v3268_v59 = vpop.f32.mrf.mxu0 }
 0x589   :  { %v3270_v10 = vpop.f32.mrf.mxu0  ;;  %v3405_v62 = vpop.f32.mrf.mxu1 }
 0x58a   :  { %v9561_v63 = vadd.f32 %v3405_v62, %v3268_v59  ;;  %v6072_v59 = vld [vmem:[%s10401_s8 + $0x350] sm:$0xff]  ;;  %v6071_v62 = vld [vmem:[%s10401_s8 + $0x348] sm:$0xff] }
 0x58b   :  { %v3274_v14 = vpop.f32.mrf.mxu0  ;;  %v3407_v47 = vpop.f32.mrf.mxu1 }
 0x58c   :  { %v9563_v50 = vadd.f32 %v3407_v47, %v3270_v10  ;;  %v6069_v47 = vld [vmem:[%s10401_s8 + $0x338] sm:$0xff] }
 0x58d   :  { %v3276_v26 = vpop.f32.mrf.mxu0  ;;  %v3411_v8 = vpop.f32.mrf.mxu1 }
 0x58e   :  { %v9565_v49 = vadd.f32 %v3411_v8, %v3274_v14  ;;  %v6070_v14 = vld [vmem:[%s10401_s8 + $0x340] sm:$0xff] }
 0x58f   :  { %v3280_v56 = vpop.f32.mrf.mxu0  ;;  %v3413_v13 = vpop.f32.mrf.mxu1 }
 0x590   :  { %v9567_v28 = vadd.f32 %v3413_v13, %v3276_v26  ;;  %v6068_v26 = vld [vmem:[%s10401_s8 + $0x330] sm:$0xff]  ;;  %v6066_v13 = vld [vmem:[%s10401_s8 + $0x320] sm:$0xff] }
 0x591   :  { %v3282_v11 = vpop.f32.mrf.mxu0  ;;  %v3417_v1 = vpop.f32.mrf.mxu1 }
 0x592   :  { %v9569_v16 = vadd.f32 %v3417_v1, %v3280_v56  ;;  %v6067_v56 = vld [vmem:[%s10401_s8 + $0x328] sm:$0xff]  ;;  %v6064_v1 = vld [vmem:[%s10401_s8 + $0x310] sm:$0xff] }
 0x593   :  { %v3286_v31 = vpop.f32.mrf.mxu0  ;;  %v3419_v36 = vpop.f32.mrf.mxu1 }
 0x594   :  { %v9571_v52 = vadd.f32 %v3419_v36, %v3282_v11  ;;  %v6065_v11 = vld [vmem:[%s10401_s8 + $0x318] sm:$0xff]  ;;  %v6063_v36 = vld [vmem:[%s10401_s8 + $0x308] sm:$0xff] }
 0x595   :  { %v3288_v27 = vpop.f32.mrf.mxu0  ;;  %v3423_v42 = vpop.f32.mrf.mxu1 }
 0x596   :  { %v9573_v38 = vadd.f32 %v3423_v42, %v3286_v31  ;;  %v6061_v42 = vld [vmem:[%s10401_s8 + $0x2f8] sm:$0xff] }
 0x597   :  { %v3292_v2 = vpop.f32.mrf.mxu0  ;;  %v3425_v60 = vpop.f32.mrf.mxu1 }
 0x598   :  { %v9575_v40 = vadd.f32 %v3425_v60, %v3288_v27  ;;  %v6062_v27 = vld [vmem:[%s10401_s8 + $0x300] sm:$0xff] }
 0x599   :  { %v3294_v4 = vpop.f32.mrf.mxu0  ;;  %v3429_v32 = vpop.f32.mrf.mxu1 }
 0x59a   :  { %v9577_v57 = vadd.f32 %v3429_v32, %v3292_v2  ;;  %v6060_v2 = vld [vmem:[%s10401_s8 + $0x2f0] sm:$0xff]  ;;  %v6058_v32 = vld [vmem:[%s10401_s8 + $0x2e0] sm:$0xff] }
 0x59b   :  { %v3298_v22 = vpop.f32.mrf.mxu0  ;;  %v3431_v37 = vpop.f32.mrf.mxu1 }
 0x59c   :  { %v9579_v35 = vadd.f32 %v3431_v37, %v3294_v4  ;;  %v6059_v4 = vld [vmem:[%s10401_s8 + $0x2e8] sm:$0xff]  ;;  %v6056_v37 = vld [vmem:[%s10401_s8 + $0x2d0] sm:$0xff] }
 0x59d   :  { %v3300_v0 = vpop.f32.mrf.mxu0  ;;  %v3435_v33 = vpop.f32.mrf.mxu1 }
 0x59e   :  { %v9581_v23 = vadd.f32 %v3435_v33, %v3298_v22  ;;  %v6057_v22 = vld [vmem:[%s10401_s8 + $0x2d8] sm:$0xff]  ;;  %v6139_v33 = vld [vmem:[%s10401_s8 + $0x4a8] sm:$0xff] }
 0x59f   :  { %v3304_v18 = vpop.f32.mrf.mxu0  ;;  %v3437_v46 = vpop.f32.mrf.mxu1 }
 0x5a0   :  { %v9583_v41 = vadd.f32 %v3437_v46, %v3300_v0 }
 0x5a1   :  { %v3306_v44 = vpop.f32.mrf.mxu0  ;;  %v3441_v58 = vpop.f32.mrf.mxu1 }
 0x5a2   :  { %v9585_v43 = vadd.f32 %v3441_v58, %v3304_v18  ;;  %v6138_v18 = vld [vmem:[%s10401_s8 + $0x4a0] sm:$0xff]  ;;  %v6136_v58 = vld [vmem:[%s10401_s8 + $0x490] sm:$0xff] }
 0x5a3   :  { %v3310_v48 = vpop.f32.mrf.mxu0  ;;  %v3443_v21 = vpop.f32.mrf.mxu1 }
 0x5a4   :  { %v9587_v20 = vadd.f32 %v3443_v21, %v3306_v44  ;;  %v6137_v44 = vld [vmem:[%s10401_s8 + $0x498] sm:$0xff]  ;;  %v6134_v21 = vld [vmem:[%s10401_s8 + $0x480] sm:$0xff] }
 0x5a5   :  { %v9589_v55 = vpop.f32.mrf.mxu0  ;;  %v3447_v51 = vpop.f32.mrf.mxu1 }
 0x5a6   :  { %v9591_v54 = vadd.f32 %v3447_v51, %v3310_v48  ;;  %v6135_v48 = vld [vmem:[%s10401_s8 + $0x488] sm:$0xff] }
 0x5a7   :  { %v6511_v3 = vpop.f32.mrf.mxu0 }
 0x5a9   :  { %v3551_v5 = vpop.f32.mrf.mxu0 }
 0x5aa   :  { %6032 = vmatmul.mubr.msk.f32.vlgmr.msra.gmra.mxu1 %vm3177_vm8, %v3551_v5  ;;  %v6131_v5 = vld [vmem:[%s10401_s8 + $0x468] sm:$0xff] }
 0x5ab   :  { %3715 = vmatprep.mubr.f32.mxu1 %v10563_v34  ;;  %3970 = vmatpush1.msra.mxu1 %v6084_v45  ;;  %v6514_v17 = vpop.f32.mrf.mxu0  ;;  %v6132_v45 = vld [vmem:[%s10401_s8 + $0x470] sm:$0xff] }
 0x5ac   :  { %3971 = vmatprep.subr.mxu1 %v6083_v15  ;;  %v6130_v15 = vld [vmem:[%s10401_s8 + $0x460] sm:$0xff] }
 0x5ad   :  { %3972 = vmatpush1.msra.mxu1 %v6082_v9  ;;  %v3561_v12 = vpop.f32.mrf.mxu0 }
 0x5ae   :  { %6033 = vmatmul.mubr.msk.f32.gmra.mxu1 %vm3177_vm8, %v6511_v3  ;;  %3973 = vmatprep.subr.mxu1 %v6081_v61  ;;  %v6133_v3 = vld [vmem:[%s10401_s8 + $0x478] sm:$0xff] }
 0x5af   :  { %3721 = vmatprep.mubr.f32.mxu1 %v10563_v34  ;;  %3974 = vmatpush1.msra.mxu1 %v6080_v30  ;;  %v6517_v10 = vpop.f32.mrf.mxu0  ;;  %v6129_v61 = vld [vmem:[%s10401_s8 + $0x458] sm:$0xff]  ;;  %v6128_v30 = vld [vmem:[%s10401_s8 + $0x450] sm:$0xff] }
 0x5b0   :  { %3975 = vmatprep.subr.mxu1 %v6079_v6  ;;  %v6126_v6 = vld [vmem:[%s10401_s8 + $0x440] sm:$0xff] }
 0x5b1   :  { %3976 = vmatpush1.msra.mxu1 %v6078_v29  ;;  %v3571_v8 = vpop.f32.mrf.mxu0 }
 0x5b2   :  { %6034 = vmatmul.mubr.msk.f32.gmra.mxu1 %vm3177_vm8, %v3561_v12  ;;  %3977 = vmatprep.subr.mxu1 %v6077_v53  ;;  %v6125_v53 = vld [vmem:[%s10401_s8 + $0x438] sm:$0xff]  ;;  %v6123_v12 = vld [vmem:[%s10401_s8 + $0x428] sm:$0xff] }
 0x5b3   :  { %3727 = vmatprep.mubr.f32.mxu1 %v10563_v34  ;;  %3978 = vmatpush1.msra.mxu1 %v6076_v24  ;;  %v6520_v31 = vpop.f32.mrf.mxu0  ;;  %v6124_v24 = vld [vmem:[%s10401_s8 + $0x430] sm:$0xff] }
 0x5b4   :  { %3979 = vmatprep.subr.mxu1 %v6075_v25  ;;  %v6122_v25 = vld [vmem:[%s10401_s8 + $0x420] sm:$0xff] }
 0x5b5   :  { %3980 = vmatpush1.msra.mxu1 %v6074_v7  ;;  %v3581_v60 = vpop.f32.mrf.mxu0 }
 0x5b6   :  { %6035 = vmatmul.mubr.msk.f32.gmra.mxu1 %vm3177_vm8, %v6514_v17  ;;  %3981 = vmatprep.subr.mxu1 %v6073_v39  ;;  %v6127_v17 = vld [vmem:[%s10401_s8 + $0x448] sm:$0xff]  ;;  %v6121_v39 = vld [vmem:[%s10401_s8 + $0x418] sm:$0xff] }
 0x5b7   :  { %3733 = vmatprep.mubr.f32.mxu1 %v10563_v34  ;;  %3982 = vmatpush1.msra.mxu1 %v6072_v59  ;;  %v6120_v59 = vld [vmem:[%s10401_s8 + $0x410] sm:$0xff] }
 0x5b8   :  { %3983 = vmatprep.subr.mxu1 %v6071_v62  ;;  %v6118_v62 = vld [vmem:[%s10401_s8 + $0x400] sm:$0xff] }
 0x5b9   :  { %3984 = vmatpush1.msra.mxu1 %v6070_v14 }
 0x5ba   :  { %6036 = vmatmul.mubr.msk.f32.gmra.mxu1 %vm3177_vm8, %v3571_v8  ;;  %3985 = vmatprep.subr.mxu1 %v6069_v47  ;;  %v6117_v47 = vld [vmem:[%s10401_s8 + $0x3f8] sm:$0xff]  ;;  %v6115_v8 = vld [vmem:[%s10401_s8 + $0x3e8] sm:$0xff] }
 0x5bb   :  { %3739 = vmatprep.mubr.f32.mxu1 %v10563_v34  ;;  %3986 = vmatpush1.msra.mxu1 %v6068_v26  ;;  %v6116_v26 = vld [vmem:[%s10401_s8 + $0x3f0] sm:$0xff] }
 0x5bc   :  { %3987 = vmatprep.subr.mxu1 %v6067_v56  ;;  %v6114_v56 = vld [vmem:[%s10401_s8 + $0x3e0] sm:$0xff] }
 0x5bd   :  { %3988 = vmatpush1.msra.mxu1 %v6066_v13 }
 0x5be   :  { %6037 = vmatmul.mubr.msk.f32.gmra.mxu1 %vm3177_vm8, %v6517_v10  ;;  %3989 = vmatprep.subr.mxu1 %v6065_v11  ;;  %v6119_v10 = vld [vmem:[%s10401_s8 + $0x408] sm:$0xff]  ;;  %v6113_v11 = vld [vmem:[%s10401_s8 + $0x3d8] sm:$0xff] }
 0x5bf   :  { %3745 = vmatprep.mubr.f32.mxu1 %v10563_v34  ;;  %3990 = vmatpush1.msra.mxu1 %v6064_v1  ;;  %v6547_v0 = vpop.f32.mrf.mxu0  ;;  %v6112_v1 = vld [vmem:[%s10401_s8 + $0x3d0] sm:$0xff] }
 0x5c0   :  { %3991 = vmatprep.subr.mxu1 %v6063_v36  ;;  %v6110_v36 = vld [vmem:[%s10401_s8 + $0x3c0] sm:$0xff] }
 0x5c1   :  { %3992 = vmatpush1.msra.mxu1 %v6062_v27  ;;  %v3873_v46 = vpop.f32.mrf.mxu0 }
 0x5c2   :  { %6038 = vmatmul.mubr.msk.f32.gmra.mxu1 %vm3177_vm8, %v3581_v60  ;;  %3993 = vmatprep.subr.mxu1 %v6061_v42 }
 0x5c3   :  { %3751 = vmatprep.mubr.f32.mxu1 %v10563_v34  ;;  %3994 = vmatpush1.msra.mxu1 %v6060_v2  ;;  %v6550_v51 = vpop.f32.mrf.mxu0 }
 0x5c4   :  { %3995 = vmatprep.subr.mxu1 %v6059_v4 }
 0x5c5   :  { %3996 = vmatpush1.msra.mxu1 %v6058_v32  ;;  %v3883_v9 = vpop.f32.mrf.mxu0 }
 0x5c6   :  { %6039 = vmatmul.mubr.msk.f32.gmra.mxu1 %vm3177_vm8, %v6520_v31  ;;  %3997 = vmatprep.subr.mxu1 %v6057_v22  ;;  %v6111_v31 = vld [vmem:[%s10401_s8 + $0x3c8] sm:$0xff] }
 0x5c7   :  { %3998 = vmatpush1.msra.mxu1 %v6056_v37  ;;  %4031 = vmatprep.mubr.f32.mxu1 %v10563_v34  ;;  %v6553_v29 = vpop.f32.mrf.mxu0 }
 0x5c8   :  { %4291 = vmatprep.subr.mxu1 %v6139_v33  ;;  %v4611_v33 = vld [vmem:[%s10403_s11 + $0x78] sm:$0xff] }
 0x5c9   :  { %v3893_v7 = vpop.f32.mrf.mxu0 }
 0x5ca   :  { %6086 = vmatmul.mubr.msk.f32.vlgmr.msra.gmra.mxu1 %vm3177_vm8, %v3873_v46  ;;  %v4610_v46 = vld [vmem:[%s10403_s11 + $0x70] sm:$0xff] }
 0x5cb   :  { %4037 = vmatprep.mubr.f32.mxu1 %v10563_v34  ;;  %4292 = vmatpush1.msra.mxu1 %v6138_v18  ;;  %v6556_v14 = vpop.f32.mrf.mxu0  ;;  %v4460_v18 = vld [vmem:[%s10402_s10 + $0x70] sm:$0xff] }
 0x5cc   :  { %4293 = vmatprep.subr.mxu1 %v6137_v44  ;;  %v4459_v44 = vld [vmem:[%s10402_s10 + $0x68] sm:$0xff] }
 0x5cd   :  { %4294 = vmatpush1.msra.mxu1 %v6136_v58  ;;  %v3903_v13 = vpop.f32.mrf.mxu0  ;;  %v4609_v58 = vld [vmem:[%s10403_s11 + $0x68] sm:$0xff] }
 0x5ce   :  { %6087 = vmatmul.mubr.msk.f32.gmra.mxu1 %vm3177_vm8, %v6547_v0  ;;  %4295 = vmatprep.subr.mxu1 %v6135_v48  ;;  %v4461_v0 = vld [vmem:[%s10402_s10 + $0x78] sm:$0xff]  ;;  %v4458_v48 = vld [vmem:[%s10402_s10 + $0x60] sm:$0xff] }
 0x5cf   :  { %4043 = vmatprep.mubr.f32.mxu1 %v10563_v34  ;;  %4296 = vmatpush1.msra.mxu1 %v6134_v21  ;;  %v4608_v21 = vld [vmem:[%s10403_s11 + $0x60] sm:$0xff] }
 0x5d0   :  { %4297 = vmatprep.subr.mxu1 %v6133_v3  ;;  %4492 = vmatpush1.msra.mxu0 %v4461_v0  ;;  %v4607_v3 = vld [vmem:[%s10403_s11 + $0x58] sm:$0xff] }
 0x5d1   :  { %4298 = vmatpush1.msra.mxu1 %v6132_v45  ;;  %4493 = vmatprep.subr.mxu0 %v10563_v34  ;;  %v4456_v45 = vld [vmem:[%s10402_s10 + $0x50] sm:$0xff] }
 0x5d2   :  { %6088 = vmatmul.mubr.msk.f32.gmra.mxu1 %vm3177_vm8, %v3883_v9  ;;  %4299 = vmatprep.subr.mxu1 %v6131_v5  ;;  %v4606_v5 = vld [vmem:[%s10403_s11 + $0x50] sm:$0xff]  ;;  %v4605_v9 = vld [vmem:[%s10403_s11 + $0x48] sm:$0xff] }
 0x5d3   :  { %4049 = vmatprep.mubr.f32.mxu1 %v10563_v34  ;;  %4300 = vmatpush1.msra.mxu1 %v6130_v15  ;;  %v4455_v15 = vld [vmem:[%s10402_s10 + $0x48] sm:$0xff] }
 0x5d4   :  { %4301 = vmatprep.subr.mxu1 %v6129_v61  ;;  %4494 = vmatpush1.msra.mxu0 %v4460_v18  ;;  %v4454_v61 = vld [vmem:[%s10402_s10 + $0x40] sm:$0xff] }
 0x5d5   :  { %4302 = vmatpush1.msra.mxu1 %v6128_v30  ;;  %4495 = vmatprep.subr.mxu0 %v10563_v34  ;;  %v4604_v30 = vld [vmem:[%s10403_s11 + $0x40] sm:$0xff] }
 0x5d6   :  { %6089 = vmatmul.mubr.msk.f32.gmra.mxu1 %vm3177_vm8, %v6550_v51  ;;  %4303 = vmatprep.subr.mxu1 %v6127_v17  ;;  %v4457_v51 = vld [vmem:[%s10402_s10 + $0x58] sm:$0xff] }
 0x5d7   :  { %4055 = vmatprep.mubr.f32.mxu1 %v10563_v34  ;;  %4304 = vmatpush1.msra.mxu1 %v6126_v6  ;;  %v6583_v27 = vpop.f32.mrf.mxu0  ;;  %v4453_v17 = vld [vmem:[%s10402_s10 + $0x38] sm:$0xff] }
 0x5d8   :  { %4305 = vmatprep.subr.mxu1 %v6125_v53  ;;  %4496 = vmatpush1.msra.mxu0 %v4459_v44  ;;  %v4603_v6 = vld [vmem:[%s10403_s11 + $0x38] sm:$0xff]  ;;  %v4602_v53 = vld [vmem:[%s10403_s11 + $0x30] sm:$0xff] }
 0x5d9   :  { %4306 = vmatpush1.msra.mxu1 %v6124_v24  ;;  %v4195_v42 = vpop.f32.mrf.mxu0  ;;  %4497 = vmatprep.subr.mxu0 %v10563_v34  ;;  %v4451_v24 = vld [vmem:[%s10402_s10 + $0x28] sm:$0xff] }
 0x5da   :  { %6090 = vmatmul.mubr.msk.f32.gmra.mxu1 %vm3177_vm8, %v3893_v7  ;;  %4307 = vmatprep.subr.mxu1 %v6123_v12  ;;  %v4601_v12 = vld [vmem:[%s10403_s11 + $0x28] sm:$0xff]  ;;  %v4600_v7 = vld [vmem:[%s10403_s11 + $0x20] sm:$0xff] }
 0x5db   :  { %4061 = vmatprep.mubr.f32.mxu1 %v10563_v34  ;;  %4308 = vmatpush1.msra.mxu1 %v6122_v25  ;;  %v6586_v2 = vpop.f32.mrf.mxu0  ;;  %v4450_v25 = vld [vmem:[%s10402_s10 + $0x20] sm:$0xff] }
 0x5dc   :  { %4309 = vmatprep.subr.mxu1 %v6121_v39  ;;  %4498 = vmatpush1.msra.mxu0 %v4458_v48  ;;  %v4449_v39 = vld [vmem:[%s10402_s10 + $0x18] sm:$0xff] }
 0x5dd   :  { %4310 = vmatpush1.msra.mxu1 %v6120_v59  ;;  %v4205_v60 = vpop.f32.mrf.mxu0  ;;  %4499 = vmatprep.subr.mxu0 %v10563_v34  ;;  %v4599_v59 = vld [vmem:[%s10403_s11 + $0x18] sm:$0xff] }
 0x5de   :  { %6091 = vmatmul.mubr.msk.f32.gmra.mxu1 %vm3177_vm8, %v6553_v29  ;;  %4311 = vmatprep.subr.mxu1 %v6119_v10  ;;  %v4452_v29 = vld [vmem:[%s10402_s10 + $0x30] sm:$0xff] }
 0x5df   :  { %4067 = vmatprep.mubr.f32.mxu1 %v10563_v34  ;;  %4312 = vmatpush1.msra.mxu1 %v6118_v62  ;;  %v6589_v4 = vpop.f32.mrf.mxu0  ;;  %v4448_v10 = vld [vmem:[%s10402_s10 + $0x10] sm:$0xff] }
 0x5e0   :  { %4313 = vmatprep.subr.mxu1 %v6117_v47  ;;  %4500 = vmatpush1.msra.mxu0 %v4457_v51  ;;  %v4598_v62 = vld [vmem:[%s10403_s11 + $0x10] sm:$0xff]  ;;  %v4597_v47 = vld [vmem:[%s10403_s11 + $0x8] sm:$0xff] }
 0x5e1   :  { %4314 = vmatpush1.msra.mxu1 %v6116_v26  ;;  %v4215_v32 = vpop.f32.mrf.mxu0  ;;  %4501 = vmatprep.subr.mxu0 %v10563_v34  ;;  %v4446_v26 = vld [vmem:[%s10402_s10] sm:$0xff] }
 0x5e2   :  { %6092 = vmatmul.mubr.msk.f32.gmra.mxu1 %vm3177_vm8, %v3903_v13  ;;  %4315 = vmatprep.subr.mxu1 %v6115_v8  ;;  %v4596_v8 = vld [vmem:[%s10403_s11] sm:$0xff]  ;;  %v4615_v13 = vld [vmem:[%s10403_s11 + $0x98] sm:$0xff] }
 0x5e3   :  { %4073 = vmatprep.mubr.f32.mxu1 %v10563_v34  ;;  %4316 = vmatpush1.msra.mxu1 %v6114_v56  ;;  %v6592_v22 = vpop.f32.mrf.mxu0  ;;  %v4465_v56 = vld [vmem:[%s10402_s10 + $0x98] sm:$0xff] }
 0x5e4   :  { %4317 = vmatprep.subr.mxu1 %v6113_v11  ;;  %4502 = vmatpush1.msra.mxu0 %v4456_v45  ;;  %v4464_v11 = vld [vmem:[%s10402_s10 + $0x90] sm:$0xff] }
 0x5e5   :  { %4318 = vmatpush1.msra.mxu1 %v6112_v1  ;;  %v4225_v37 = vpop.f32.mrf.mxu0  ;;  %4503 = vmatprep.subr.mxu0 %v10563_v34  ;;  %v4614_v1 = vld [vmem:[%s10403_s11 + $0x90] sm:$0xff] }
 0x5e6   :  { %6093 = vmatmul.mubr.msk.f32.gmra.mxu1 %vm3177_vm8, %v6556_v14  ;;  %4319 = vmatprep.subr.mxu1 %v6111_v31  ;;  %v4447_v14 = vld [vmem:[%s10402_s10 + $0x8] sm:$0xff] }
 0x5e7   :  { %4320 = vmatpush1.msra.mxu1 %v6110_v36  ;;  %4353 = vmatprep.mubr.f32.mxu1 %v10563_v34  ;;  %v4463_v31 = vld [vmem:[%s10402_s10 + $0x88] sm:$0xff] }
 0x5e8   :  { %4616 = vmatprep.subr.mxu1 %v10563_v34  ;;  %4504 = vmatpush1.msra.mxu0 %v4455_v15  ;;  %v4613_v36 = vld [vmem:[%s10403_s11 + $0x88] sm:$0xff] }
 0x5e9   :  { %4505 = vmatprep.subr.mxu0 %v10563_v34 }
 0x5ea   :  { %6140 = vmatmul.mubr.msk.f32.vlgmr.msra.gmra.mxu1 %vm3177_vm8, %v4195_v42  ;;  %4506 = vmatpush1.msra.mxu0 %v4454_v61  ;;  %v4612_v42 = vld [vmem:[%s10403_s11 + $0x80] sm:$0xff] }
 0x5eb   :  { %4359 = vmatprep.mubr.f32.mxu1 %v10563_v34  ;;  %4617 = vmatpush1.msra.mxu1 %v4611_v33 }
 0x5ec   :  { %4618 = vmatprep.subr.mxu1 %v10563_v34  ;;  %4507 = vmatprep.subr.mxu0 %v10563_v34 }
 0x5ed   :  { %4619 = vmatpush1.msra.mxu1 %v4610_v46  ;;  %4508 = vmatpush1.msra.mxu0 %v4453_v17 }
 0x5ee   :  { %6141 = vmatmul.mubr.msk.f32.gmra.mxu1 %vm3177_vm8, %v6583_v27  ;;  %4620 = vmatprep.subr.mxu1 %v10563_v34  ;;  %v4462_v27 = vld [vmem:[%s10402_s10 + $0x80] sm:$0xff] }
 0x5ef   :  { %4365 = vmatprep.mubr.f32.mxu1 %v10563_v34  ;;  %4621 = vmatpush1.msra.mxu1 %v4609_v58 }
 0x5f0   :  { %4622 = vmatprep.subr.mxu1 %v10563_v34  ;;  %4509 = vmatprep.subr.mxu0 %v10563_v34 }
 0x5f1   :  { %4623 = vmatpush1.msra.mxu1 %v4608_v21  ;;  %4510 = vmatpush1.msra.mxu0 %v4452_v29 }
 0x5f2   :  { %6142 = vmatmul.mubr.msk.f32.gmra.mxu1 %vm3177_vm8, %v4205_v60  ;;  %4624 = vmatprep.subr.mxu1 %v10563_v34 }
 0x5f3   :  { %4371 = vmatprep.mubr.f32.mxu1 %v10563_v34  ;;  %4625 = vmatpush1.msra.mxu1 %v4607_v3 }
 0x5f4   :  { %4626 = vmatprep.subr.mxu1 %v10563_v34  ;;  %4511 = vmatprep.subr.mxu0 %v10563_v34 }
 0x5f5   :  { %4627 = vmatpush1.msra.mxu1 %v4606_v5  ;;  %4512 = vmatpush1.msra.mxu0 %v4451_v24 }
 0x5f6   :  { %6143 = vmatmul.mubr.msk.f32.gmra.mxu1 %vm3177_vm8, %v6586_v2  ;;  %4628 = vmatprep.subr.mxu1 %v10563_v34  ;;  %v9977_v2 = vpop.f32.mrf.mxu1 }
 0x5f7   :  { %4377 = vmatprep.mubr.f32.mxu1 %v10563_v34  ;;  %4629 = vmatpush1.msra.mxu1 %v4605_v9 }
 0x5f8   :  { %4630 = vmatprep.subr.mxu1 %v10563_v34  ;;  %4513 = vmatprep.subr.mxu0 %v10563_v34 }
 0x5f9   :  { %4631 = vmatpush1.msra.mxu1 %v4604_v30  ;;  %4514 = vmatpush1.msra.mxu0 %v4450_v25 }
 0x5fa   :  { %6144 = vmatmul.mubr.msk.f32.gmra.mxu1 %vm3177_vm8, %v4215_v32  ;;  %4632 = vmatprep.subr.mxu1 %v10563_v34 }
 0x5fb   :  { %4383 = vmatprep.mubr.f32.mxu1 %v10563_v34  ;;  %4633 = vmatpush1.msra.mxu1 %v4603_v6 }
 0x5fc   :  { %4634 = vmatprep.subr.mxu1 %v10563_v34  ;;  %4515 = vmatprep.subr.mxu0 %v10563_v34 }
 0x5fd   :  { %4635 = vmatpush1.msra.mxu1 %v4602_v53  ;;  %4516 = vmatpush1.msra.mxu0 %v4449_v39 }
 0x5fe   :  { %6145 = vmatmul.mubr.msk.f32.gmra.mxu1 %vm3177_vm8, %v6589_v4  ;;  %4636 = vmatprep.subr.mxu1 %v10563_v34 }
 0x5ff   :  { %4389 = vmatprep.mubr.f32.mxu1 %v10563_v34  ;;  %4637 = vmatpush1.msra.mxu1 %v4601_v12 }
 0x600   :  { %4638 = vmatprep.subr.mxu1 %v10563_v34  ;;  %4517 = vmatprep.subr.mxu0 %v10563_v34 }
 0x601   :  { %4639 = vmatpush1.msra.mxu1 %v4600_v7  ;;  %4518 = vmatpush1.msra.mxu0 %v4448_v10 }
 0x602   :  { %6146 = vmatmul.mubr.msk.f32.gmra.mxu1 %vm3177_vm8, %v4225_v37  ;;  %4640 = vmatprep.subr.mxu1 %v10563_v34 }
 0x603   :  { %4395 = vmatprep.mubr.f32.mxu1 %v10563_v34  ;;  %4641 = vmatpush1.msra.mxu1 %v4599_v59 }
 0x604   :  { %4642 = vmatprep.subr.mxu1 %v10563_v34  ;;  %4519 = vmatprep.subr.mxu0 %v10563_v34 }
 0x605   :  { %4643 = vmatpush1.msra.mxu1 %v4598_v62  ;;  %4520 = vmatpush1.msra.mxu0 %v4447_v14 }
 0x606   :  { %6147 = vmatmul.mubr.msk.f32.gmra.mxu1 %vm3177_vm8, %v6592_v22  ;;  %4644 = vmatprep.subr.mxu1 %v10563_v34 }
 0x607   :  { %4645 = vmatpush1.msra.mxu1 %v4597_v47  ;;  %4521 = vmatprep.subr.mxu0 %v10563_v34  ;;  %v4418_v47 = vld [vmem:[%s10404_s9] sm:$0x3] }
 0x608   :  { %4646 = vmatprep.subr.mxu1 %v10563_v34  ;;  %4522 = vmatpush1.msra.mxu0 %v4446_v26 }
 0x609   :  { %4647 = vmatpush1.msra.mxu1 %v4596_v8  ;;  %4547 = vmatprep.subr.mxu0 %v10563_v34 }
 0x60a   :  { %4672 = vmatprep.subr.mxu1 %v10563_v34  ;;  %4548 = vmatpush2.msra.mxu0 %v4465_v56 }
 0x60b   :  { %4673 = vmatpush2.msra.mxu1 %v4615_v13  ;;  %4549 = vmatprep.subr.mxu0 %v10563_v34  ;;  %v10564_v13 = vsub.s32 1, %v8277_v19 }
 0x60c   :  { %4674 = vmatprep.subr.mxu1 %v10563_v34  ;;  %4550 = vmatpush2.msra.mxu0 %v4464_v11 }
 0x60d   :  { %4675 = vmatpush2.msra.mxu1 %v4614_v1  ;;  %4551 = vmatprep.subr.mxu0 %v10563_v34  ;;  %v10018_v11 = vrot.slane %v4418_v47, %v10564_v13 }
 0x60e   :  { %4676 = vmatprep.subr.mxu1 %v10563_v34  ;;  %4552 = vmatpush2.msra.mxu0 %v4463_v31 }
 0x60f   :  { %4677 = vmatpush2.msra.mxu1 %v4613_v36  ;;  %4553 = vmatprep.subr.mxu0 %v10563_v34 }
 0x610   :  { %4678 = vmatprep.subr.mxu1 %v10563_v34  ;;  %4554 = vmatpush2.msra.mxu0 %v4462_v27 }
 0x611   :  { %4679 = vmatpush2.msra.mxu1 %v4612_v42 }
 0x612   :  { %6637 = vmatprep.subr.mxu1 %v10563_v34 }
 0x66a   :  { %v3711_v60 = vpop.f32.mrf.mxu1 }
 0x66b   :  { %v3758_v10 = vadd.f32 %v3711_v60, %v9561_v63  ;;  %v10565_v63 = vsub.s32 0, %v8277_v19 }
 0x66c   :  { %v3713_v4 = vpop.f32.mrf.mxu1 }
 0x66d   :  { %v3759_v14 = vadd.f32 %v3713_v4, %v9563_v50  ;;  %v10023_v36 = vrot.slane %v4418_v47, %v10565_v63 }
 0x66e   :  { %v3717_v32 = vpop.f32.mrf.mxu1 }
 0x66f   :  { %v3760_v1 = vadd.f32 %v3717_v32, %v9565_v49 }
 0x670   :  { %v3719_v22 = vpop.f32.mrf.mxu1 }
 0x671   :  { %v3761_v50 = vadd.f32 %v3719_v22, %v9567_v28 }
 0x672   :  { %v3723_v37 = vpop.f32.mrf.mxu1 }
 0x674   :  { %v3725_v0 = vpop.f32.mrf.mxu1 }
 0x675   :  { %v3763_v19 = vadd.f32 %v3725_v0, %v9571_v52 }
 0x676   :  { %v3729_v33 = vpop.f32.mrf.mxu1 }
 0x678   :  { %v3731_v18 = vpop.f32.mrf.mxu1 }
 0x679   :  { %v3765_v52 = vadd.f32 %v3731_v18, %v9575_v40 }
 0x67a   :  { %v9979_v46 = vpop.f32.mrf.mxu1 }
 0x67c   :  { %v9981_v44 = vpop.f32.mrf.mxu1 }
 0x67d   :  { %v3767_v40 = vadd.f32 %v9981_v44, %v9579_v35 }
 0x67e   :  { %v9983_v58 = vpop.f32.mrf.mxu1 }
 0x680   :  { %v9985_v48 = vpop.f32.mrf.mxu1 }
 0x682   :  { %v9987_v21 = vpop.f32.mrf.mxu1 }
 0x684   :  { %v9989_v51 = vpop.f32.mrf.mxu1 }
 0x686   :  { %v9991_v3 = vpop.f32.mrf.mxu1 }
 0x688   :  { %v9993_v45 = vpop.f32.mrf.mxu1 }
 0x68a   :  { %v4033_v5 = vpop.f32.mrf.mxu1 }
 0x68b   :  { %v4080_v26 = vadd.f32 %v4033_v5, %v3758_v10  ;;  %v3762_v10 = vadd.f32 %v3723_v37, %v9569_v16  ;;  %v3764_v16 = vadd.f32 %v3729_v33, %v9573_v38  ;;  %v3766_v38 = vadd.f32 %v9979_v46, %v9577_v57 }
 0x68c   :  { %v4035_v15 = vpop.f32.mrf.mxu1  ;;  %v3768_v46 = vadd.f32 %v9983_v58, %v9581_v23  ;;  %v3770_v58 = vadd.f32 %v9987_v21, %v9585_v43  ;;  %v3450_v43 = vadd.f32 %v9977_v2, %v9589_v55 }
 0x68d   :  { %v4081_v56 = vadd.f32 %v4035_v15, %v3759_v14 }
 0x68e   :  { %v4039_v9 = vpop.f32.mrf.mxu1 }
 0x68f   :  { %v4082_v60 = vadd.f32 %v4039_v9, %v3760_v1 }
 0x690   :  { %v4041_v61 = vpop.f32.mrf.mxu1 }
 0x691   :  { %v4083_v5 = vadd.f32 %v4041_v61, %v3761_v50  ;;  %v3769_v50 = vadd.f32 %v9985_v48, %v9583_v41 }
 0x692   :  { %v4045_v30 = vpop.f32.mrf.mxu1 }
 0x693   :  { %v4084_v28 = vadd.f32 %v4045_v30, %v3762_v10 }
 0x694   :  { %v4047_v17 = vpop.f32.mrf.mxu1 }
 0x695   :  { %v4085_v9 = vadd.f32 %v4047_v17, %v3763_v19 }
 0x696   :  { %v4051_v6 = vpop.f32.mrf.mxu1 }
 0x697   :  { %v4086_v30 = vadd.f32 %v4051_v6, %v3764_v16 }
 0x698   :  { %v4053_v29 = vpop.f32.mrf.mxu1 }
 0x699   :  { %v4087_v17 = vadd.f32 %v4053_v29, %v3765_v52 }
 0x69a   :  { %v9995_v53 = vpop.f32.mrf.mxu1 }
 0x69b   :  { %v4088_v6 = vadd.f32 %v9995_v53, %v3766_v38 }
 0x69c   :  { %v9997_v24 = vpop.f32.mrf.mxu1 }
 0x69d   :  { %v4089_v63 = vadd.f32 %v9997_v24, %v3767_v40 }
 0x69e   :  { %v9999_v12 = vpop.f32.mrf.mxu1 }
 0x69f   :  { %v4090_v53 = vadd.f32 %v9999_v12, %v3768_v46 }
 0x6a0   :  { %v10001_v25 = vpop.f32.mrf.mxu1 }
 0x6a2   :  { %v10003_v7 = vpop.f32.mrf.mxu1 }
 0x6a3   :  { %v4092_v12 = vadd.f32 %v10003_v7, %v3770_v58 }
 0x6a4   :  { %v10005_v39 = vpop.f32.mrf.mxu1 }
 0x6a6   :  { %v10007_v59 = vpop.f32.mrf.mxu1 }
 0x6a8   :  { %v10010_v62 = vpop.f32.mrf.mxu1 }
 0x6aa   :  { %v4355_v8 = vpop.f32.mrf.mxu1 }
 0x6ab   :  { %v4402_v31 = vadd.f32 %v4355_v8, %v4080_v26 }
 0x6ac   :  { %v4357_v27 = vpop.f32.mrf.mxu1 }
 0x6ad   :  { %v4403_v42 = vadd.f32 %v4357_v27, %v4081_v56  ;;  %v4430_v14 = vadd.f32 %v10023_v36, %v4402_v31 }
 0x6ae   :  { %v4361_v4 = vpop.f32.mrf.mxu1 }
 0x6af   :  { %v4431_v15 = vadd.f32 %v10018_v11, %v4403_v42  ;;  %v4404_v49 = vadd.f32 %v4361_v4, %v4082_v60  ;;  %v4091_v60 = vadd.f32 %v10001_v25, %v3769_v50 }
 0x6b0   :  { %v4363_v32 = vpop.f32.mrf.mxu1 }
 0x6b1   :  { %v4405_v47 = vadd.f32 %v4363_v32, %v4083_v5  ;;  %6148 = vmatprep.mubr.msk.f32.mxu0 %vm4466_vm9, %v4431_v15  ;;  %6156 = vmatprep.mubr.msk.f32.mxu1 %vm4466_vm9, %v4431_v15  ;;  %v4432_v37 = vadd.f32 %v10023_v36, %v4404_v49  ;;  %v3771_v5 = vadd.f32 %v9989_v51, %v9587_v20 }
 0x6b2   :  { %v4367_v22 = vpop.f32.mrf.mxu1  ;;  %4556 = vmatmul.mubr.f32.vlgmr.msra.gmra.mxu0 %v4430_v14  ;;  %4681 = vmatmul.mubr.f32.vlgmr.msra.gmra.mxu1 %v4430_v14  ;;  %v3772_v20 = vadd.f32 %v9991_v3, %v9591_v54  ;;  %v3773_v32 = vadd.f32 %v9993_v45, %v3450_v43  ;;  %v4830_v43 = vld [vmem:[%s10406_s13] sm:$0xff] }
 0x6b3   :  { %v4433_v61 = vadd.f32 %v10018_v11, %v4405_v47  ;;  %v4406_v26 = vadd.f32 %v4367_v22, %v4084_v28  ;;  %v4093_v21 = vadd.f32 %v10005_v39, %v3771_v5 }
 0x6b4   :  { %v4369_v8 = vpop.f32.mrf.mxu1  ;;  %v4094_v55 = vadd.f32 %v10007_v59, %v3772_v20  ;;  %v4095_v39 = vadd.f32 %v10010_v62, %v3773_v32  ;;  %v4729_v62 = vld [vmem:[%s10405_s12] sm:$0xff]  ;;  %v4833_v20 = vld [vmem:[%s10406_s13 + $0x18] sm:$0xff] }
 0x6b5   :  { %v4407_v0 = vadd.f32 %v4369_v8, %v4085_v9  ;;  %6149 = vmatprep.mubr.msk.f32.mxu0 %vm4466_vm9, %v4433_v61  ;;  %6157 = vmatprep.mubr.msk.f32.mxu1 %vm4466_vm9, %v4433_v61  ;;  %v4434_v33 = vadd.f32 %v10023_v36, %v4406_v26 }
 0x6b6   :  { %v4373_v56 = vpop.f32.mrf.mxu1  ;;  %4561 = vmatmul.mubr.f32.gmra.mxu0 %v4432_v37  ;;  %4686 = vmatmul.mubr.f32.gmra.mxu1 %v4432_v37 }
 0x6b7   :  { %v4435_v13 = vadd.f32 %v10018_v11, %v4407_v0  ;;  %v4408_v1 = vadd.f32 %v4373_v56, %v4086_v30 }
 0x6b8   :  { %v4375_v31 = vpop.f32.mrf.mxu1 }
 0x6b9   :  { %v4409_v18 = vadd.f32 %v4375_v31, %v4087_v17  ;;  %6150 = vmatprep.mubr.msk.f32.mxu0 %vm4466_vm9, %v4435_v13  ;;  %6158 = vmatprep.mubr.msk.f32.mxu1 %vm4466_vm9, %v4435_v13  ;;  %v4436_v27 = vadd.f32 %v10023_v36, %v4408_v1 }
 0x6ba   :  { %v4379_v29 = vpop.f32.mrf.mxu1  ;;  %4566 = vmatmul.mubr.f32.gmra.mxu0 %v4434_v33  ;;  %4691 = vmatmul.mubr.f32.gmra.mxu1 %v4434_v33 }
 0x6bb   :  { %v4437_v57 = vadd.f32 %v10018_v11, %v4409_v18  ;;  %v4410_v35 = vadd.f32 %v4379_v29, %v4088_v6 }
 0x6bc   :  { %v4381_v44 = vpop.f32.mrf.mxu1 }
 0x6bd   :  { %v4411_v42 = vadd.f32 %v4381_v44, %v4089_v63  ;;  %6151 = vmatprep.mubr.msk.f32.mxu0 %vm4466_vm9, %v4437_v57  ;;  %6159 = vmatprep.mubr.msk.f32.mxu1 %vm4466_vm9, %v4437_v57  ;;  %v4438_v4 = vadd.f32 %v10023_v36, %v4410_v35 }
 0x6be   :  { %v4385_v24 = vpop.f32.mrf.mxu1  ;;  %4571 = vmatmul.mubr.f32.gmra.mxu0 %v4436_v27  ;;  %4696 = vmatmul.mubr.f32.gmra.mxu1 %v4436_v27 }
 0x6bf   :  { %v4439_v23 = vadd.f32 %v10018_v11, %v4411_v42  ;;  %v4412_v41 = vadd.f32 %v4385_v24, %v4090_v53 }
 0x6c0   :  { %v4387_v48 = vpop.f32.mrf.mxu1 }
 0x6c1   :  { %v4413_v15 = vadd.f32 %v4387_v48, %v4091_v60  ;;  %6152 = vmatprep.mubr.msk.f32.mxu0 %vm4466_vm9, %v4439_v23  ;;  %6160 = vmatprep.mubr.msk.f32.mxu1 %vm4466_vm9, %v4439_v23  ;;  %v4440_v51 = vadd.f32 %v10023_v36, %v4412_v41 }
 0x6c2   :  { %v4391_v25 = vpop.f32.mrf.mxu1  ;;  %4576 = vmatmul.mubr.f32.gmra.mxu0 %v4438_v4  ;;  %4701 = vmatmul.mubr.f32.gmra.mxu1 %v4438_v4 }
 0x6c3   :  { %v4441_v10 = vadd.f32 %v10018_v11, %v4413_v15  ;;  %v4414_v14 = vadd.f32 %v4391_v25, %v4092_v12  ;;  %v4730_v15 = vld [vmem:[%s10405_s12 + $0x8] sm:$0xff]  ;;  %v4731_v12 = vld [vmem:[%s10405_s12 + $0x10] sm:$0xff]  ;;  %v4732_v25 = vld [vmem:[%s10405_s12 + $0x18] sm:$0xff] }
 0x6c4   :  { %v4393_v49 = vpop.f32.mrf.mxu1 }
 0x6c5   :  { %v4415_v7 = vadd.f32 %v4393_v49, %v4093_v21  ;;  %6153 = vmatprep.mubr.msk.f32.mxu0 %vm4466_vm9, %v4441_v10  ;;  %6161 = vmatprep.mubr.msk.f32.mxu1 %vm4466_vm9, %v4441_v10  ;;  %v4442_v3 = vadd.f32 %v10023_v36, %v4414_v14  ;;  %v4831_v21 = vld [vmem:[%s10406_s13 + $0x8] sm:$0xff]  ;;  %v4832_v10 = vld [vmem:[%s10406_s13 + $0x10] sm:$0xff] }
 0x6c6   :  { %v4397_v2 = vpop.f32.mrf.mxu1  ;;  %4581 = vmatmul.mubr.f32.gmra.mxu0 %v4440_v51  ;;  %4706 = vmatmul.mubr.f32.gmra.mxu1 %v4440_v51 }
 0x6c7   :  { %v4443_v54 = vadd.f32 %v10018_v11, %v4415_v7  ;;  %v4416_v19 = vadd.f32 %v4397_v2, %v4094_v55 }
 0x6c8   :  { %v4399_v47 = vpop.f32.mrf.mxu1 }
 0x6c9   :  { %v4417_v28 = vadd.f32 %v4399_v47, %v4095_v39  ;;  %6154 = vmatprep.mubr.msk.f32.mxu0 %vm4466_vm9, %v4443_v54  ;;  %6162 = vmatprep.mubr.msk.f32.mxu1 %vm4466_vm9, %v4443_v54  ;;  %v4444_v59 = vadd.f32 %v10023_v36, %v4416_v19 }
 0x6ca   :  { %4586 = vmatmul.mubr.f32.gmra.mxu0 %v4442_v3  ;;  %4711 = vmatmul.mubr.f32.gmra.mxu1 %v4442_v3 }
 0x6cb   :  { %v4445_v45 = vadd.f32 %v10018_v11, %v4417_v28 }
 0x6cd   :  { %6155 = vmatprep.mubr.msk.f32.mxu0 %vm4466_vm9, %v4445_v45  ;;  %6163 = vmatprep.mubr.msk.f32.mxu1 %vm4466_vm9, %v4445_v45 }
 0x6ce   :  { %4591 = vmatmul.mubr.f32.gmra.mxu0 %v4444_v59  ;;  %4716 = vmatmul.mubr.f32.gmra.mxu1 %v4444_v59 }
 0x6cf   :  { %6609 = vmatprep.mubr.msk.f32.mxu0 %vm2469_vm6, %v4729_v62  ;;  %6645 = vmatprep.mubr.msk.f32.mxu1 %vm6805_vm10, %v10563_v34 }
 0x772   :  { %v4557_v22 = vpop.f32.mrf.mxu0  ;;  %v4682_v9 = vpop.f32.mrf.mxu1 }
 0x773   :  { %v4721_v5 = vmax.f32 %v4557_v22, %v4682_v9  ;;  %v6173_v22 = vld [vmem:[%s10407_s14 + $0x8] sm:$0xff]  ;;  %v4939_v9 = vld [vmem:[%s10407_s14] sm:$0xff] }
 0x774   :  { %v4559_v61 = vpop.f32.mrf.mxu0  ;;  %v4684_v16 = vpop.f32.mrf.mxu1 }
 0x775   :  { %v6184_v61 = vld [vmem:[%s10408_s15 + $0x98] sm:$0xff]  ;;  %v6183_v16 = vld [vmem:[%s10408_s15 + $0x90] sm:$0xff] }
 0x776   :  { %v4562_v37 = vpop.f32.mrf.mxu0  ;;  %v4687_v11 = vpop.f32.mrf.mxu1 }
 0x777   :  { %v4722_v48 = vmax.f32 %v4562_v37, %v4687_v11  ;;  %v6182_v37 = vld [vmem:[%s10408_s15 + $0x88] sm:$0xff]  ;;  %v6181_v11 = vld [vmem:[%s10408_s15 + $0x80] sm:$0xff] }
 0x778   :  { %v4564_v26 = vpop.f32.mrf.mxu0  ;;  %v4689_v36 = vpop.f32.mrf.mxu1 }
 0x779   :  { %v6180_v26 = vld [vmem:[%s10408_s15 + $0x78] sm:$0xff]  ;;  %v6179_v36 = vld [vmem:[%s10408_s15 + $0x70] sm:$0xff] }
 0x77a   :  { %v4567_v8 = vpop.f32.mrf.mxu0  ;;  %v4692_v52 = vpop.f32.mrf.mxu1 }
 0x77b   :  { %v4723_v41 = vmax.f32 %v4567_v8, %v4692_v52  ;;  %v6178_v8 = vld [vmem:[%s10408_s15 + $0x68] sm:$0xff]  ;;  %v6177_v52 = vld [vmem:[%s10408_s15 + $0x60] sm:$0xff] }
 0x77c   :  { %v4569_v0 = vpop.f32.mrf.mxu0  ;;  %v4694_v30 = vpop.f32.mrf.mxu1 }
 0x77d   :  { %v6176_v0 = vld [vmem:[%s10408_s15 + $0x58] sm:$0xff]  ;;  %v6175_v30 = vld [vmem:[%s10408_s15 + $0x50] sm:$0xff] }
 0x77e   :  { %v4572_v56 = vpop.f32.mrf.mxu0  ;;  %v4697_v17 = vpop.f32.mrf.mxu1 }
 0x77f   :  { %v4724_v4 = vmax.f32 %v4572_v56, %v4697_v17  ;;  %v5022_v56 = vld [vmem:[%s10408_s15 + $0x48] sm:$0xff]  ;;  %v5021_v17 = vld [vmem:[%s10408_s15 + $0x40] sm:$0xff] }
 0x780   :  { %v4574_v13 = vpop.f32.mrf.mxu0  ;;  %v4699_v38 = vpop.f32.mrf.mxu1 }
 0x781   :  { %v5020_v13 = vld [vmem:[%s10408_s15 + $0x38] sm:$0xff]  ;;  %v5019_v38 = vld [vmem:[%s10408_s15 + $0x30] sm:$0xff] }
 0x782   :  { %v4577_v33 = vpop.f32.mrf.mxu0  ;;  %v4702_v1 = vpop.f32.mrf.mxu1 }
 0x783   :  { %v4725_v58 = vmax.f32 %v4577_v33, %v4702_v1  ;;  %v5018_v33 = vld [vmem:[%s10408_s15 + $0x28] sm:$0xff]  ;;  %v5017_v1 = vld [vmem:[%s10408_s15 + $0x20] sm:$0xff] }
 0x784   :  { %v4579_v31 = vpop.f32.mrf.mxu0  ;;  %v4704_v40 = vpop.f32.mrf.mxu1 }
 0x785   :  { %v5016_v31 = vld [vmem:[%s10408_s15 + $0x18] sm:$0xff]  ;;  %v5015_v40 = vld [vmem:[%s10408_s15 + $0x10] sm:$0xff] }
 0x786   :  { %v4582_v18 = vpop.f32.mrf.mxu0  ;;  %v4707_v6 = vpop.f32.mrf.mxu1 }
 0x787   :  { %v4726_v23 = vmax.f32 %v4582_v18, %v4707_v6  ;;  %v5014_v18 = vld [vmem:[%s10408_s15 + $0x8] sm:$0xff]  ;;  %v5013_v6 = vld [vmem:[%s10408_s15] sm:$0xff] }
 0x788   :  { %v4584_v29 = vpop.f32.mrf.mxu0  ;;  %v4709_v63 = vpop.f32.mrf.mxu1 }
 0x78a   :  { %v4587_v57 = vpop.f32.mrf.mxu0  ;;  %v4712_v46 = vpop.f32.mrf.mxu1 }
 0x78b   :  { %v4727_v60 = vmax.f32 %v4587_v57, %v4712_v46  ;;  %v6198_v57 = vld [vmem:[%s10408_s15 + $0xe8] sm:$0xff] }
 0x78c   :  { %v4589_v27 = vpop.f32.mrf.mxu0  ;;  %v4714_v35 = vpop.f32.mrf.mxu1 }
 0x78d   :  { %v6197_v27 = vld [vmem:[%s10408_s15 + $0xe0] sm:$0xff] }
 0x78e   :  { %v4592_v44 = vpop.f32.mrf.mxu0  ;;  %v4717_v50 = vpop.f32.mrf.mxu1 }
 0x78f   :  { %v4728_v42 = vmax.f32 %v4592_v44, %v4717_v50  ;;  %v6196_v44 = vld [vmem:[%s10408_s15 + $0xd8] sm:$0xff]  ;;  %v6187_v50 = vld [vmem:[%s10407_s14 + $0x10] sm:$0xff] }
 0x790   :  { %v4594_v53 = vpop.f32.mrf.mxu0  ;;  %v4719_v24 = vpop.f32.mrf.mxu1 }
 0x791   :  { %6593 = vmatprep.subr.mxu0 %v4728_v42  ;;  %v6194_v53 = vld [vmem:[%s10408_s15 + $0xc8] sm:$0xff]  ;;  %v6193_v24 = vld [vmem:[%s10408_s15 + $0xc0] sm:$0xff] }
 0x792   :  { %6594 = vmatpush3.msra.mxu0 %v4728_v42 }
 0x793   :  { %6595 = vmatprep.subr.mxu0 %v4727_v60 }
 0x794   :  { %6596 = vmatpush3.msra.mxu0 %v4727_v60 }
 0x795   :  { %6597 = vmatprep.subr.mxu0 %v4726_v23 }
 0x796   :  { %6598 = vmatpush3.msra.mxu0 %v4726_v23 }
 0x797   :  { %6599 = vmatprep.subr.mxu0 %v4725_v58 }
 0x798   :  { %6600 = vmatpush3.msra.mxu0 %v4725_v58 }
 0x799   :  { %6601 = vmatprep.subr.mxu0 %v4724_v4 }
 0x79a   :  { %6602 = vmatpush3.msra.mxu0 %v4724_v4 }
 0x79b   :  { %6603 = vmatprep.subr.mxu0 %v4723_v41 }
 0x79c   :  { %6604 = vmatpush3.msra.mxu0 %v4723_v41 }
 0x79d   :  { %6605 = vmatprep.subr.mxu0 %v4722_v48 }
 0x79e   :  { %6606 = vmatpush3.msra.mxu0 %v4722_v48 }
 0x79f   :  { %6607 = vmatprep.subr.mxu0 %v4721_v5 }
 0x7a0   :  { %6608 = vmatpush3.msra.mxu0 %v4721_v5 }
 0x7a1   :  { %6615 = vmatprep.subr.mxu0 %v4728_v42  ;;  %6610 = vmatmul.mubr.msk.f32.vlgmr.msra.gmra.mxu0 %vm2469_vm6, %v4730_v15  ;;  %v6190_v15 = vld [vmem:[%s10408_s15 + $0xa8] sm:$0xff] }
 0x7a2   :  { %6616 = vmatpush3.msra.mxu0 %v4728_v42  ;;  %6612 = vmatprep.mubr.msk.f32.mxu0 %vm2469_vm6, %v4731_v12  ;;  %v6195_v42 = vld [vmem:[%s10408_s15 + $0xd0] sm:$0xff]  ;;  %v6207_v12 = vld [vmem:[%s10408_s15 + $0x118] sm:$0xff] }
 0x7a3   :  { %6617 = vmatprep.subr.mxu0 %v4727_v60 }
 0x7a4   :  { %6618 = vmatpush3.msra.mxu0 %v4727_v60  ;;  %v6200_v60 = vld [vmem:[%s10407_s14 + $0x18] sm:$0xff] }
 0x7a5   :  { %6619 = vmatprep.subr.mxu0 %v4726_v23  ;;  %6613 = vmatmul.mubr.msk.f32.gmra.mxu0 %vm2469_vm6, %v4732_v25  ;;  %v6189_v25 = vld [vmem:[%s10408_s15 + $0xa0] sm:$0xff] }
 0x7a6   :  { %6620 = vmatpush3.msra.mxu0 %v4726_v23  ;;  %6631 = vmatprep.mubr.msk.f32.mxu0 %vm2469_vm6, %v4830_v43  ;;  %v6211_v23 = vld [vmem:[%s10408_s15 + $0x138] sm:$0xff]  ;;  %v6206_v43 = vld [vmem:[%s10408_s15 + $0x110] sm:$0xff] }
 0x7a7   :  { %6621 = vmatprep.subr.mxu0 %v4725_v58 }
 0x7a8   :  { %6622 = vmatpush3.msra.mxu0 %v4725_v58  ;;  %v6192_v58 = vld [vmem:[%s10408_s15 + $0xb8] sm:$0xff] }
 0x7a9   :  { %6623 = vmatprep.subr.mxu0 %v4724_v4 }
 0x7aa   :  { %6624 = vmatpush3.msra.mxu0 %v4724_v4  ;;  %v6210_v4 = vld [vmem:[%s10408_s15 + $0x130] sm:$0xff] }
 0x7ab   :  { %6625 = vmatprep.subr.mxu0 %v4723_v41 }
 0x7ac   :  { %6626 = vmatpush3.msra.mxu0 %v4723_v41  ;;  %v6209_v41 = vld [vmem:[%s10408_s15 + $0x128] sm:$0xff] }
 0x7ad   :  { %6627 = vmatprep.subr.mxu0 %v4722_v48 }
 0x7ae   :  { %6628 = vmatpush3.msra.mxu0 %v4722_v48  ;;  %v6191_v48 = vld [vmem:[%s10408_s15 + $0xb0] sm:$0xff] }
 0x7af   :  { %6629 = vmatprep.subr.mxu0 %v4721_v5 }
 0x7b0   :  { %6630 = vmatpush3.msra.mxu0 %v4721_v5  ;;  %v6208_v5 = vld [vmem:[%s10408_s15 + $0x120] sm:$0xff] }
 0x7b1   :  { %6632 = vmatmul.mubr.msk.f32.vlgmr.msra.gmra.mxu0 %vm2469_vm6, %v4831_v21  ;;  %6648 = vmatprep.subr.mxu0 %v10563_v34  ;;  %v6205_v21 = vld [vmem:[%s10408_s15 + $0x108] sm:$0xff] }
 0x7b2   :  { %6634 = vmatprep.mubr.msk.f32.mxu0 %vm2469_vm6, %v4832_v10  ;;  %v6204_v10 = vld [vmem:[%s10408_s15 + $0x100] sm:$0xff] }
 0x7b5   :  { %6635 = vmatmul.mubr.msk.f32.gmra.mxu0 %vm2469_vm6, %v4833_v20  ;;  %v6203_v20 = vld [vmem:[%s10408_s15 + $0xf8] sm:$0xff] }
 0x7b6   :  { %6656 = vmatprep.mubr.msk.f32.mxu0 %vm6805_vm10, %v10563_v34 }
 0x861   :  { %v6611_v51 = vpop.f32.mrf.mxu0 }
 0x863   :  { %v4811_v14 = vpop.f32.mrf.mxu0 }
 0x865   :  { %v6614_v49 = vpop.f32.mrf.mxu0 }
 0x867   :  { %v4821_v32 = vpop.f32.mrf.mxu0 }
 0x871   :  { %v6633_v7 = vpop.f32.mrf.mxu0 }
 0x872   :  { %v4932_v3 = vmax.f32 %v6611_v51, %v6633_v7  ;;  %v6202_v51 = vld [vmem:[%s10408_s15 + $0xf0] sm:$0xff] }
 0x873   :  { %v4912_v55 = vpop.f32.mrf.mxu0 }
 0x874   :  { %v4931_v28 = vmax.f32 %v4811_v14, %v4912_v55  ;;  %v10132_v59 = vmax.f32 %v4932_v3, 0.0 }
 0x875   :  { %v6636_v2 = vpop.f32.mrf.mxu0 }
 0x876   :  { %v4934_v39 = vmax.f32 %v6614_v49, %v6636_v2  ;;  %v10138_v62 = vmax.f32 %v4931_v28, 0.0  ;;  %v5588_v28 = vld [vmem:[%s10409_s17 + $0x20] sm:$0xff] }
 0x877   :  { %v4922_v54 = vpop.f32.mrf.mxu0 }
 0x878   :  { %v10124_v19 = vmax.f32 %v4934_v39, 0.0  ;;  %v4933_v47 = vmax.f32 %v4821_v32, %v4922_v54 }
 0x87a   :  { %v10126_v45 = vmax.f32 %v4933_v47, 0.0  ;;  %6649 = vmatpush3.msra.mxu0 %v10124_v19  ;;  %6638 = vmatpush3.msra.mxu1 %v10124_v19  ;;  %v5589_v47 = vld [vmem:[%s10409_s17 + $0x28] sm:$0xff] }
 0x87b   :  { %6650 = vmatprep.subr.mxu0 %v10563_v34  ;;  %6639 = vmatprep.subr.mxu1 %v10563_v34 }
 0x87c   :  { %6651 = vmatpush3.msra.mxu0 %v10126_v45  ;;  %6640 = vmatpush3.msra.mxu1 %v10126_v45 }
 0x87d   :  { %6652 = vmatprep.subr.mxu0 %v10563_v34  ;;  %6641 = vmatprep.subr.mxu1 %v10563_v34 }
 0x87e   :  { %6653 = vmatpush3.msra.mxu0 %v10132_v59  ;;  %6642 = vmatpush3.msra.mxu1 %v10132_v59 }
 0x87f   :  { %6654 = vmatprep.subr.mxu0 %v10563_v34  ;;  %6643 = vmatprep.subr.mxu1 %v10563_v34 }
 0x880   :  { %6655 = vmatpush3.msra.mxu0 %v10138_v62  ;;  %6644 = vmatpush3.msra.mxu1 %v10138_v62 }
 0x881   :  { %6657 = vmatmul.mubr.msk.f32.vlgmr.msra.gmra.mxu0 %vm4466_vm9, %v6173_v22  ;;  %6646 = vmatmul.mubr.msk.f32.vlgmr.msra.gmra.mxu1 %vm4466_vm9, %v4939_v9  ;;  %v5584_v22 = vld [vmem:[%s10409_s17] sm:$0xff] }
 0x882   :  { %6659 = vmatprep.subr.mxu1 %v10563_v34  ;;  %6679 = vmatprep.mubr.msk.f32.mxu1 %vm6805_vm10, %v10563_v34 }
 0x883   :  { %6660 = vmatpush3.msra.mxu1 %v6184_v61  ;;  %6682 = vmatprep.subr.mxu0 %v10563_v34 }
 0x884   :  { %6661 = vmatprep.subr.mxu1 %v10563_v34  ;;  %6702 = vmatprep.mubr.msk.f32.mxu0 %vm6805_vm10, %v10563_v34 }
 0x885   :  { %6662 = vmatpush3.msra.mxu1 %v6183_v16  ;;  %6683 = vmatpush3.msra.mxu0 %v5022_v56 }
 0x886   :  { %6663 = vmatprep.subr.mxu1 %v10563_v34  ;;  %6684 = vmatprep.subr.mxu0 %v10563_v34 }
 0x887   :  { %6664 = vmatpush3.msra.mxu1 %v6182_v37  ;;  %6685 = vmatpush3.msra.mxu0 %v5021_v17 }
 0x888   :  { %6665 = vmatprep.subr.mxu1 %v10563_v34  ;;  %6686 = vmatprep.subr.mxu0 %v10563_v34 }
 0x889   :  { %6666 = vmatpush3.msra.mxu1 %v6181_v11  ;;  %6687 = vmatpush3.msra.mxu0 %v5020_v13  ;;  %v6213_v11 = vld [vmem:[%s10410_s16] ss:$0 sm:$0xff] }
 0x88a   :  { %6667 = vmatprep.subr.mxu1 %v10563_v34  ;;  %6688 = vmatprep.subr.mxu0 %v10563_v34 }
 0x88b   :  { %6668 = vmatpush3.msra.mxu1 %v6180_v26  ;;  %6689 = vmatpush3.msra.mxu0 %v5019_v38 }
 0x88c   :  { %6669 = vmatprep.subr.mxu1 %v10563_v34  ;;  %6690 = vmatprep.subr.mxu0 %v10563_v34 }
 0x88d   :  { %6670 = vmatpush3.msra.mxu1 %v6179_v36  ;;  %6691 = vmatpush3.msra.mxu0 %v5018_v33 }
 0x88e   :  { %6671 = vmatprep.subr.mxu1 %v10563_v34  ;;  %6692 = vmatprep.subr.mxu0 %v10563_v34 }
 0x88f   :  { %6672 = vmatpush3.msra.mxu1 %v6178_v8  ;;  %6693 = vmatpush3.msra.mxu0 %v5017_v1 }
 0x890   :  { %6673 = vmatprep.subr.mxu1 %v10563_v34  ;;  %6694 = vmatprep.subr.mxu0 %v10563_v34 }
 0x891   :  { %6674 = vmatpush3.msra.mxu1 %v6177_v52  ;;  %6695 = vmatpush3.msra.mxu0 %v5016_v31  ;;  %v6214_v52 = vld [vmem:[%s10411_s18] ss:$0 sm:$0xff] }
 0x892   :  { %6675 = vmatprep.subr.mxu1 %v10563_v34  ;;  %6696 = vmatprep.subr.mxu0 %v10563_v34 }
 0x893   :  { %6676 = vmatpush3.msra.mxu1 %v6176_v0  ;;  %6697 = vmatpush3.msra.mxu0 %v5015_v40 }
 0x894   :  { %6677 = vmatprep.subr.mxu1 %v10563_v34  ;;  %6698 = vmatprep.subr.mxu0 %v10563_v34 }
 0x895   :  { %6678 = vmatpush3.msra.mxu1 %v6175_v30  ;;  %6699 = vmatpush3.msra.mxu0 %v5014_v18 }
 0x896   :  { %6705 = vmatprep.subr.mxu1 %v10563_v34  ;;  %6700 = vmatprep.subr.mxu0 %v10563_v34 }
 0x897   :  { %6701 = vmatpush3.msra.mxu0 %v5013_v6 }
 0x898   :  { %6716 = vmatprep.subr.mxu0 %v10563_v34 }
 0x941   :  { %v5094_v29 = vpop.f32.mrf.mxu0  ;;  %v5009_v63 = vpop.f32.mrf.mxu1 }
 0x942   :  { %6680 = vmatmul.mubr.msk.f32.vlgmr.msra.gmra.mxu1 %vm5109_vm11, %v5094_v29  ;;  %6703 = vmatmul.mubr.msk.f32.vlgmr.msra.gmra.mxu0 %vm5109_vm11, %v5009_v63 }
 0x943   :  { %6706 = vmatpush3.msra.mxu1 %v10124_v19  ;;  %6713 = vmatprep.mubr.msk.f32.mxu1 %vm6805_vm10, %v10563_v34  ;;  %v6658_v46 = vpop.f32.mrf.mxu0  ;;  %v6647_v35 = vpop.f32.mrf.mxu1 }
 0x944   :  { %6707 = vmatprep.subr.mxu1 %v10563_v34  ;;  %6717 = vmatpush3.msra.mxu0 %v6198_v57 }
 0x945   :  { %6708 = vmatpush3.msra.mxu1 %v10126_v45  ;;  %6718 = vmatprep.subr.mxu0 %v10563_v34 }
 0x946   :  { %6709 = vmatprep.subr.mxu1 %v10563_v34  ;;  %6719 = vmatpush3.msra.mxu0 %v6197_v27 }
 0x947   :  { %6710 = vmatpush3.msra.mxu1 %v10132_v59  ;;  %6720 = vmatprep.subr.mxu0 %v10563_v34 }
 0x948   :  { %6711 = vmatprep.subr.mxu1 %v10563_v34  ;;  %6721 = vmatpush3.msra.mxu0 %v6196_v44 }
 0x949   :  { %6712 = vmatpush3.msra.mxu1 %v10138_v62  ;;  %6722 = vmatprep.subr.mxu0 %v10563_v34 }
 0x94a   :  { %6714 = vmatmul.mubr.msk.f32.vlgmr.msra.gmra.mxu1 %vm4466_vm9, %v6187_v50  ;;  %6739 = vmatprep.subr.mxu1 %v10563_v34 }
 0x94b   :  { %6740 = vmatpush3.msra.mxu1 %v10124_v19  ;;  %6747 = vmatprep.mubr.msk.f32.mxu1 %vm6805_vm10, %v10563_v34  ;;  %v5590_v19 = vld [vmem:[%s10409_s17 + $0x30] sm:$0x3] }
 0x94c   :  { %6741 = vmatprep.subr.mxu1 %v10563_v34  ;;  %6723 = vmatpush3.msra.mxu0 %v6195_v42 }
 0x94d   :  { %6742 = vmatpush3.msra.mxu1 %v10126_v45  ;;  %6724 = vmatprep.subr.mxu0 %v10563_v34  ;;  %v5587_v45 = vld [vmem:[%s10409_s17 + $0x18] sm:$0xff] }
 0x94e   :  { %6743 = vmatprep.subr.mxu1 %v10563_v34  ;;  %6725 = vmatpush3.msra.mxu0 %v6194_v53 }
 0x94f   :  { %6744 = vmatpush3.msra.mxu1 %v10132_v59  ;;  %6726 = vmatprep.subr.mxu0 %v10563_v34  ;;  %v5586_v59 = vld [vmem:[%s10409_s17 + $0x10] sm:$0xff] }
 0x950   :  { %6745 = vmatprep.subr.mxu1 %v10563_v34  ;;  %6727 = vmatpush3.msra.mxu0 %v6193_v24 }
 0x951   :  { %6746 = vmatpush3.msra.mxu1 %v10138_v62  ;;  %6728 = vmatprep.subr.mxu0 %v10563_v34  ;;  %v5585_v62 = vld [vmem:[%s10409_s17 + $0x8] sm:$0xff] }
 0x952   :  { %6748 = vmatmul.mubr.msk.f32.vlgmr.msra.gmra.mxu1 %vm4466_vm9, %v6200_v60  ;;  %6750 = vmatprep.subr.mxu1 %v10563_v34 }
 0x953   :  { %6751 = vmatpush3.msra.mxu1 %v6211_v23  ;;  %6729 = vmatpush3.msra.mxu0 %v6192_v58 }
 0x954   :  { %6752 = vmatprep.subr.mxu1 %v10563_v34  ;;  %6730 = vmatprep.subr.mxu0 %v10563_v34 }
 0x955   :  { %6753 = vmatpush3.msra.mxu1 %v6210_v4  ;;  %6736 = vmatprep.mubr.msk.f32.mxu0 %vm6805_vm10, %v10563_v34 }
 0x956   :  { %6754 = vmatprep.subr.mxu1 %v10563_v34  ;;  %6770 = vmatprep.mubr.msk.f32.mxu1 %vm6805_vm10, %v10563_v34 }
 0x957   :  { %6755 = vmatpush3.msra.mxu1 %v6209_v41  ;;  %6731 = vmatpush3.msra.mxu0 %v6191_v48 }
 0x958   :  { %6756 = vmatprep.subr.mxu1 %v10563_v34  ;;  %6732 = vmatprep.subr.mxu0 %v10563_v34 }
 0x959   :  { %6757 = vmatpush3.msra.mxu1 %v6208_v5  ;;  %6733 = vmatpush3.msra.mxu0 %v6190_v15 }
 0x95a   :  { %6758 = vmatprep.subr.mxu1 %v10563_v34  ;;  %6734 = vmatprep.subr.mxu0 %v10563_v34 }
 0x95b   :  { %6759 = vmatpush3.msra.mxu1 %v6207_v12  ;;  %6735 = vmatpush3.msra.mxu0 %v6189_v25 }
 0x95c   :  { %6760 = vmatprep.subr.mxu1 %v10563_v34  ;;  %6773 = vmatprep.subr.mxu0 %v10563_v34 }
 0x95d   :  { %6761 = vmatpush3.msra.mxu1 %v6206_v43 }
 0x95e   :  { %6762 = vmatprep.subr.mxu1 %v10563_v34 }
 0x95f   :  { %6763 = vmatpush3.msra.mxu1 %v6205_v21 }
 0x960   :  { %6764 = vmatprep.subr.mxu1 %v10563_v34 }
 0x961   :  { %6765 = vmatpush3.msra.mxu1 %v6204_v10 }
 0x962   :  { %6766 = vmatprep.subr.mxu1 %v10563_v34 }
 0x963   :  { %6767 = vmatpush3.msra.mxu1 %v6203_v20 }
 0x964   :  { %6768 = vmatprep.subr.mxu1 %v10563_v34 }
 0x965   :  { %6769 = vmatpush3.msra.mxu1 %v6202_v51 }
 0xa02   :  { %v5179_v14 = vpop.f32.mrf.mxu1  ;;  %v5252_v49 = vpop.f32.mrf.mxu0 }
 0xa03   :  { %v5253_v32 = vadd.f32 %v5252_v49, %v5179_v14 }
 0xa04   :  { %v6681_v7 = vpop.f32.mrf.mxu1  ;;  %v6704_v55 = vpop.f32.mrf.mxu0 }
 0xa0a   :  { %v5327_v2 = vpop.f32.mrf.mxu1 }
 0xa0b   :  { %6737 = vmatmul.mubr.msk.f32.vlgmr.msra.gmra.mxu0 %vm5109_vm11, %v5327_v2 }
 0xa0c   :  { %v6715_v39 = vpop.f32.mrf.mxu1  ;;  %6787 = vmatprep.mubr.msk.f32.mxu0 %vm6805_vm10, %v10563_v34  ;;  %6774 = vmatpush3.msk.msra.mxu0 %vm5602_vm12, %v5590_v19 }
 0xa0d   :  { %6775 = vmatprep.subr.mxu0 %v10563_v34 }
 0xa0e   :  { %6776 = vmatpush3.msra.mxu0 %v5589_v47 }
 0xa0f   :  { %6777 = vmatprep.subr.mxu0 %v10563_v34 }
 0xa10   :  { %6778 = vmatpush3.msra.mxu0 %v5588_v28 }
 0xa11   :  { %6779 = vmatprep.subr.mxu0 %v10563_v34 }
 0xa12   :  { %v5487_v54 = vpop.f32.mrf.mxu1  ;;  %6780 = vmatpush3.msra.mxu0 %v5587_v45 }
 0xa13   :  { %6771 = vmatmul.mubr.msk.f32.vlgmr.msra.gmra.mxu1 %vm5109_vm11, %v5487_v54  ;;  %6781 = vmatprep.subr.mxu0 %v10563_v34 }
 0xa14   :  { %v6749_v3 = vpop.f32.mrf.mxu1  ;;  %6782 = vmatpush3.msra.mxu0 %v5586_v59 }
 0xa15   :  { %6783 = vmatprep.subr.mxu0 %v10563_v34 }
 0xa16   :  { %6784 = vmatpush3.msra.mxu0 %v5585_v62 }
 0xa17   :  { %6785 = vmatprep.subr.mxu0 %v10563_v34 }
 0xa18   :  { %6786 = vmatpush3.msra.mxu0 %v5584_v22 }
 0xacb   :  { %v5411_v9 = vpop.f32.mrf.mxu0 }
 0xacc   :  { %v5415_v16 = vadd.f32 %v5411_v9, %v5253_v32 }
 0xacd   :  { %v6738_v61 = vpop.f32.mrf.mxu0 }
 0xad3   :  { %v5571_v37 = vpop.f32.mrf.mxu1 }
 0xad4   :  { %v5575_v26 = vadd.f32 %v5571_v37, %v5415_v16 }
 0xad5   :  { %v6772_v36 = vpop.f32.mrf.mxu1 }
 0xad6   :  { %v5583_v8 = vadd.f32 %v6213_v11, %v5575_v26 }
 0xad8   :  { %6788 = vmatmul.mubr.msk.f32.vlgmr.msra.gmra.mxu0 %vm5598_vm13, %v5583_v8 }
 0xb98   :  { %v5672_v0 = vpop.f32.mrf.mxu0 }
 0xb99   :  { %v5673_v34 = vadd.f32 %v6214_v52, %v5672_v0 }
 0xb9a   :  { %v6789_v30 = vpop.f32.mrf.mxu0 }
 0xb9b   :  { %5677 = vst.msk [vmem:[%s10412_s19] sm:$0xff] %vm5676_vm14, %v5673_v34 }

</bundles_post_ra>
